<compile_context>
chip_gen: v6e
topology: v6e:2x2x1
jax: 0.10.0
libtpu: 0.0.40
codegen_flags: <defaults>
</compile_context>

<pallas_src>
import jax
import jax.numpy as jnp
from jax.experimental import pallas as pl
from jax.experimental.pallas import tpu as pltpu

KH = KW = 7
PAD = 3


# ----------------------------- Pallas kernel --------------------------------

def spatial_attn_kernel(x_ref, w_ref, b_ref, o_ref, pad_ref):
    # x_ref  : (N, C, H, W)               VMEM  whole batch (NCHW)
    # w_ref  : (2*KH*KW,) = (98,)         SMEM  conv weights, (c, kh, kw) order
    # b_ref  : (1,)                       SMEM  conv bias
    # o_ref  : (N, H, W)                  VMEM  sigmoid(conv(...)) output
    # pad_ref: (2, N, H+2*PAD, W+2*PAD)   VMEM  zero-padded pooled maps
    N, C, H, W = x_ref.shape

    # Fused single-pass channel mean + max: each channel slice is read once.
    xc = x_ref[:, 0, :, :]                            # (N, H, W)
    s = xc
    mx = xc
    for c in range(1, C):
        xc = x_ref[:, c, :, :]
        s = s + xc
        mx = jnp.maximum(mx, xc)
    avg = s * (1.0 / C)

    # Zero-pad both pooled maps in VMEM.  Single grid step => zeroed exactly
    # once per call; the interior is fully overwritten right below.
    pad_ref[...] = jnp.zeros(pad_ref.shape, jnp.float32)
    pad_ref[0, :, PAD:PAD + H, PAD:PAD + W] = avg
    pad_ref[1, :, PAD:PAD + H, PAD:PAD + W] = mx

    # Direct 7x7 conv over all N samples at once: 98 scalar-weight FMAs on
    # (N, H, W) tiles.  Four independent accumulators break the 98-long add
    # dependence chain; acc[0] starts at the bias so no epilogue add.
    accs = [jnp.full((N, H, W), b_ref[0], jnp.float32)] + \
           [jnp.zeros((N, H, W), jnp.float32) for _ in range(3)]
    for c in range(2):
        for kh in range(KH):
            strip = pad_ref[c, :, kh:kh + H, :]             # (N, H, W + 2*PAD)
            for kw in range(KW):
                wv = w_ref[c * KH * KW + kh * KW + kw]      # SMEM scalar
                a = (c * KH + kh) % 4
                accs[a] = accs[a] + wv * strip[:, :, kw:kw + W]
    acc = (accs[0] + accs[1]) + (accs[2] + accs[3])

    # Numerically-safe sigmoid (exp on the otherwise-idle EUP slot).
    o_ref[...] = jax.nn.sigmoid(acc)


# ----------------------------- Pallas wrapper --------------------------------

def spatial_attention(x_nchw, w_oihw, bias):
    N, C, H, W = x_nchw.shape
    # OIHW (1, 2, 7, 7) -> flat (98,), index = c*49 + kh*7 + kw (O squeezed).
    w_flat = w_oihw.reshape(-1).astype(jnp.float32)
    out = pl.pallas_call(
        spatial_attn_kernel,
        out_shape=jax.ShapeDtypeStruct((N, H, W), jnp.float32),
        in_specs=[
            pl.BlockSpec(memory_space=pltpu.MemorySpace.VMEM),   # x (whole batch)
            pl.BlockSpec(memory_space=pltpu.MemorySpace.SMEM),   # weights
            pl.BlockSpec(memory_space=pltpu.MemorySpace.SMEM),   # bias
        ],
        out_specs=pl.BlockSpec(memory_space=pltpu.MemorySpace.VMEM),
        scratch_shapes=[
            pltpu.VMEM((2, N, H + 2 * PAD, W + 2 * PAD), jnp.float32),
        ],
    )(x_nchw.astype(jnp.float32), w_flat, bias.astype(jnp.float32))
    # (N, H, W) -> (N, 1, H, W): contiguous, metadata-only reshape.
    return out.reshape(N, 1, H, W)


# ---------------------------- Pure-JAX reference ------------------------------

def ref_forward(x, w_oihw, bias):
    avg = jnp.mean(x, axis=1, keepdims=True)
    mx = jnp.max(x, axis=1, keepdims=True)
    cat = jnp.concatenate([avg, mx], axis=1)            # (N, 2, H, W)
    y = jax.lax.conv_general_dilated(
        cat, w_oihw, window_strides=(1, 1),
        padding=((PAD, PAD), (PAD, PAD)),
        dimension_numbers=("NCHW", "OIHW", "NCHW"))
    y = y + bias.reshape(1, -1, 1, 1)
    return jax.nn.sigmoid(y)


# ----------------------------------- main -------------------------------------

if __name__ == "__main__":
    key = jax.random.PRNGKey(0)
    kx, kw, kb = jax.random.split(key, 3)

    N, C, H, W = 2, 4, 16, 16
    x = jax.random.normal(kx, (N, C, H, W), jnp.float32)          # NCHW input
    w = 0.1 * jax.random.normal(kw, (1, 2, KH, KW), jnp.float32)  # OIHW conv weight
    b = 0.1 * jax.random.normal(kb, (1,), jnp.float32)            # conv bias

    out = jax.block_until_ready(spatial_attention(x, w, b))
    ref = jax.block_until_ready(ref_forward(x, w, b))

    assert out.shape == (N, 1, H, W)
    assert jnp.allclose(out, ref, rtol=1e-4, atol=1e-4), \
        f"max err {jnp.max(jnp.abs(out - ref))}"
    print("KERNEL_OK")
</pallas_src>

<mosaic_0001>
module attributes {stable_mosaic.version = 11 : i64} {
  func.func @spatial_attn_kernel(%arg0: memref<2x4x16x16xf32, #tpu.memory_space<vmem>>, %arg1: memref<98xf32, #tpu.memory_space<smem>>, %arg2: memref<1xf32, #tpu.memory_space<smem>>, %arg3: memref<2x16x16xf32, #tpu.memory_space<vmem>>, %arg4: memref<2x2x22x22xf32, #tpu.memory_space<vmem>>) attributes {dimension_semantics = [], scalar_prefetch = 0 : i64, scratch_operands = 1 : i64, tpu.core_type = #tpu.core_type<tc>} {
    %c0 = arith.constant 0 : index
    %c0_0 = arith.constant 0 : index
    %c0_1 = arith.constant 0 : index
    %c0_2 = arith.constant 0 : index
    %0 = vector.load %arg0[%c0, %c0_0, %c0_1, %c0_2] : memref<2x4x16x16xf32, #tpu.memory_space<vmem>>, vector<2x1x16x16xf32>
    %1 = vector.shape_cast %0 : vector<2x1x16x16xf32> to vector<2x16x16xf32>
    %c0_3 = arith.constant 0 : index
    %c1 = arith.constant 1 : index
    %c0_4 = arith.constant 0 : index
    %c0_5 = arith.constant 0 : index
    %2 = vector.load %arg0[%c0_3, %c1, %c0_4, %c0_5] : memref<2x4x16x16xf32, #tpu.memory_space<vmem>>, vector<2x1x16x16xf32>
    %3 = vector.shape_cast %2 : vector<2x1x16x16xf32> to vector<2x16x16xf32>
    %4 = arith.addf %1, %3 : vector<2x16x16xf32>
    %5 = arith.maximumf %1, %3 : vector<2x16x16xf32>
    %c0_6 = arith.constant 0 : index
    %c2 = arith.constant 2 : index
    %c0_7 = arith.constant 0 : index
    %c0_8 = arith.constant 0 : index
    %6 = vector.load %arg0[%c0_6, %c2, %c0_7, %c0_8] : memref<2x4x16x16xf32, #tpu.memory_space<vmem>>, vector<2x1x16x16xf32>
    %7 = vector.shape_cast %6 : vector<2x1x16x16xf32> to vector<2x16x16xf32>
    %8 = arith.addf %4, %7 : vector<2x16x16xf32>
    %9 = arith.maximumf %5, %7 : vector<2x16x16xf32>
    %c0_9 = arith.constant 0 : index
    %c3 = arith.constant 3 : index
    %c0_10 = arith.constant 0 : index
    %c0_11 = arith.constant 0 : index
    %10 = vector.load %arg0[%c0_9, %c3, %c0_10, %c0_11] : memref<2x4x16x16xf32, #tpu.memory_space<vmem>>, vector<2x1x16x16xf32>
    %11 = vector.shape_cast %10 : vector<2x1x16x16xf32> to vector<2x16x16xf32>
    %12 = arith.addf %8, %11 : vector<2x16x16xf32>
    %13 = arith.maximumf %9, %11 : vector<2x16x16xf32>
    %cst = arith.constant 2.500000e-01 : f32
    %14 = vector.broadcast %cst : f32 to vector<2x16x16xf32>
    %15 = arith.mulf %12, %14 : vector<2x16x16xf32>
    %cst_12 = arith.constant 0.000000e+00 : f32
    %16 = vector.broadcast %cst_12 : f32 to vector<2x2x22x22xf32>
    %c0_13 = arith.constant 0 : index
    %c0_14 = arith.constant 0 : index
    %c0_15 = arith.constant 0 : index
    %c0_16 = arith.constant 0 : index
    %17 = vector.load %arg4[%c0_13, %c0_14, %c0_15, %c0_16] : memref<2x2x22x22xf32, #tpu.memory_space<vmem>>, vector<2x2x22x22xf32>
    tpu.vector_store %arg4[%c0_13, %c0_14, %c0_15, %c0_16], %16 {strides = array<i32>} : memref<2x2x22x22xf32, #tpu.memory_space<vmem>>, vector<2x2x22x22xf32>,
    %c0_17 = arith.constant 0 : index
    %c0_18 = arith.constant 0 : index
    %c3_19 = arith.constant 3 : index
    %c3_20 = arith.constant 3 : index
    %18 = vector.load %arg4[%c0_17, %c0_18, %c3_19, %c3_20] : memref<2x2x22x22xf32, #tpu.memory_space<vmem>>, vector<1x2x16x16xf32>
    %19 = vector.shape_cast %18 : vector<1x2x16x16xf32> to vector<2x16x16xf32>
    %20 = vector.shape_cast %15 : vector<2x16x16xf32> to vector<1x2x16x16xf32>
    tpu.vector_store %arg4[%c0_17, %c0_18, %c3_19, %c3_20], %20 {strides = array<i32>} : memref<2x2x22x22xf32, #tpu.memory_space<vmem>>, vector<1x2x16x16xf32>,
    %c1_21 = arith.constant 1 : index
    %c0_22 = arith.constant 0 : index
    %c3_23 = arith.constant 3 : index
    %c3_24 = arith.constant 3 : index
    %21 = vector.load %arg4[%c1_21, %c0_22, %c3_23, %c3_24] : memref<2x2x22x22xf32, #tpu.memory_space<vmem>>, vector<1x2x16x16xf32>
    %22 = vector.shape_cast %21 : vector<1x2x16x16xf32> to vector<2x16x16xf32>
    %23 = vector.shape_cast %13 : vector<2x16x16xf32> to vector<1x2x16x16xf32>
    tpu.vector_store %arg4[%c1_21, %c0_22, %c3_23, %c3_24], %23 {strides = array<i32>} : memref<2x2x22x22xf32, #tpu.memory_space<vmem>>, vector<1x2x16x16xf32>,
    %c0_25 = arith.constant 0 : index
    %24 = memref.load %arg2[%c0_25] : memref<1xf32, #tpu.memory_space<smem>>
    %25 = vector.broadcast %24 : f32 to vector<2x16x16xf32>
    %cst_26 = arith.constant 0.000000e+00 : f32
    %26 = vector.broadcast %cst_26 : f32 to vector<2x16x16xf32>
    %cst_27 = arith.constant 0.000000e+00 : f32
    %27 = vector.broadcast %cst_27 : f32 to vector<2x16x16xf32>
    %cst_28 = arith.constant 0.000000e+00 : f32
    %28 = vector.broadcast %cst_28 : f32 to vector<2x16x16xf32>
    %c0_29 = arith.constant 0 : index
    %c0_30 = arith.constant 0 : index
    %c0_31 = arith.constant 0 : index
    %c0_32 = arith.constant 0 : index
    %29 = vector.load %arg4[%c0_29, %c0_30, %c0_31, %c0_32] : memref<2x2x22x22xf32, #tpu.memory_space<vmem>>, vector<1x2x16x22xf32>
    %30 = vector.shape_cast %29 : vector<1x2x16x22xf32> to vector<2x16x22xf32>
    %c0_33 = arith.constant 0 : index
    %31 = memref.load %arg1[%c0_33] : memref<98xf32, #tpu.memory_space<smem>>
    %32 = vector.extract_strided_slice %30 {offsets = [0, 0, 0], sizes = [2, 16, 16], strides = [1, 1, 1]} : vector<2x16x22xf32> to vector<2x16x16xf32>
    %33 = vector.broadcast %31 : f32 to vector<2x16x16xf32>
    %34 = arith.mulf %33, %32 : vector<2x16x16xf32>
    %35 = arith.addf %25, %34 : vector<2x16x16xf32>
    %c1_34 = arith.constant 1 : index
    %36 = memref.load %arg1[%c1_34] : memref<98xf32, #tpu.memory_space<smem>>
    %37 = vector.extract_strided_slice %30 {offsets = [0, 0, 1], sizes = [2, 16, 16], strides = [1, 1, 1]} : vector<2x16x22xf32> to vector<2x16x16xf32>
    %38 = vector.broadcast %36 : f32 to vector<2x16x16xf32>
    %39 = arith.mulf %38, %37 : vector<2x16x16xf32>
    %40 = arith.addf %35, %39 : vector<2x16x16xf32>
    %c2_35 = arith.constant 2 : index
    %41 = memref.load %arg1[%c2_35] : memref<98xf32, #tpu.memory_space<smem>>
    %42 = vector.extract_strided_slice %30 {offsets = [0, 0, 2], sizes = [2, 16, 16], strides = [1, 1, 1]} : vector<2x16x22xf32> to vector<2x16x16xf32>
    %43 = vector.broadcast %41 : f32 to vector<2x16x16xf32>
    %44 = arith.mulf %43, %42 : vector<2x16x16xf32>
    %45 = arith.addf %40, %44 : vector<2x16x16xf32>
    %c3_36 = arith.constant 3 : index
    %46 = memref.load %arg1[%c3_36] : memref<98xf32, #tpu.memory_space<smem>>
    %47 = vector.extract_strided_slice %30 {offsets = [0, 0, 3], sizes = [2, 16, 16], strides = [1, 1, 1]} : vector<2x16x22xf32> to vector<2x16x16xf32>
    %48 = vector.broadcast %46 : f32 to vector<2x16x16xf32>
    %49 = arith.mulf %48, %47 : vector<2x16x16xf32>
    %50 = arith.addf %45, %49 : vector<2x16x16xf32>
    %c4 = arith.constant 4 : index
    %51 = memref.load %arg1[%c4] : memref<98xf32, #tpu.memory_space<smem>>
    %52 = vector.extract_strided_slice %30 {offsets = [0, 0, 4], sizes = [2, 16, 16], strides = [1, 1, 1]} : vector<2x16x22xf32> to vector<2x16x16xf32>
    %53 = vector.broadcast %51 : f32 to vector<2x16x16xf32>
    %54 = arith.mulf %53, %52 : vector<2x16x16xf32>
    %55 = arith.addf %50, %54 : vector<2x16x16xf32>
    %c5 = arith.constant 5 : index
    %56 = memref.load %arg1[%c5] : memref<98xf32, #tpu.memory_space<smem>>
    %57 = vector.extract_strided_slice %30 {offsets = [0, 0, 5], sizes = [2, 16, 16], strides = [1, 1, 1]} : vector<2x16x22xf32> to vector<2x16x16xf32>
    %58 = vector.broadcast %56 : f32 to vector<2x16x16xf32>
    %59 = arith.mulf %58, %57 : vector<2x16x16xf32>
    %60 = arith.addf %55, %59 : vector<2x16x16xf32>
    %c6 = arith.constant 6 : index
    %61 = memref.load %arg1[%c6] : memref<98xf32, #tpu.memory_space<smem>>
    %62 = vector.extract_strided_slice %30 {offsets = [0, 0, 6], sizes = [2, 16, 16], strides = [1, 1, 1]} : vector<2x16x22xf32> to vector<2x16x16xf32>
    %63 = vector.broadcast %61 : f32 to vector<2x16x16xf32>
    %64 = arith.mulf %63, %62 : vector<2x16x16xf32>
    %65 = arith.addf %60, %64 : vector<2x16x16xf32>
    %c0_37 = arith.constant 0 : index
    %c0_38 = arith.constant 0 : index
    %c1_39 = arith.constant 1 : index
    %c0_40 = arith.constant 0 : index
    %66 = vector.load %arg4[%c0_37, %c0_38, %c1_39, %c0_40] : memref<2x2x22x22xf32, #tpu.memory_space<vmem>>, vector<1x2x16x22xf32>
    %67 = vector.shape_cast %66 : vector<1x2x16x22xf32> to vector<2x16x22xf32>
    %c7 = arith.constant 7 : index
    %68 = memref.load %arg1[%c7] : memref<98xf32, #tpu.memory_space<smem>>
    %69 = vector.extract_strided_slice %67 {offsets = [0, 0, 0], sizes = [2, 16, 16], strides = [1, 1, 1]} : vector<2x16x22xf32> to vector<2x16x16xf32>
    %70 = vector.broadcast %68 : f32 to vector<2x16x16xf32>
    %71 = arith.mulf %70, %69 : vector<2x16x16xf32>
    %72 = arith.addf %26, %71 : vector<2x16x16xf32>
    %c8 = arith.constant 8 : index
    %73 = memref.load %arg1[%c8] : memref<98xf32, #tpu.memory_space<smem>>
    %74 = vector.extract_strided_slice %67 {offsets = [0, 0, 1], sizes = [2, 16, 16], strides = [1, 1, 1]} : vector<2x16x22xf32> to vector<2x16x16xf32>
    %75 = vector.broadcast %73 : f32 to vector<2x16x16xf32>
    %76 = arith.mulf %75, %74 : vector<2x16x16xf32>
    %77 = arith.addf %72, %76 : vector<2x16x16xf32>
    %c9 = arith.constant 9 : index
    %78 = memref.load %arg1[%c9] : memref<98xf32, #tpu.memory_space<smem>>
    %79 = vector.extract_strided_slice %67 {offsets = [0, 0, 2], sizes = [2, 16, 16], strides = [1, 1, 1]} : vector<2x16x22xf32> to vector<2x16x16xf32>
    %80 = vector.broadcast %78 : f32 to vector<2x16x16xf32>
    %81 = arith.mulf %80, %79 : vector<2x16x16xf32>
    %82 = arith.addf %77, %81 : vector<2x16x16xf32>
    %c10 = arith.constant 10 : index
    %83 = memref.load %arg1[%c10] : memref<98xf32, #tpu.memory_space<smem>>
    %84 = vector.extract_strided_slice %67 {offsets = [0, 0, 3], sizes = [2, 16, 16], strides = [1, 1, 1]} : vector<2x16x22xf32> to vector<2x16x16xf32>
    %85 = vector.broadcast %83 : f32 to vector<2x16x16xf32>
    %86 = arith.mulf %85, %84 : vector<2x16x16xf32>
    %87 = arith.addf %82, %86 : vector<2x16x16xf32>
    %c11 = arith.constant 11 : index
    %88 = memref.load %arg1[%c11] : memref<98xf32, #tpu.memory_space<smem>>
    %89 = vector.extract_strided_slice %67 {offsets = [0, 0, 4], sizes = [2, 16, 16], strides = [1, 1, 1]} : vector<2x16x22xf32> to vector<2x16x16xf32>
    %90 = vector.broadcast %88 : f32 to vector<2x16x16xf32>
    %91 = arith.mulf %90, %89 : vector<2x16x16xf32>
    %92 = arith.addf %87, %91 : vector<2x16x16xf32>
    %c12 = arith.constant 12 : index
    %93 = memref.load %arg1[%c12] : memref<98xf32, #tpu.memory_space<smem>>
    %94 = vector.extract_strided_slice %67 {offsets = [0, 0, 5], sizes = [2, 16, 16], strides = [1, 1, 1]} : vector<2x16x22xf32> to vector<2x16x16xf32>
    %95 = vector.broadcast %93 : f32 to vector<2x16x16xf32>
    %96 = arith.mulf %95, %94 : vector<2x16x16xf32>
    %97 = arith.addf %92, %96 : vector<2x16x16xf32>
    %c13 = arith.constant 13 : index
    %98 = memref.load %arg1[%c13] : memref<98xf32, #tpu.memory_space<smem>>
    %99 = vector.extract_strided_slice %67 {offsets = [0, 0, 6], sizes = [2, 16, 16], strides = [1, 1, 1]} : vector<2x16x22xf32> to vector<2x16x16xf32>
    %100 = vector.broadcast %98 : f32 to vector<2x16x16xf32>
    %101 = arith.mulf %100, %99 : vector<2x16x16xf32>
    %102 = arith.addf %97, %101 : vector<2x16x16xf32>
    %c0_41 = arith.constant 0 : index
    %c0_42 = arith.constant 0 : index
    %c2_43 = arith.constant 2 : index
    %c0_44 = arith.constant 0 : index
    %103 = vector.load %arg4[%c0_41, %c0_42, %c2_43, %c0_44] : memref<2x2x22x22xf32, #tpu.memory_space<vmem>>, vector<1x2x16x22xf32>
    %104 = vector.shape_cast %103 : vector<1x2x16x22xf32> to vector<2x16x22xf32>
    %c14 = arith.constant 14 : index
    %105 = memref.load %arg1[%c14] : memref<98xf32, #tpu.memory_space<smem>>
    %106 = vector.extract_strided_slice %104 {offsets = [0, 0, 0], sizes = [2, 16, 16], strides = [1, 1, 1]} : vector<2x16x22xf32> to vector<2x16x16xf32>
    %107 = vector.broadcast %105 : f32 to vector<2x16x16xf32>
    %108 = arith.mulf %107, %106 : vector<2x16x16xf32>
    %109 = arith.addf %27, %108 : vector<2x16x16xf32>
    %c15 = arith.constant 15 : index
    %110 = memref.load %arg1[%c15] : memref<98xf32, #tpu.memory_space<smem>>
    %111 = vector.extract_strided_slice %104 {offsets = [0, 0, 1], sizes = [2, 16, 16], strides = [1, 1, 1]} : vector<2x16x22xf32> to vector<2x16x16xf32>
    %112 = vector.broadcast %110 : f32 to vector<2x16x16xf32>
    %113 = arith.mulf %112, %111 : vector<2x16x16xf32>
    %114 = arith.addf %109, %113 : vector<2x16x16xf32>
    %c16 = arith.constant 16 : index
    %115 = memref.load %arg1[%c16] : memref<98xf32, #tpu.memory_space<smem>>
    %116 = vector.extract_strided_slice %104 {offsets = [0, 0, 2], sizes = [2, 16, 16], strides = [1, 1, 1]} : vector<2x16x22xf32> to vector<2x16x16xf32>
    %117 = vector.broadcast %115 : f32 to vector<2x16x16xf32>
    %118 = arith.mulf %117, %116 : vector<2x16x16xf32>
    %119 = arith.addf %114, %118 : vector<2x16x16xf32>
    %c17 = arith.constant 17 : index
    %120 = memref.load %arg1[%c17] : memref<98xf32, #tpu.memory_space<smem>>
    %121 = vector.extract_strided_slice %104 {offsets = [0, 0, 3], sizes = [2, 16, 16], strides = [1, 1, 1]} : vector<2x16x22xf32> to vector<2x16x16xf32>
    %122 = vector.broadcast %120 : f32 to vector<2x16x16xf32>
    %123 = arith.mulf %122, %121 : vector<2x16x16xf32>
    %124 = arith.addf %119, %123 : vector<2x16x16xf32>
    %c18 = arith.constant 18 : index
    %125 = memref.load %arg1[%c18] : memref<98xf32, #tpu.memory_space<smem>>
    %126 = vector.extract_strided_slice %104 {offsets = [0, 0, 4], sizes = [2, 16, 16], strides = [1, 1, 1]} : vector<2x16x22xf32> to vector<2x16x16xf32>
    %127 = vector.broadcast %125 : f32 to vector<2x16x16xf32>
    %128 = arith.mulf %127, %126 : vector<2x16x16xf32>
    %129 = arith.addf %124, %128 : vector<2x16x16xf32>
    %c19 = arith.constant 19 : index
    %130 = memref.load %arg1[%c19] : memref<98xf32, #tpu.memory_space<smem>>
    %131 = vector.extract_strided_slice %104 {offsets = [0, 0, 5], sizes = [2, 16, 16], strides = [1, 1, 1]} : vector<2x16x22xf32> to vector<2x16x16xf32>
    %132 = vector.broadcast %130 : f32 to vector<2x16x16xf32>
    %133 = arith.mulf %132, %131 : vector<2x16x16xf32>
    %134 = arith.addf %129, %133 : vector<2x16x16xf32>
    %c20 = arith.constant 20 : index
    %135 = memref.load %arg1[%c20] : memref<98xf32, #tpu.memory_space<smem>>
    %136 = vector.extract_strided_slice %104 {offsets = [0, 0, 6], sizes = [2, 16, 16], strides = [1, 1, 1]} : vector<2x16x22xf32> to vector<2x16x16xf32>
    %137 = vector.broadcast %135 : f32 to vector<2x16x16xf32>
    %138 = arith.mulf %137, %136 : vector<2x16x16xf32>
    %139 = arith.addf %134, %138 : vector<2x16x16xf32>
    %c0_45 = arith.constant 0 : index
    %c0_46 = arith.constant 0 : index
    %c3_47 = arith.constant 3 : index
    %c0_48 = arith.constant 0 : index
    %140 = vector.load %arg4[%c0_45, %c0_46, %c3_47, %c0_48] : memref<2x2x22x22xf32, #tpu.memory_space<vmem>>, vector<1x2x16x22xf32>
    %141 = vector.shape_cast %140 : vector<1x2x16x22xf32> to vector<2x16x22xf32>
    %c21 = arith.constant 21 : index
    %142 = memref.load %arg1[%c21] : memref<98xf32, #tpu.memory_space<smem>>
    %143 = vector.extract_strided_slice %141 {offsets = [0, 0, 0], sizes = [2, 16, 16], strides = [1, 1, 1]} : vector<2x16x22xf32> to vector<2x16x16xf32>
    %144 = vector.broadcast %142 : f32 to vector<2x16x16xf32>
    %145 = arith.mulf %144, %143 : vector<2x16x16xf32>
    %146 = arith.addf %28, %145 : vector<2x16x16xf32>
    %c22 = arith.constant 22 : index
    %147 = memref.load %arg1[%c22] : memref<98xf32, #tpu.memory_space<smem>>
    %148 = vector.extract_strided_slice %141 {offsets = [0, 0, 1], sizes = [2, 16, 16], strides = [1, 1, 1]} : vector<2x16x22xf32> to vector<2x16x16xf32>
    %149 = vector.broadcast %147 : f32 to vector<2x16x16xf32>
    %150 = arith.mulf %149, %148 : vector<2x16x16xf32>
    %151 = arith.addf %146, %150 : vector<2x16x16xf32>
    %c23 = arith.constant 23 : index
    %152 = memref.load %arg1[%c23] : memref<98xf32, #tpu.memory_space<smem>>
    %153 = vector.extract_strided_slice %141 {offsets = [0, 0, 2], sizes = [2, 16, 16], strides = [1, 1, 1]} : vector<2x16x22xf32> to vector<2x16x16xf32>
    %154 = vector.broadcast %152 : f32 to vector<2x16x16xf32>
    %155 = arith.mulf %154, %153 : vector<2x16x16xf32>
    %156 = arith.addf %151, %155 : vector<2x16x16xf32>
    %c24 = arith.constant 24 : index
    %157 = memref.load %arg1[%c24] : memref<98xf32, #tpu.memory_space<smem>>
    %158 = vector.extract_strided_slice %141 {offsets = [0, 0, 3], sizes = [2, 16, 16], strides = [1, 1, 1]} : vector<2x16x22xf32> to vector<2x16x16xf32>
    %159 = vector.broadcast %157 : f32 to vector<2x16x16xf32>
    %160 = arith.mulf %159, %158 : vector<2x16x16xf32>
    %161 = arith.addf %156, %160 : vector<2x16x16xf32>
    %c25 = arith.constant 25 : index
    %162 = memref.load %arg1[%c25] : memref<98xf32, #tpu.memory_space<smem>>
    %163 = vector.extract_strided_slice %141 {offsets = [0, 0, 4], sizes = [2, 16, 16], strides = [1, 1, 1]} : vector<2x16x22xf32> to vector<2x16x16xf32>
    %164 = vector.broadcast %162 : f32 to vector<2x16x16xf32>
    %165 = arith.mulf %164, %163 : vector<2x16x16xf32>
    %166 = arith.addf %161, %165 : vector<2x16x16xf32>
    %c26 = arith.constant 26 : index
    %167 = memref.load %arg1[%c26] : memref<98xf32, #tpu.memory_space<smem>>
    %168 = vector.extract_strided_slice %141 {offsets = [0, 0, 5], sizes = [2, 16, 16], strides = [1, 1, 1]} : vector<2x16x22xf32> to vector<2x16x16xf32>
    %169 = vector.broadcast %167 : f32 to vector<2x16x16xf32>
    %170 = arith.mulf %169, %168 : vector<2x16x16xf32>
    %171 = arith.addf %166, %170 : vector<2x16x16xf32>
    %c27 = arith.constant 27 : index
    %172 = memref.load %arg1[%c27] : memref<98xf32, #tpu.memory_space<smem>>
    %173 = vector.extract_strided_slice %141 {offsets = [0, 0, 6], sizes = [2, 16, 16], strides = [1, 1, 1]} : vector<2x16x22xf32> to vector<2x16x16xf32>
    %174 = vector.broadcast %172 : f32 to vector<2x16x16xf32>
    %175 = arith.mulf %174, %173 : vector<2x16x16xf32>
    %176 = arith.addf %171, %175 : vector<2x16x16xf32>
    %c0_49 = arith.constant 0 : index
    %c0_50 = arith.constant 0 : index
    %c4_51 = arith.constant 4 : index
    %c0_52 = arith.constant 0 : index
    %177 = vector.load %arg4[%c0_49, %c0_50, %c4_51, %c0_52] : memref<2x2x22x22xf32, #tpu.memory_space<vmem>>, vector<1x2x16x22xf32>
    %178 = vector.shape_cast %177 : vector<1x2x16x22xf32> to vector<2x16x22xf32>
    %c28 = arith.constant 28 : index
    %179 = memref.load %arg1[%c28] : memref<98xf32, #tpu.memory_space<smem>>
    %180 = vector.extract_strided_slice %178 {offsets = [0, 0, 0], sizes = [2, 16, 16], strides = [1, 1, 1]} : vector<2x16x22xf32> to vector<2x16x16xf32>
    %181 = vector.broadcast %179 : f32 to vector<2x16x16xf32>
    %182 = arith.mulf %181, %180 : vector<2x16x16xf32>
    %183 = arith.addf %65, %182 : vector<2x16x16xf32>
    %c29 = arith.constant 29 : index
    %184 = memref.load %arg1[%c29] : memref<98xf32, #tpu.memory_space<smem>>
    %185 = vector.extract_strided_slice %178 {offsets = [0, 0, 1], sizes = [2, 16, 16], strides = [1, 1, 1]} : vector<2x16x22xf32> to vector<2x16x16xf32>
    %186 = vector.broadcast %184 : f32 to vector<2x16x16xf32>
    %187 = arith.mulf %186, %185 : vector<2x16x16xf32>
    %188 = arith.addf %183, %187 : vector<2x16x16xf32>
    %c30 = arith.constant 30 : index
    %189 = memref.load %arg1[%c30] : memref<98xf32, #tpu.memory_space<smem>>
    %190 = vector.extract_strided_slice %178 {offsets = [0, 0, 2], sizes = [2, 16, 16], strides = [1, 1, 1]} : vector<2x16x22xf32> to vector<2x16x16xf32>
    %191 = vector.broadcast %189 : f32 to vector<2x16x16xf32>
    %192 = arith.mulf %191, %190 : vector<2x16x16xf32>
    %193 = arith.addf %188, %192 : vector<2x16x16xf32>
    %c31 = arith.constant 31 : index
    %194 = memref.load %arg1[%c31] : memref<98xf32, #tpu.memory_space<smem>>
    %195 = vector.extract_strided_slice %178 {offsets = [0, 0, 3], sizes = [2, 16, 16], strides = [1, 1, 1]} : vector<2x16x22xf32> to vector<2x16x16xf32>
    %196 = vector.broadcast %194 : f32 to vector<2x16x16xf32>
    %197 = arith.mulf %196, %195 : vector<2x16x16xf32>
    %198 = arith.addf %193, %197 : vector<2x16x16xf32>
    %c32 = arith.constant 32 : index
    %199 = memref.load %arg1[%c32] : memref<98xf32, #tpu.memory_space<smem>>
    %200 = vector.extract_strided_slice %178 {offsets = [0, 0, 4], sizes = [2, 16, 16], strides = [1, 1, 1]} : vector<2x16x22xf32> to vector<2x16x16xf32>
    %201 = vector.broadcast %199 : f32 to vector<2x16x16xf32>
    %202 = arith.mulf %201, %200 : vector<2x16x16xf32>
    %203 = arith.addf %198, %202 : vector<2x16x16xf32>
    %c33 = arith.constant 33 : index
    %204 = memref.load %arg1[%c33] : memref<98xf32, #tpu.memory_space<smem>>
    %205 = vector.extract_strided_slice %178 {offsets = [0, 0, 5], sizes = [2, 16, 16], strides = [1, 1, 1]} : vector<2x16x22xf32> to vector<2x16x16xf32>
    %206 = vector.broadcast %204 : f32 to vector<2x16x16xf32>
    %207 = arith.mulf %206, %205 : vector<2x16x16xf32>
    %208 = arith.addf %203, %207 : vector<2x16x16xf32>
    %c34 = arith.constant 34 : index
    %209 = memref.load %arg1[%c34] : memref<98xf32, #tpu.memory_space<smem>>
    %210 = vector.extract_strided_slice %178 {offsets = [0, 0, 6], sizes = [2, 16, 16], strides = [1, 1, 1]} : vector<2x16x22xf32> to vector<2x16x16xf32>
    %211 = vector.broadcast %209 : f32 to vector<2x16x16xf32>
    %212 = arith.mulf %211, %210 : vector<2x16x16xf32>
    %213 = arith.addf %208, %212 : vector<2x16x16xf32>
    %c0_53 = arith.constant 0 : index
    %c0_54 = arith.constant 0 : index
    %c5_55 = arith.constant 5 : index
    %c0_56 = arith.constant 0 : index
    %214 = vector.load %arg4[%c0_53, %c0_54, %c5_55, %c0_56] : memref<2x2x22x22xf32, #tpu.memory_space<vmem>>, vector<1x2x16x22xf32>
    %215 = vector.shape_cast %214 : vector<1x2x16x22xf32> to vector<2x16x22xf32>
    %c35 = arith.constant 35 : index
    %216 = memref.load %arg1[%c35] : memref<98xf32, #tpu.memory_space<smem>>
    %217 = vector.extract_strided_slice %215 {offsets = [0, 0, 0], sizes = [2, 16, 16], strides = [1, 1, 1]} : vector<2x16x22xf32> to vector<2x16x16xf32>
    %218 = vector.broadcast %216 : f32 to vector<2x16x16xf32>
    %219 = arith.mulf %218, %217 : vector<2x16x16xf32>
    %220 = arith.addf %102, %219 : vector<2x16x16xf32>
    %c36 = arith.constant 36 : index
    %221 = memref.load %arg1[%c36] : memref<98xf32, #tpu.memory_space<smem>>
    %222 = vector.extract_strided_slice %215 {offsets = [0, 0, 1], sizes = [2, 16, 16], strides = [1, 1, 1]} : vector<2x16x22xf32> to vector<2x16x16xf32>
    %223 = vector.broadcast %221 : f32 to vector<2x16x16xf32>
    %224 = arith.mulf %223, %222 : vector<2x16x16xf32>
    %225 = arith.addf %220, %224 : vector<2x16x16xf32>
    %c37 = arith.constant 37 : index
    %226 = memref.load %arg1[%c37] : memref<98xf32, #tpu.memory_space<smem>>
    %227 = vector.extract_strided_slice %215 {offsets = [0, 0, 2], sizes = [2, 16, 16], strides = [1, 1, 1]} : vector<2x16x22xf32> to vector<2x16x16xf32>
    %228 = vector.broadcast %226 : f32 to vector<2x16x16xf32>
    %229 = arith.mulf %228, %227 : vector<2x16x16xf32>
    %230 = arith.addf %225, %229 : vector<2x16x16xf32>
    %c38 = arith.constant 38 : index
    %231 = memref.load %arg1[%c38] : memref<98xf32, #tpu.memory_space<smem>>
    %232 = vector.extract_strided_slice %215 {offsets = [0, 0, 3], sizes = [2, 16, 16], strides = [1, 1, 1]} : vector<2x16x22xf32> to vector<2x16x16xf32>
    %233 = vector.broadcast %231 : f32 to vector<2x16x16xf32>
    %234 = arith.mulf %233, %232 : vector<2x16x16xf32>
    %235 = arith.addf %230, %234 : vector<2x16x16xf32>
    %c39 = arith.constant 39 : index
    %236 = memref.load %arg1[%c39] : memref<98xf32, #tpu.memory_space<smem>>
    %237 = vector.extract_strided_slice %215 {offsets = [0, 0, 4], sizes = [2, 16, 16], strides = [1, 1, 1]} : vector<2x16x22xf32> to vector<2x16x16xf32>
    %238 = vector.broadcast %236 : f32 to vector<2x16x16xf32>
    %239 = arith.mulf %238, %237 : vector<2x16x16xf32>
    %240 = arith.addf %235, %239 : vector<2x16x16xf32>
    %c40 = arith.constant 40 : index
    %241 = memref.load %arg1[%c40] : memref<98xf32, #tpu.memory_space<smem>>
    %242 = vector.extract_strided_slice %215 {offsets = [0, 0, 5], sizes = [2, 16, 16], strides = [1, 1, 1]} : vector<2x16x22xf32> to vector<2x16x16xf32>
    %243 = vector.broadcast %241 : f32 to vector<2x16x16xf32>
    %244 = arith.mulf %243, %242 : vector<2x16x16xf32>
    %245 = arith.addf %240, %244 : vector<2x16x16xf32>
    %c41 = arith.constant 41 : index
    %246 = memref.load %arg1[%c41] : memref<98xf32, #tpu.memory_space<smem>>
    %247 = vector.extract_strided_slice %215 {offsets = [0, 0, 6], sizes = [2, 16, 16], strides = [1, 1, 1]} : vector<2x16x22xf32> to vector<2x16x16xf32>
    %248 = vector.broadcast %246 : f32 to vector<2x16x16xf32>
    %249 = arith.mulf %248, %247 : vector<2x16x16xf32>
    %250 = arith.addf %245, %249 : vector<2x16x16xf32>
    %c0_57 = arith.constant 0 : index
    %c0_58 = arith.constant 0 : index
    %c6_59 = arith.constant 6 : index
    %c0_60 = arith.constant 0 : index
    %251 = vector.load %arg4[%c0_57, %c0_58, %c6_59, %c0_60] : memref<2x2x22x22xf32, #tpu.memory_space<vmem>>, vector<1x2x16x22xf32>
    %252 = vector.shape_cast %251 : vector<1x2x16x22xf32> to vector<2x16x22xf32>
    %c42 = arith.constant 42 : index
    %253 = memref.load %arg1[%c42] : memref<98xf32, #tpu.memory_space<smem>>
    %254 = vector.extract_strided_slice %252 {offsets = [0, 0, 0], sizes = [2, 16, 16], strides = [1, 1, 1]} : vector<2x16x22xf32> to vector<2x16x16xf32>
    %255 = vector.broadcast %253 : f32 to vector<2x16x16xf32>
    %256 = arith.mulf %255, %254 : vector<2x16x16xf32>
    %257 = arith.addf %139, %256 : vector<2x16x16xf32>
    %c43 = arith.constant 43 : index
    %258 = memref.load %arg1[%c43] : memref<98xf32, #tpu.memory_space<smem>>
    %259 = vector.extract_strided_slice %252 {offsets = [0, 0, 1], sizes = [2, 16, 16], strides = [1, 1, 1]} : vector<2x16x22xf32> to vector<2x16x16xf32>
    %260 = vector.broadcast %258 : f32 to vector<2x16x16xf32>
    %261 = arith.mulf %260, %259 : vector<2x16x16xf32>
    %262 = arith.addf %257, %261 : vector<2x16x16xf32>
    %c44 = arith.constant 44 : index
    %263 = memref.load %arg1[%c44] : memref<98xf32, #tpu.memory_space<smem>>
    %264 = vector.extract_strided_slice %252 {offsets = [0, 0, 2], sizes = [2, 16, 16], strides = [1, 1, 1]} : vector<2x16x22xf32> to vector<2x16x16xf32>
    %265 = vector.broadcast %263 : f32 to vector<2x16x16xf32>
    %266 = arith.mulf %265, %264 : vector<2x16x16xf32>
    %267 = arith.addf %262, %266 : vector<2x16x16xf32>
    %c45 = arith.constant 45 : index
    %268 = memref.load %arg1[%c45] : memref<98xf32, #tpu.memory_space<smem>>
    %269 = vector.extract_strided_slice %252 {offsets = [0, 0, 3], sizes = [2, 16, 16], strides = [1, 1, 1]} : vector<2x16x22xf32> to vector<2x16x16xf32>
    %270 = vector.broadcast %268 : f32 to vector<2x16x16xf32>
    %271 = arith.mulf %270, %269 : vector<2x16x16xf32>
    %272 = arith.addf %267, %271 : vector<2x16x16xf32>
    %c46 = arith.constant 46 : index
    %273 = memref.load %arg1[%c46] : memref<98xf32, #tpu.memory_space<smem>>
    %274 = vector.extract_strided_slice %252 {offsets = [0, 0, 4], sizes = [2, 16, 16], strides = [1, 1, 1]} : vector<2x16x22xf32> to vector<2x16x16xf32>
    %275 = vector.broadcast %273 : f32 to vector<2x16x16xf32>
    %276 = arith.mulf %275, %274 : vector<2x16x16xf32>
    %277 = arith.addf %272, %276 : vector<2x16x16xf32>
    %c47 = arith.constant 47 : index
    %278 = memref.load %arg1[%c47] : memref<98xf32, #tpu.memory_space<smem>>
    %279 = vector.extract_strided_slice %252 {offsets = [0, 0, 5], sizes = [2, 16, 16], strides = [1, 1, 1]} : vector<2x16x22xf32> to vector<2x16x16xf32>
    %280 = vector.broadcast %278 : f32 to vector<2x16x16xf32>
    %281 = arith.mulf %280, %279 : vector<2x16x16xf32>
    %282 = arith.addf %277, %281 : vector<2x16x16xf32>
    %c48 = arith.constant 48 : index
    %283 = memref.load %arg1[%c48] : memref<98xf32, #tpu.memory_space<smem>>
    %284 = vector.extract_strided_slice %252 {offsets = [0, 0, 6], sizes = [2, 16, 16], strides = [1, 1, 1]} : vector<2x16x22xf32> to vector<2x16x16xf32>
    %285 = vector.broadcast %283 : f32 to vector<2x16x16xf32>
    %286 = arith.mulf %285, %284 : vector<2x16x16xf32>
    %287 = arith.addf %282, %286 : vector<2x16x16xf32>
    %c1_61 = arith.constant 1 : index
    %c0_62 = arith.constant 0 : index
    %c0_63 = arith.constant 0 : index
    %c0_64 = arith.constant 0 : index
    %288 = vector.load %arg4[%c1_61, %c0_62, %c0_63, %c0_64] : memref<2x2x22x22xf32, #tpu.memory_space<vmem>>, vector<1x2x16x22xf32>
    %289 = vector.shape_cast %288 : vector<1x2x16x22xf32> to vector<2x16x22xf32>
    %c49 = arith.constant 49 : index
    %290 = memref.load %arg1[%c49] : memref<98xf32, #tpu.memory_space<smem>>
    %291 = vector.extract_strided_slice %289 {offsets = [0, 0, 0], sizes = [2, 16, 16], strides = [1, 1, 1]} : vector<2x16x22xf32> to vector<2x16x16xf32>
    %292 = vector.broadcast %290 : f32 to vector<2x16x16xf32>
    %293 = arith.mulf %292, %291 : vector<2x16x16xf32>
    %294 = arith.addf %176, %293 : vector<2x16x16xf32>
    %c50 = arith.constant 50 : index
    %295 = memref.load %arg1[%c50] : memref<98xf32, #tpu.memory_space<smem>>
    %296 = vector.extract_strided_slice %289 {offsets = [0, 0, 1], sizes = [2, 16, 16], strides = [1, 1, 1]} : vector<2x16x22xf32> to vector<2x16x16xf32>
    %297 = vector.broadcast %295 : f32 to vector<2x16x16xf32>
    %298 = arith.mulf %297, %296 : vector<2x16x16xf32>
    %299 = arith.addf %294, %298 : vector<2x16x16xf32>
    %c51 = arith.constant 51 : index
    %300 = memref.load %arg1[%c51] : memref<98xf32, #tpu.memory_space<smem>>
    %301 = vector.extract_strided_slice %289 {offsets = [0, 0, 2], sizes = [2, 16, 16], strides = [1, 1, 1]} : vector<2x16x22xf32> to vector<2x16x16xf32>
    %302 = vector.broadcast %300 : f32 to vector<2x16x16xf32>
    %303 = arith.mulf %302, %301 : vector<2x16x16xf32>
    %304 = arith.addf %299, %303 : vector<2x16x16xf32>
    %c52 = arith.constant 52 : index
    %305 = memref.load %arg1[%c52] : memref<98xf32, #tpu.memory_space<smem>>
    %306 = vector.extract_strided_slice %289 {offsets = [0, 0, 3], sizes = [2, 16, 16], strides = [1, 1, 1]} : vector<2x16x22xf32> to vector<2x16x16xf32>
    %307 = vector.broadcast %305 : f32 to vector<2x16x16xf32>
    %308 = arith.mulf %307, %306 : vector<2x16x16xf32>
    %309 = arith.addf %304, %308 : vector<2x16x16xf32>
    %c53 = arith.constant 53 : index
    %310 = memref.load %arg1[%c53] : memref<98xf32, #tpu.memory_space<smem>>
    %311 = vector.extract_strided_slice %289 {offsets = [0, 0, 4], sizes = [2, 16, 16], strides = [1, 1, 1]} : vector<2x16x22xf32> to vector<2x16x16xf32>
    %312 = vector.broadcast %310 : f32 to vector<2x16x16xf32>
    %313 = arith.mulf %312, %311 : vector<2x16x16xf32>
    %314 = arith.addf %309, %313 : vector<2x16x16xf32>
    %c54 = arith.constant 54 : index
    %315 = memref.load %arg1[%c54] : memref<98xf32, #tpu.memory_space<smem>>
    %316 = vector.extract_strided_slice %289 {offsets = [0, 0, 5], sizes = [2, 16, 16], strides = [1, 1, 1]} : vector<2x16x22xf32> to vector<2x16x16xf32>
    %317 = vector.broadcast %315 : f32 to vector<2x16x16xf32>
    %318 = arith.mulf %317, %316 : vector<2x16x16xf32>
    %319 = arith.addf %314, %318 : vector<2x16x16xf32>
    %c55 = arith.constant 55 : index
    %320 = memref.load %arg1[%c55] : memref<98xf32, #tpu.memory_space<smem>>
    %321 = vector.extract_strided_slice %289 {offsets = [0, 0, 6], sizes = [2, 16, 16], strides = [1, 1, 1]} : vector<2x16x22xf32> to vector<2x16x16xf32>
    %322 = vector.broadcast %320 : f32 to vector<2x16x16xf32>
    %323 = arith.mulf %322, %321 : vector<2x16x16xf32>
    %324 = arith.addf %319, %323 : vector<2x16x16xf32>
    %c1_65 = arith.constant 1 : index
    %c0_66 = arith.constant 0 : index
    %c1_67 = arith.constant 1 : index
    %c0_68 = arith.constant 0 : index
    %325 = vector.load %arg4[%c1_65, %c0_66, %c1_67, %c0_68] : memref<2x2x22x22xf32, #tpu.memory_space<vmem>>, vector<1x2x16x22xf32>
    %326 = vector.shape_cast %325 : vector<1x2x16x22xf32> to vector<2x16x22xf32>
    %c56 = arith.constant 56 : index
    %327 = memref.load %arg1[%c56] : memref<98xf32, #tpu.memory_space<smem>>
    %328 = vector.extract_strided_slice %326 {offsets = [0, 0, 0], sizes = [2, 16, 16], strides = [1, 1, 1]} : vector<2x16x22xf32> to vector<2x16x16xf32>
    %329 = vector.broadcast %327 : f32 to vector<2x16x16xf32>
    %330 = arith.mulf %329, %328 : vector<2x16x16xf32>
    %331 = arith.addf %213, %330 : vector<2x16x16xf32>
    %c57 = arith.constant 57 : index
    %332 = memref.load %arg1[%c57] : memref<98xf32, #tpu.memory_space<smem>>
    %333 = vector.extract_strided_slice %326 {offsets = [0, 0, 1], sizes = [2, 16, 16], strides = [1, 1, 1]} : vector<2x16x22xf32> to vector<2x16x16xf32>
    %334 = vector.broadcast %332 : f32 to vector<2x16x16xf32>
    %335 = arith.mulf %334, %333 : vector<2x16x16xf32>
    %336 = arith.addf %331, %335 : vector<2x16x16xf32>
    %c58 = arith.constant 58 : index
    %337 = memref.load %arg1[%c58] : memref<98xf32, #tpu.memory_space<smem>>
    %338 = vector.extract_strided_slice %326 {offsets = [0, 0, 2], sizes = [2, 16, 16], strides = [1, 1, 1]} : vector<2x16x22xf32> to vector<2x16x16xf32>
    %339 = vector.broadcast %337 : f32 to vector<2x16x16xf32>
    %340 = arith.mulf %339, %338 : vector<2x16x16xf32>
    %341 = arith.addf %336, %340 : vector<2x16x16xf32>
    %c59 = arith.constant 59 : index
    %342 = memref.load %arg1[%c59] : memref<98xf32, #tpu.memory_space<smem>>
    %343 = vector.extract_strided_slice %326 {offsets = [0, 0, 3], sizes = [2, 16, 16], strides = [1, 1, 1]} : vector<2x16x22xf32> to vector<2x16x16xf32>
    %344 = vector.broadcast %342 : f32 to vector<2x16x16xf32>
    %345 = arith.mulf %344, %343 : vector<2x16x16xf32>
    %346 = arith.addf %341, %345 : vector<2x16x16xf32>
    %c60 = arith.constant 60 : index
    %347 = memref.load %arg1[%c60] : memref<98xf32, #tpu.memory_space<smem>>
    %348 = vector.extract_strided_slice %326 {offsets = [0, 0, 4], sizes = [2, 16, 16], strides = [1, 1, 1]} : vector<2x16x22xf32> to vector<2x16x16xf32>
    %349 = vector.broadcast %347 : f32 to vector<2x16x16xf32>
    %350 = arith.mulf %349, %348 : vector<2x16x16xf32>
    %351 = arith.addf %346, %350 : vector<2x16x16xf32>
    %c61 = arith.constant 61 : index
    %352 = memref.load %arg1[%c61] : memref<98xf32, #tpu.memory_space<smem>>
    %353 = vector.extract_strided_slice %326 {offsets = [0, 0, 5], sizes = [2, 16, 16], strides = [1, 1, 1]} : vector<2x16x22xf32> to vector<2x16x16xf32>
    %354 = vector.broadcast %352 : f32 to vector<2x16x16xf32>
    %355 = arith.mulf %354, %353 : vector<2x16x16xf32>
    %356 = arith.addf %351, %355 : vector<2x16x16xf32>
    %c62 = arith.constant 62 : index
    %357 = memref.load %arg1[%c62] : memref<98xf32, #tpu.memory_space<smem>>
    %358 = vector.extract_strided_slice %326 {offsets = [0, 0, 6], sizes = [2, 16, 16], strides = [1, 1, 1]} : vector<2x16x22xf32> to vector<2x16x16xf32>
    %359 = vector.broadcast %357 : f32 to vector<2x16x16xf32>
    %360 = arith.mulf %359, %358 : vector<2x16x16xf32>
    %361 = arith.addf %356, %360 : vector<2x16x16xf32>
    %c1_69 = arith.constant 1 : index
    %c0_70 = arith.constant 0 : index
    %c2_71 = arith.constant 2 : index
    %c0_72 = arith.constant 0 : index
    %362 = vector.load %arg4[%c1_69, %c0_70, %c2_71, %c0_72] : memref<2x2x22x22xf32, #tpu.memory_space<vmem>>, vector<1x2x16x22xf32>
    %363 = vector.shape_cast %362 : vector<1x2x16x22xf32> to vector<2x16x22xf32>
    %c63 = arith.constant 63 : index
    %364 = memref.load %arg1[%c63] : memref<98xf32, #tpu.memory_space<smem>>
    %365 = vector.extract_strided_slice %363 {offsets = [0, 0, 0], sizes = [2, 16, 16], strides = [1, 1, 1]} : vector<2x16x22xf32> to vector<2x16x16xf32>
    %366 = vector.broadcast %364 : f32 to vector<2x16x16xf32>
    %367 = arith.mulf %366, %365 : vector<2x16x16xf32>
    %368 = arith.addf %250, %367 : vector<2x16x16xf32>
    %c64 = arith.constant 64 : index
    %369 = memref.load %arg1[%c64] : memref<98xf32, #tpu.memory_space<smem>>
    %370 = vector.extract_strided_slice %363 {offsets = [0, 0, 1], sizes = [2, 16, 16], strides = [1, 1, 1]} : vector<2x16x22xf32> to vector<2x16x16xf32>
    %371 = vector.broadcast %369 : f32 to vector<2x16x16xf32>
    %372 = arith.mulf %371, %370 : vector<2x16x16xf32>
    %373 = arith.addf %368, %372 : vector<2x16x16xf32>
    %c65 = arith.constant 65 : index
    %374 = memref.load %arg1[%c65] : memref<98xf32, #tpu.memory_space<smem>>
    %375 = vector.extract_strided_slice %363 {offsets = [0, 0, 2], sizes = [2, 16, 16], strides = [1, 1, 1]} : vector<2x16x22xf32> to vector<2x16x16xf32>
    %376 = vector.broadcast %374 : f32 to vector<2x16x16xf32>
    %377 = arith.mulf %376, %375 : vector<2x16x16xf32>
    %378 = arith.addf %373, %377 : vector<2x16x16xf32>
    %c66 = arith.constant 66 : index
    %379 = memref.load %arg1[%c66] : memref<98xf32, #tpu.memory_space<smem>>
    %380 = vector.extract_strided_slice %363 {offsets = [0, 0, 3], sizes = [2, 16, 16], strides = [1, 1, 1]} : vector<2x16x22xf32> to vector<2x16x16xf32>
    %381 = vector.broadcast %379 : f32 to vector<2x16x16xf32>
    %382 = arith.mulf %381, %380 : vector<2x16x16xf32>
    %383 = arith.addf %378, %382 : vector<2x16x16xf32>
    %c67 = arith.constant 67 : index
    %384 = memref.load %arg1[%c67] : memref<98xf32, #tpu.memory_space<smem>>
    %385 = vector.extract_strided_slice %363 {offsets = [0, 0, 4], sizes = [2, 16, 16], strides = [1, 1, 1]} : vector<2x16x22xf32> to vector<2x16x16xf32>
    %386 = vector.broadcast %384 : f32 to vector<2x16x16xf32>
    %387 = arith.mulf %386, %385 : vector<2x16x16xf32>
    %388 = arith.addf %383, %387 : vector<2x16x16xf32>
    %c68 = arith.constant 68 : index
    %389 = memref.load %arg1[%c68] : memref<98xf32, #tpu.memory_space<smem>>
    %390 = vector.extract_strided_slice %363 {offsets = [0, 0, 5], sizes = [2, 16, 16], strides = [1, 1, 1]} : vector<2x16x22xf32> to vector<2x16x16xf32>
    %391 = vector.broadcast %389 : f32 to vector<2x16x16xf32>
    %392 = arith.mulf %391, %390 : vector<2x16x16xf32>
    %393 = arith.addf %388, %392 : vector<2x16x16xf32>
    %c69 = arith.constant 69 : index
    %394 = memref.load %arg1[%c69] : memref<98xf32, #tpu.memory_space<smem>>
    %395 = vector.extract_strided_slice %363 {offsets = [0, 0, 6], sizes = [2, 16, 16], strides = [1, 1, 1]} : vector<2x16x22xf32> to vector<2x16x16xf32>
    %396 = vector.broadcast %394 : f32 to vector<2x16x16xf32>
    %397 = arith.mulf %396, %395 : vector<2x16x16xf32>
    %398 = arith.addf %393, %397 : vector<2x16x16xf32>
    %c1_73 = arith.constant 1 : index
    %c0_74 = arith.constant 0 : index
    %c3_75 = arith.constant 3 : index
    %c0_76 = arith.constant 0 : index
    %399 = vector.load %arg4[%c1_73, %c0_74, %c3_75, %c0_76] : memref<2x2x22x22xf32, #tpu.memory_space<vmem>>, vector<1x2x16x22xf32>
    %400 = vector.shape_cast %399 : vector<1x2x16x22xf32> to vector<2x16x22xf32>
    %c70 = arith.constant 70 : index
    %401 = memref.load %arg1[%c70] : memref<98xf32, #tpu.memory_space<smem>>
    %402 = vector.extract_strided_slice %400 {offsets = [0, 0, 0], sizes = [2, 16, 16], strides = [1, 1, 1]} : vector<2x16x22xf32> to vector<2x16x16xf32>
    %403 = vector.broadcast %401 : f32 to vector<2x16x16xf32>
    %404 = arith.mulf %403, %402 : vector<2x16x16xf32>
    %405 = arith.addf %287, %404 : vector<2x16x16xf32>
    %c71 = arith.constant 71 : index
    %406 = memref.load %arg1[%c71] : memref<98xf32, #tpu.memory_space<smem>>
    %407 = vector.extract_strided_slice %400 {offsets = [0, 0, 1], sizes = [2, 16, 16], strides = [1, 1, 1]} : vector<2x16x22xf32> to vector<2x16x16xf32>
    %408 = vector.broadcast %406 : f32 to vector<2x16x16xf32>
    %409 = arith.mulf %408, %407 : vector<2x16x16xf32>
    %410 = arith.addf %405, %409 : vector<2x16x16xf32>
    %c72 = arith.constant 72 : index
    %411 = memref.load %arg1[%c72] : memref<98xf32, #tpu.memory_space<smem>>
    %412 = vector.extract_strided_slice %400 {offsets = [0, 0, 2], sizes = [2, 16, 16], strides = [1, 1, 1]} : vector<2x16x22xf32> to vector<2x16x16xf32>
    %413 = vector.broadcast %411 : f32 to vector<2x16x16xf32>
    %414 = arith.mulf %413, %412 : vector<2x16x16xf32>
    %415 = arith.addf %410, %414 : vector<2x16x16xf32>
    %c73 = arith.constant 73 : index
    %416 = memref.load %arg1[%c73] : memref<98xf32, #tpu.memory_space<smem>>
    %417 = vector.extract_strided_slice %400 {offsets = [0, 0, 3], sizes = [2, 16, 16], strides = [1, 1, 1]} : vector<2x16x22xf32> to vector<2x16x16xf32>
    %418 = vector.broadcast %416 : f32 to vector<2x16x16xf32>
    %419 = arith.mulf %418, %417 : vector<2x16x16xf32>
    %420 = arith.addf %415, %419 : vector<2x16x16xf32>
    %c74 = arith.constant 74 : index
    %421 = memref.load %arg1[%c74] : memref<98xf32, #tpu.memory_space<smem>>
    %422 = vector.extract_strided_slice %400 {offsets = [0, 0, 4], sizes = [2, 16, 16], strides = [1, 1, 1]} : vector<2x16x22xf32> to vector<2x16x16xf32>
    %423 = vector.broadcast %421 : f32 to vector<2x16x16xf32>
    %424 = arith.mulf %423, %422 : vector<2x16x16xf32>
    %425 = arith.addf %420, %424 : vector<2x16x16xf32>
    %c75 = arith.constant 75 : index
    %426 = memref.load %arg1[%c75] : memref<98xf32, #tpu.memory_space<smem>>
    %427 = vector.extract_strided_slice %400 {offsets = [0, 0, 5], sizes = [2, 16, 16], strides = [1, 1, 1]} : vector<2x16x22xf32> to vector<2x16x16xf32>
    %428 = vector.broadcast %426 : f32 to vector<2x16x16xf32>
    %429 = arith.mulf %428, %427 : vector<2x16x16xf32>
    %430 = arith.addf %425, %429 : vector<2x16x16xf32>
    %c76 = arith.constant 76 : index
    %431 = memref.load %arg1[%c76] : memref<98xf32, #tpu.memory_space<smem>>
    %432 = vector.extract_strided_slice %400 {offsets = [0, 0, 6], sizes = [2, 16, 16], strides = [1, 1, 1]} : vector<2x16x22xf32> to vector<2x16x16xf32>
    %433 = vector.broadcast %431 : f32 to vector<2x16x16xf32>
    %434 = arith.mulf %433, %432 : vector<2x16x16xf32>
    %435 = arith.addf %430, %434 : vector<2x16x16xf32>
    %c1_77 = arith.constant 1 : index
    %c0_78 = arith.constant 0 : index
    %c4_79 = arith.constant 4 : index
    %c0_80 = arith.constant 0 : index
    %436 = vector.load %arg4[%c1_77, %c0_78, %c4_79, %c0_80] : memref<2x2x22x22xf32, #tpu.memory_space<vmem>>, vector<1x2x16x22xf32>
    %437 = vector.shape_cast %436 : vector<1x2x16x22xf32> to vector<2x16x22xf32>
    %c77 = arith.constant 77 : index
    %438 = memref.load %arg1[%c77] : memref<98xf32, #tpu.memory_space<smem>>
    %439 = vector.extract_strided_slice %437 {offsets = [0, 0, 0], sizes = [2, 16, 16], strides = [1, 1, 1]} : vector<2x16x22xf32> to vector<2x16x16xf32>
    %440 = vector.broadcast %438 : f32 to vector<2x16x16xf32>
    %441 = arith.mulf %440, %439 : vector<2x16x16xf32>
    %442 = arith.addf %324, %441 : vector<2x16x16xf32>
    %c78 = arith.constant 78 : index
    %443 = memref.load %arg1[%c78] : memref<98xf32, #tpu.memory_space<smem>>
    %444 = vector.extract_strided_slice %437 {offsets = [0, 0, 1], sizes = [2, 16, 16], strides = [1, 1, 1]} : vector<2x16x22xf32> to vector<2x16x16xf32>
    %445 = vector.broadcast %443 : f32 to vector<2x16x16xf32>
    %446 = arith.mulf %445, %444 : vector<2x16x16xf32>
    %447 = arith.addf %442, %446 : vector<2x16x16xf32>
    %c79 = arith.constant 79 : index
    %448 = memref.load %arg1[%c79] : memref<98xf32, #tpu.memory_space<smem>>
    %449 = vector.extract_strided_slice %437 {offsets = [0, 0, 2], sizes = [2, 16, 16], strides = [1, 1, 1]} : vector<2x16x22xf32> to vector<2x16x16xf32>
    %450 = vector.broadcast %448 : f32 to vector<2x16x16xf32>
    %451 = arith.mulf %450, %449 : vector<2x16x16xf32>
    %452 = arith.addf %447, %451 : vector<2x16x16xf32>
    %c80 = arith.constant 80 : index
    %453 = memref.load %arg1[%c80] : memref<98xf32, #tpu.memory_space<smem>>
    %454 = vector.extract_strided_slice %437 {offsets = [0, 0, 3], sizes = [2, 16, 16], strides = [1, 1, 1]} : vector<2x16x22xf32> to vector<2x16x16xf32>
    %455 = vector.broadcast %453 : f32 to vector<2x16x16xf32>
    %456 = arith.mulf %455, %454 : vector<2x16x16xf32>
    %457 = arith.addf %452, %456 : vector<2x16x16xf32>
    %c81 = arith.constant 81 : index
    %458 = memref.load %arg1[%c81] : memref<98xf32, #tpu.memory_space<smem>>
    %459 = vector.extract_strided_slice %437 {offsets = [0, 0, 4], sizes = [2, 16, 16], strides = [1, 1, 1]} : vector<2x16x22xf32> to vector<2x16x16xf32>
    %460 = vector.broadcast %458 : f32 to vector<2x16x16xf32>
    %461 = arith.mulf %460, %459 : vector<2x16x16xf32>
    %462 = arith.addf %457, %461 : vector<2x16x16xf32>
    %c82 = arith.constant 82 : index
    %463 = memref.load %arg1[%c82] : memref<98xf32, #tpu.memory_space<smem>>
    %464 = vector.extract_strided_slice %437 {offsets = [0, 0, 5], sizes = [2, 16, 16], strides = [1, 1, 1]} : vector<2x16x22xf32> to vector<2x16x16xf32>
    %465 = vector.broadcast %463 : f32 to vector<2x16x16xf32>
    %466 = arith.mulf %465, %464 : vector<2x16x16xf32>
    %467 = arith.addf %462, %466 : vector<2x16x16xf32>
    %c83 = arith.constant 83 : index
    %468 = memref.load %arg1[%c83] : memref<98xf32, #tpu.memory_space<smem>>
    %469 = vector.extract_strided_slice %437 {offsets = [0, 0, 6], sizes = [2, 16, 16], strides = [1, 1, 1]} : vector<2x16x22xf32> to vector<2x16x16xf32>
    %470 = vector.broadcast %468 : f32 to vector<2x16x16xf32>
    %471 = arith.mulf %470, %469 : vector<2x16x16xf32>
    %472 = arith.addf %467, %471 : vector<2x16x16xf32>
    %c1_81 = arith.constant 1 : index
    %c0_82 = arith.constant 0 : index
    %c5_83 = arith.constant 5 : index
    %c0_84 = arith.constant 0 : index
    %473 = vector.load %arg4[%c1_81, %c0_82, %c5_83, %c0_84] : memref<2x2x22x22xf32, #tpu.memory_space<vmem>>, vector<1x2x16x22xf32>
    %474 = vector.shape_cast %473 : vector<1x2x16x22xf32> to vector<2x16x22xf32>
    %c84 = arith.constant 84 : index
    %475 = memref.load %arg1[%c84] : memref<98xf32, #tpu.memory_space<smem>>
    %476 = vector.extract_strided_slice %474 {offsets = [0, 0, 0], sizes = [2, 16, 16], strides = [1, 1, 1]} : vector<2x16x22xf32> to vector<2x16x16xf32>
    %477 = vector.broadcast %475 : f32 to vector<2x16x16xf32>
    %478 = arith.mulf %477, %476 : vector<2x16x16xf32>
    %479 = arith.addf %361, %478 : vector<2x16x16xf32>
    %c85 = arith.constant 85 : index
    %480 = memref.load %arg1[%c85] : memref<98xf32, #tpu.memory_space<smem>>
    %481 = vector.extract_strided_slice %474 {offsets = [0, 0, 1], sizes = [2, 16, 16], strides = [1, 1, 1]} : vector<2x16x22xf32> to vector<2x16x16xf32>
    %482 = vector.broadcast %480 : f32 to vector<2x16x16xf32>
    %483 = arith.mulf %482, %481 : vector<2x16x16xf32>
    %484 = arith.addf %479, %483 : vector<2x16x16xf32>
    %c86 = arith.constant 86 : index
    %485 = memref.load %arg1[%c86] : memref<98xf32, #tpu.memory_space<smem>>
    %486 = vector.extract_strided_slice %474 {offsets = [0, 0, 2], sizes = [2, 16, 16], strides = [1, 1, 1]} : vector<2x16x22xf32> to vector<2x16x16xf32>
    %487 = vector.broadcast %485 : f32 to vector<2x16x16xf32>
    %488 = arith.mulf %487, %486 : vector<2x16x16xf32>
    %489 = arith.addf %484, %488 : vector<2x16x16xf32>
    %c87 = arith.constant 87 : index
    %490 = memref.load %arg1[%c87] : memref<98xf32, #tpu.memory_space<smem>>
    %491 = vector.extract_strided_slice %474 {offsets = [0, 0, 3], sizes = [2, 16, 16], strides = [1, 1, 1]} : vector<2x16x22xf32> to vector<2x16x16xf32>
    %492 = vector.broadcast %490 : f32 to vector<2x16x16xf32>
    %493 = arith.mulf %492, %491 : vector<2x16x16xf32>
    %494 = arith.addf %489, %493 : vector<2x16x16xf32>
    %c88 = arith.constant 88 : index
    %495 = memref.load %arg1[%c88] : memref<98xf32, #tpu.memory_space<smem>>
    %496 = vector.extract_strided_slice %474 {offsets = [0, 0, 4], sizes = [2, 16, 16], strides = [1, 1, 1]} : vector<2x16x22xf32> to vector<2x16x16xf32>
    %497 = vector.broadcast %495 : f32 to vector<2x16x16xf32>
    %498 = arith.mulf %497, %496 : vector<2x16x16xf32>
    %499 = arith.addf %494, %498 : vector<2x16x16xf32>
    %c89 = arith.constant 89 : index
    %500 = memref.load %arg1[%c89] : memref<98xf32, #tpu.memory_space<smem>>
    %501 = vector.extract_strided_slice %474 {offsets = [0, 0, 5], sizes = [2, 16, 16], strides = [1, 1, 1]} : vector<2x16x22xf32> to vector<2x16x16xf32>
    %502 = vector.broadcast %500 : f32 to vector<2x16x16xf32>
    %503 = arith.mulf %502, %501 : vector<2x16x16xf32>
    %504 = arith.addf %499, %503 : vector<2x16x16xf32>
    %c90 = arith.constant 90 : index
    %505 = memref.load %arg1[%c90] : memref<98xf32, #tpu.memory_space<smem>>
    %506 = vector.extract_strided_slice %474 {offsets = [0, 0, 6], sizes = [2, 16, 16], strides = [1, 1, 1]} : vector<2x16x22xf32> to vector<2x16x16xf32>
    %507 = vector.broadcast %505 : f32 to vector<2x16x16xf32>
    %508 = arith.mulf %507, %506 : vector<2x16x16xf32>
    %509 = arith.addf %504, %508 : vector<2x16x16xf32>
    %c1_85 = arith.constant 1 : index
    %c0_86 = arith.constant 0 : index
    %c6_87 = arith.constant 6 : index
    %c0_88 = arith.constant 0 : index
    %510 = vector.load %arg4[%c1_85, %c0_86, %c6_87, %c0_88] : memref<2x2x22x22xf32, #tpu.memory_space<vmem>>, vector<1x2x16x22xf32>
    %511 = vector.shape_cast %510 : vector<1x2x16x22xf32> to vector<2x16x22xf32>
    %c91 = arith.constant 91 : index
    %512 = memref.load %arg1[%c91] : memref<98xf32, #tpu.memory_space<smem>>
    %513 = vector.extract_strided_slice %511 {offsets = [0, 0, 0], sizes = [2, 16, 16], strides = [1, 1, 1]} : vector<2x16x22xf32> to vector<2x16x16xf32>
    %514 = vector.broadcast %512 : f32 to vector<2x16x16xf32>
    %515 = arith.mulf %514, %513 : vector<2x16x16xf32>
    %516 = arith.addf %398, %515 : vector<2x16x16xf32>
    %c92 = arith.constant 92 : index
    %517 = memref.load %arg1[%c92] : memref<98xf32, #tpu.memory_space<smem>>
    %518 = vector.extract_strided_slice %511 {offsets = [0, 0, 1], sizes = [2, 16, 16], strides = [1, 1, 1]} : vector<2x16x22xf32> to vector<2x16x16xf32>
    %519 = vector.broadcast %517 : f32 to vector<2x16x16xf32>
    %520 = arith.mulf %519, %518 : vector<2x16x16xf32>
    %521 = arith.addf %516, %520 : vector<2x16x16xf32>
    %c93 = arith.constant 93 : index
    %522 = memref.load %arg1[%c93] : memref<98xf32, #tpu.memory_space<smem>>
    %523 = vector.extract_strided_slice %511 {offsets = [0, 0, 2], sizes = [2, 16, 16], strides = [1, 1, 1]} : vector<2x16x22xf32> to vector<2x16x16xf32>
    %524 = vector.broadcast %522 : f32 to vector<2x16x16xf32>
    %525 = arith.mulf %524, %523 : vector<2x16x16xf32>
    %526 = arith.addf %521, %525 : vector<2x16x16xf32>
    %c94 = arith.constant 94 : index
    %527 = memref.load %arg1[%c94] : memref<98xf32, #tpu.memory_space<smem>>
    %528 = vector.extract_strided_slice %511 {offsets = [0, 0, 3], sizes = [2, 16, 16], strides = [1, 1, 1]} : vector<2x16x22xf32> to vector<2x16x16xf32>
    %529 = vector.broadcast %527 : f32 to vector<2x16x16xf32>
    %530 = arith.mulf %529, %528 : vector<2x16x16xf32>
    %531 = arith.addf %526, %530 : vector<2x16x16xf32>
    %c95 = arith.constant 95 : index
    %532 = memref.load %arg1[%c95] : memref<98xf32, #tpu.memory_space<smem>>
    %533 = vector.extract_strided_slice %511 {offsets = [0, 0, 4], sizes = [2, 16, 16], strides = [1, 1, 1]} : vector<2x16x22xf32> to vector<2x16x16xf32>
    %534 = vector.broadcast %532 : f32 to vector<2x16x16xf32>
    %535 = arith.mulf %534, %533 : vector<2x16x16xf32>
    %536 = arith.addf %531, %535 : vector<2x16x16xf32>
    %c96 = arith.constant 96 : index
    %537 = memref.load %arg1[%c96] : memref<98xf32, #tpu.memory_space<smem>>
    %538 = vector.extract_strided_slice %511 {offsets = [0, 0, 5], sizes = [2, 16, 16], strides = [1, 1, 1]} : vector<2x16x22xf32> to vector<2x16x16xf32>
    %539 = vector.broadcast %537 : f32 to vector<2x16x16xf32>
    %540 = arith.mulf %539, %538 : vector<2x16x16xf32>
    %541 = arith.addf %536, %540 : vector<2x16x16xf32>
    %c97 = arith.constant 97 : index
    %542 = memref.load %arg1[%c97] : memref<98xf32, #tpu.memory_space<smem>>
    %543 = vector.extract_strided_slice %511 {offsets = [0, 0, 6], sizes = [2, 16, 16], strides = [1, 1, 1]} : vector<2x16x22xf32> to vector<2x16x16xf32>
    %544 = vector.broadcast %542 : f32 to vector<2x16x16xf32>
    %545 = arith.mulf %544, %543 : vector<2x16x16xf32>
    %546 = arith.addf %541, %545 : vector<2x16x16xf32>
    %547 = arith.addf %509, %546 : vector<2x16x16xf32>
    %548 = arith.addf %435, %472 : vector<2x16x16xf32>
    %549 = arith.addf %547, %548 : vector<2x16x16xf32>
    %550 = arith.negf %549 : vector<2x16x16xf32>
    %551 = math.exp %550 : vector<2x16x16xf32>
    %cst_89 = arith.constant 1.000000e+00 : f32
    %552 = vector.broadcast %cst_89 : f32 to vector<2x16x16xf32>
    %553 = arith.addf %552, %551 : vector<2x16x16xf32>
    %554 = arith.divf %552, %553 : vector<2x16x16xf32>
    %c0_90 = arith.constant 0 : index
    %c0_91 = arith.constant 0 : index
    %c0_92 = arith.constant 0 : index
    %555 = vector.load %arg3[%c0_90, %c0_91, %c0_92] : memref<2x16x16xf32, #tpu.memory_space<vmem>>, vector<2x16x16xf32>
    tpu.vector_store %arg3[%c0_90, %c0_91, %c0_92], %554 {strides = array<i32>} : memref<2x16x16xf32, #tpu.memory_space<vmem>>, vector<2x16x16xf32>,
    return
  }
}

</mosaic_0001>

<bundles_post_ra>
// kernel: tpu_custom_call.1
= control target key start
LH: loop header
LB: loop body
LE: loop exit
PB: predicated region body
PF: predicated region fallthrough
CT: control target
= control target key end

     0   :  { %9 = vsyncpa [#allocation5], 0  ;;  %s4068_s0 = inlined_call_operand.hbm [shape: f32[2,4,16,16], index: 0, kind: input, shape index: {}]   ;;  %s4069_s1 = inlined_call_operand.vmem [shape: f32[98], index: 1, kind: input, shape index: {}]   ;;  %s4070_s2 = inlined_call_operand.<no memory space> [shape: f32[1], index: 2, kind: input, shape index: {}]   ;;  %s4071_s3 = inlined_call_operand.hbm [shape: f32[2,16,16], index: 3, kind: output, shape index: {}]  }
   0x1   :  { %10 = vsyncpa [#allocation7], 0 }
   0x2   :  { %11 = vsyncpa [#allocation6], 0  ;;  %s2778_s12 = smov [#allocation4]   ;;  %s30_s16 = sshll.u32 %s4069_s1, 4  ;;  %s31_s16 = int_to_ptr.vmem [resolvable:$true] %s30_s16 }
   0x3   :  { %s17_s13 = sshll.u32 %s2778_s12, 4  ;;  %s18_s13 = int_to_ptr.vmem [resolvable:$true] %s17_s13 }
   0x4   :  { %s2728_s17 = scalar_lea.vmem %s18_s13, 2048  ;;  %p2733_p1 = scmp.lt.s32.totalorder %s18_s13, %s18_s13 }
   0x5   :  { %p2729_p0 = scmp.ne.s32.totalorder %s18_s13, %s2728_s17  ;;  %p2734_p2 = scmp.lt.s32.totalorder %s2728_s17, %s2728_s17 }
   0x7   :  { %p2735_p3 = por %p2734_p2, %p2733_p1 }
   0x9   :  { %p2736_p4 = pnand %p2735_p3, %p2729_p0 }
   0xb   :  { %2739 = shalt.err (!%p2736_p4)
}
   0xc   :  { %s2779_s18 = smov 128   ;;  %s2780_s19 = smov 8  }
   0xd   :  { %23 = dma.hbm_to_vmem [thread:$0]  %s4068_s0, 2048, %s18_s13, [#allocation5], %s2779_s18, %s2779_s18, %s2780_s19  }
   0xe   :  { %s2740_s22 = scalar_lea.vmem %s31_s16, 16  ;;  %p2745_p6 = scmp.lt.s32.totalorder %s31_s16, %s31_s16 }
   0xf   :  { %p2741_p5 = scmp.ne.s32.totalorder %s31_s16, %s2740_s22  ;;  %p2746_p7 = scmp.lt.s32.totalorder %s2740_s22, %s2740_s22 }
  0x11   :  { %p2747_p8 = por %p2746_p7, %p2745_p6 }
  0x13   :  { %p2748_p9 = pnand %p2747_p8, %p2741_p5 }
  0x15   :  { %2751 = shalt.err (!%p2748_p9)
}
  0x16   :  { %s2781_s1 = smov [#allocation8]  }
  0x17   :  { %33 = dma.vmem_to_smem %s31_s16, 16, %s2781_s1, [#allocation7]  }
  0x18   :  { %2772 = dma.done.wait [#allocation5], 2048  }
  0x19   :  { %2773 = vsyncadd [#allocation5], 4294965248 }
  0x1a   :  { %2774 = dma.done.wait [#allocation7], 16  }
  0x1b   :  { %2775 = vsyncadd [#allocation7], 4294967280 }
  0x1c   :  { %42 = sfence }
  0x1d   :  { %v44_v0 = vld [vmem:[#allocation4 + $0x8] sm:$0xff]  ;;  %v49_v1 = vld [vmem:[#allocation4 + $0x18] sm:$0xff]  ;;  %vm90_vm0 = vcmask 179200   ;;  %v43_v5 = vld [vmem:[#allocation4] sm:$0xff]  ;;  %vm93_vm1 = vcmask 177152   ;;  %v2782_v7 = vmov 0.0  }
  0x1e   :  { %v62_v2 = vld [vmem:[#allocation4 + $0x28] sm:$0xff]  ;;  %v57_v3 = vmax.f32 %v44_v0, %v49_v1  ;;  %v53_v4 = vadd.f32 %v49_v1, %v44_v0  ;;  %v48_v6 = vld [vmem:[#allocation4 + $0x10] sm:$0xff]  ;;  %99 = vst.msk [vmem:[#allocation2 + $0x38] sm:$0xff] %vm90_vm0, %v2782_v7  ;;  %91 = vst.msk [vmem:[#allocation2] sm:$0xff] %vm90_vm0, %v2782_v7  ;;  %s2783_s0 = smov 3   ;;  %vm120_vm2 = vcmask 154648  }
  0x1f   :  { %92 = vst.msk [vmem:[#allocation2 + $0x8] sm:$0xff] %vm90_vm0, %v2782_v7  ;;  %95 = vst.msk [vmem:[#allocation2 + $0x18] sm:$0xff] %vm90_vm0, %v2782_v7  ;;  %v75_v8 = vld [vmem:[#allocation4 + $0x38] sm:$0xff]  ;;  %v56_v9 = vmax.f32 %v43_v5, %v48_v6  ;;  %v61_v10 = vld [vmem:[#allocation4 + $0x20] sm:$0xff]  ;;  %v52_v11 = vadd.f32 %v48_v6, %v43_v5  ;;  %s2587_s23 = sld [smem:[#allocation8 + $0x1]]  ;;  %s2784_s25 = smov 127  }
  0x20   :  { %96 = vst.msk [vmem:[#allocation2 + $0x20] sm:$0xff] %vm90_vm0, %v2782_v7  ;;  %98 = vst.msk [vmem:[#allocation2 + $0x30] sm:$0xff] %vm90_vm0, %v2782_v7  ;;  %v45_v12 = vld [vmem:[#allocation4 + $0x40] sm:$0xff]  ;;  %v70_v13 = vmax.f32 %v57_v3, %v62_v2  ;;  %v74_v14 = vld [vmem:[#allocation4 + $0x30] sm:$0xff]  ;;  %v66_v17 = vadd.f32 %v62_v2, %v53_v4  ;;  %s2588_s24 = sld [smem:[#allocation8 + $0x2]]  ;;  %s2785_s27 = smov 126  }
  0x21   :  { %101 = vst.msk [vmem:[#allocation2 + $0x48] sm:$0xff] %vm90_vm0, %v2782_v7  ;;  %102 = vst.msk [vmem:[#allocation2 + $0x50] sm:$0xff] %vm90_vm0, %v2782_v7  ;;  %v50_v15 = vld [vmem:[#allocation4 + $0x50] sm:$0xff]  ;;  %v63_v16 = vld [vmem:[#allocation4 + $0x60] sm:$0xff]  ;;  %v69_v18 = vmax.f32 %v56_v9, %v61_v10  ;;  %v65_v19 = vadd.f32 %v61_v10, %v52_v11  ;;  %s2589_s26 = sld [smem:[#allocation8 + $0x3]]  ;;  %s2786_s29 = smov 125  }
  0x22   :  { %100 = vst.msk [vmem:[#allocation2 + $0x40] sm:$0x3f] %vm93_vm1, %v2782_v7  ;;  %94 = vst.msk [vmem:[#allocation2 + $0x10] sm:$0x3f] %vm93_vm1, %v2782_v7  ;;  %v54_v20 = vadd.f32 %v50_v15, %v45_v12  ;;  %v46_v21 = vld [vmem:[#allocation4 + $0x48] sm:$0xff]  ;;  %v51_v22 = vld [vmem:[#allocation4 + $0x58] sm:$0xff]  ;;  %v83_v24 = vmax.f32 %v70_v13, %v75_v8  ;;  %v58_v32 = vmax.f32 %v45_v12, %v50_v15 }
  0x23   :  { %97 = vst.msk [vmem:[#allocation2 + $0x28] sm:$0x3f] %vm93_vm1, %v2782_v7  ;;  %103 = vst.msk [vmem:[#allocation2 + $0x58] sm:$0x3f] %vm93_vm1, %v2782_v7  ;;  %v64_v23 = vld [vmem:[#allocation4 + $0x68] sm:$0xff]  ;;  %v76_v25 = vld [vmem:[#allocation4 + $0x70] sm:$0xff]  ;;  %v55_v26 = vadd.f32 %v51_v22, %v46_v21  ;;  %v82_v27 = vmax.f32 %v69_v18, %v74_v14  ;;  %v78_v28 = vadd.f32 %v74_v14, %v65_v19 }
  0x24   :  { %v67_v29 = vadd.f32 %v63_v16, %v54_v20  ;;  %v77_v30 = vld [vmem:[#allocation4 + $0x78] sm:$0xff]  ;;  %131 = vrot.lane.b32.xlu1 %v83_v24, %s2783_s0  ;;  %v79_v33 = vadd.f32 %v75_v8, %v66_v17  ;;  %v59_v36 = vmax.f32 %v46_v21, %v51_v22  ;;  %v71_v41 = vmax.f32 %v58_v32, %v63_v16  ;;  %s2590_s28 = sld [smem:[#allocation8 + $0x4]]  ;;  %s2787_s4 = smov 124  }
  0x25   :  { %v68_v31 = vadd.f32 %v64_v23, %v55_v26  ;;  %129 = vrot.lane.b32.xlu0 %v82_v27, %s2783_s0  ;;  %v86_v35 = vmul.f32 0.25, %v78_v28  ;;  %v163_v51 = vstv %s2587_s23  ;;  %s2591_s30 = sld [smem:[#allocation8 + $0x5]]  ;;  %s2788_s6 = smov 123   ;;  %vm2564_vm3 = vcmask 130048  }
  0x26   :  { %v80_v34 = vadd.f32 %v76_v25, %v67_v29  ;;  %v87_v40 = vmul.f32 0.25, %v79_v33  ;;  %v72_v42 = vmax.f32 %v59_v36, %v64_v23  ;;  %v84_v43 = vmax.f32 %v71_v41, %v76_v25  ;;  %s2592_s5 = sld [smem:[#allocation8 + $0x6]]  ;;  %s2789_s8 = smov 122  }
  0x27   :  { %v81_v37 = vadd.f32 %v77_v30, %v68_v31  ;;  %v189_v60 = vstv %s2588_s24  ;;  %v215_v2 = vstv %s2589_s26  ;;  %s2594_s7 = sld [smem:[#allocation8 + $0x8]] }
  0x28   :  { %v88_v38 = vmul.f32 0.25, %v80_v34  ;;  %v85_v44 = vmax.f32 %v72_v42, %v77_v30  ;;  %s2595_s9 = sld [smem:[#allocation8 + $0x9]] }
  0x29   :  { %108 = vrot.lane.b32.xlu0 %v86_v35, %s2783_s0  ;;  %v89_v39 = vmul.f32 0.25, %v81_v37  ;;  %s2596_s10 = sld [smem:[#allocation8 + $0xa]] }
  0x2a   :  { %112 = vrot.lane.b32.xlu1 %v88_v38, %s2783_s0  ;;  %v241_v7 = vstv %s2590_s28  ;;  %s2597_s11 = sld [smem:[#allocation8 + $0xb]] }
  0x2b   :  { %v267_v12 = vstv %s2591_s30  ;;  %s2598_s12 = sld [smem:[#allocation8 + $0xc]] }
  0x2c   :  { %v293_v17 = vstv %s2592_s5  ;;  %s2599_s13 = sld [smem:[#allocation8 + $0xd]] }
  0x2d   :  { %110 = vrot.lane.b32.xlu0 %v87_v40, %s2783_s0  ;;  %v333_v23 = vstv %s2594_s7  ;;  %s2668_s14 = sld [smem:[#allocation8 + $0x52]] }
  0x2e   :  { %114 = vrot.lane.b32.xlu1 %v89_v39, %s2783_s0  ;;  %v359_v30 = vstv %s2595_s9  ;;  %s2601_s15 = sld [smem:[#allocation8 + $0xf]] }
  0x2f   :  { %v385_v36 = vstv %s2596_s10  ;;  %s2602_s16 = sld [smem:[#allocation8 + $0x10]] }
  0x30   :  { %v411_v41 = vstv %s2597_s11  ;;  %s2603_s17 = sld [smem:[#allocation8 + $0x11]] }
  0x31   :  { %133 = vrot.lane.b32.xlu0 %v84_v43, %s2783_s0  ;;  %s2604_s20 = sld [smem:[#allocation8 + $0x12]] }
  0x32   :  { %135 = vrot.lane.b32.xlu1 %v85_v44, %s2783_s0  ;;  %s2605_s21 = sld [smem:[#allocation8 + $0x13]] }
  0x33   :  { %s2606_s22 = sld [smem:[#allocation8 + $0x14]] }
  0x34   :  { %s152_s1 = sld [smem:[#allocation8]] }
  0x35   :  { %s2608_s0 = sld [smem:[#allocation8 + $0x16]] }
  0x36   :  { %s2609_s23 = sld [smem:[#allocation8 + $0x17]] }
  0x37   :  { %s2614_s28 = sld [smem:[#allocation8 + $0x1c]] }
  0x38   :  { %s2611_s30 = sld [smem:[#allocation8 + $0x19]] }
  0x39   :  { %s2612_s5 = sld [smem:[#allocation8 + $0x1a]] }
  0x3a   :  { %s2613_s7 = sld [smem:[#allocation8 + $0x1b]] }
  0x3b   :  { %s2615_s9 = sld [smem:[#allocation8 + $0x1d]] }
  0x3c   :  { %s2593_s10 = sld [smem:[#allocation8 + $0x7]] }
  0x3d   :  { %s2616_s11 = sld [smem:[#allocation8 + $0x1e]] }
  0x3e   :  { %s2627_s24 = sld [smem:[#allocation8 + $0x29]] }
  0x3f   :  { %s2629_s26 = sld [smem:[#allocation8 + $0x2b]] }
  0x96   :  { %v132_v45 = vpop.permute.xlu1 %131 }
  0x97   :  { %143 = vst.msk [vmem:[#allocation2 + $0x3b] sm:$0xff] %vm120_vm2, %v132_v45  ;;  %v130_v46 = vpop.permute.xlu0 %129 }
  0x98   :  { %142 = vst.msk [vmem:[#allocation2 + $0x33] sm:$0xff] %vm120_vm2, %v130_v46  ;;  %v437_v46 = vstv %s2598_s12  ;;  %s2621_s12 = sld [smem:[#allocation8 + $0x23]] }
  0x9b   :  { %v109_v48 = vpop.permute.xlu0 %108 }
  0x9c   :  { %v113_v47 = vpop.permute.xlu1 %112  ;;  %121 = vst.msk [vmem:[#allocation2 + $0x3] sm:$0xff] %vm120_vm2, %v109_v48 }
  0x9d   :  { %123 = vst.msk [vmem:[#allocation2 + $0x1b] sm:$0xff] %vm120_vm2, %v113_v47 }
  0x9f   :  { %v111_v50 = vpop.permute.xlu0 %110 }
  0xa0   :  { %v115_v49 = vpop.permute.xlu1 %114  ;;  %122 = vst.msk [vmem:[#allocation2 + $0xb] sm:$0xff] %vm120_vm2, %v111_v50 }
  0xa1   :  { %124 = vst.msk [vmem:[#allocation2 + $0x23] sm:$0xff] %vm120_vm2, %v115_v49 }
  0xa3   :  { %v2830_v52 = vld [vmem:[#allocation2] sm:$0xff]  ;;  %v134_v54 = vpop.permute.xlu0 %133 }
  0xa4   :  { %v2832_v53 = vld [vmem:[#allocation2 + $0x18] sm:$0xff]  ;;  %v136_v55 = vpop.permute.xlu1 %135  ;;  %v164_v56 = vmul.f32 %v163_v51, %v2830_v52  ;;  %144 = vst.msk [vmem:[#allocation2 + $0x4b] sm:$0xff] %vm120_vm2, %v134_v54  ;;  %v190_v62 = vmul.f32 %v189_v60, %v2830_v52  ;;  %v216_v3 = vmul.f32 %v215_v2, %v2830_v52  ;;  %v242_v8 = vmul.f32 %v241_v7, %v2830_v52  ;;  %v2884_v22 = vld [vmem:[#allocation2 + $0x1] sm:$0xff] }
  0xa5   :  { %145 = vst.msk [vmem:[#allocation2 + $0x53] sm:$0xff] %vm120_vm2, %v136_v55  ;;  %v166_v57 = vmul.f32 %v163_v51, %v2832_v53  ;;  %v192_v0 = vmul.f32 %v189_v60, %v2832_v53  ;;  %v218_v5 = vmul.f32 %v215_v2, %v2832_v53  ;;  %v244_v10 = vmul.f32 %v241_v7, %v2832_v53  ;;  %v2890_v26 = vld [vmem:[#allocation2 + $0x19] sm:$0xff] }
  0xa6   :  { %172 = vrot.lane.b32.xlu0 %v164_v56, %s2784_s25  ;;  %v268_v13 = vmul.f32 %v267_v12, %v2830_v52  ;;  %v270_v15 = vmul.f32 %v267_v12, %v2832_v53  ;;  %v294_v18 = vmul.f32 %v293_v17, %v2830_v52  ;;  %v296_v20 = vmul.f32 %v293_v17, %v2832_v53 }
  0xa7   :  { %v2839_v58 = vld [vmem:[#allocation2 + $0x8] sm:$0xff]  ;;  %v334_v24 = vmul.f32 %v333_v23, %v2884_v22  ;;  %v336_v28 = vmul.f32 %v333_v23, %v2890_v26  ;;  %v360_v32 = vmul.f32 %v359_v30, %v2884_v22  ;;  %v362_v34 = vmul.f32 %v359_v30, %v2890_v26 }
  0xa8   :  { %v165_v59 = vmul.f32 %v163_v51, %v2839_v58  ;;  %v2842_v61 = vld [vmem:[#allocation2 + $0x20] sm:$0xff]  ;;  %v191_v1 = vmul.f32 %v189_v60, %v2839_v58  ;;  %v217_v6 = vmul.f32 %v215_v2, %v2839_v58  ;;  %v243_v11 = vmul.f32 %v241_v7, %v2839_v58  ;;  %v2892_v27 = vld [vmem:[#allocation2 + $0x9] sm:$0xff] }
  0xa9   :  { %v167_v63 = vmul.f32 %v163_v51, %v2842_v61  ;;  %v193_v4 = vmul.f32 %v189_v60, %v2842_v61  ;;  %v219_v9 = vmul.f32 %v215_v2, %v2842_v61  ;;  %v245_v14 = vmul.f32 %v241_v7, %v2842_v61  ;;  %v2898_v31 = vld [vmem:[#allocation2 + $0x21] sm:$0xff] }
  0xaa   :  { %176 = vrot.lane.b32.xlu0 %v166_v57, %s2784_s25  ;;  %174 = vrot.lane.b32.xlu1 %v165_v59, %s2784_s25  ;;  %v269_v16 = vmul.f32 %v267_v12, %v2839_v58  ;;  %v271_v19 = vmul.f32 %v267_v12, %v2842_v61  ;;  %v295_v21 = vmul.f32 %v293_v17, %v2839_v58  ;;  %v463_v51 = vstv %s2599_s13  ;;  %s2617_s13 = sld [smem:[#allocation8 + $0x1f]] }
  0xab   :  { %v297_v25 = vmul.f32 %v293_v17, %v2842_v61  ;;  %v335_v29 = vmul.f32 %v333_v23, %v2892_v27  ;;  %v337_v33 = vmul.f32 %v333_v23, %v2898_v31  ;;  %v361_v35 = vmul.f32 %v359_v30, %v2892_v27 }
  0xac   :  { %v386_v37 = vmul.f32 %v385_v36, %v2884_v22  ;;  %v363_v38 = vmul.f32 %v359_v30, %v2898_v31  ;;  %v388_v39 = vmul.f32 %v385_v36, %v2890_v26  ;;  %v387_v40 = vmul.f32 %v385_v36, %v2892_v27  ;;  %v2021_v56 = vld [vmem:[#allocation2 + $0x54] sm:$0xff] }
  0xad   :  { %v412_v42 = vmul.f32 %v411_v41, %v2884_v22  ;;  %v389_v43 = vmul.f32 %v385_v36, %v2898_v31  ;;  %v414_v44 = vmul.f32 %v411_v41, %v2890_v26  ;;  %v413_v45 = vmul.f32 %v411_v41, %v2892_v27 }
  0xae   :  { %198 = vrot.lane.b32.xlu0 %v190_v62, %s2785_s27  ;;  %178 = vrot.lane.b32.xlu1 %v167_v63, %s2784_s25  ;;  %v438_v47 = vmul.f32 %v437_v46, %v2884_v22  ;;  %v415_v48 = vmul.f32 %v411_v41, %v2898_v31  ;;  %v440_v49 = vmul.f32 %v437_v46, %v2890_v26  ;;  %v2938_v57 = vstv %s2668_s14  ;;  %v2945_v63 = vld [vmem:[#allocation2 + $0x2] sm:$0xff]  ;;  %s2618_s14 = sld [smem:[#allocation8 + $0x20]] }
  0xaf   :  { %v439_v50 = vmul.f32 %v437_v46, %v2892_v27  ;;  %v464_v54 = vmul.f32 %v463_v51, %v2884_v22  ;;  %v441_v55 = vmul.f32 %v437_v46, %v2898_v31  ;;  %4077 = vst [vmem:[#allocation13_spill] sm:$0xff] %v2938_v57  ;;  %v2941_v59 = vmul.f32 %v2938_v57, %v2021_v56 }
  0xb0   :  { %v466_v60 = vmul.f32 %v463_v51, %v2890_v26  ;;  %v465_v62 = vmul.f32 %v463_v51, %v2892_v27  ;;  %v467_v2 = vmul.f32 %v463_v51, %v2898_v31  ;;  %v529_v7 = vstv %s2602_s16  ;;  %s2620_s16 = sld [smem:[#allocation8 + $0x22]] }
  0xb1   :  { %4078 = vst [vmem:[#allocation14_spill] sm:$0xff] %v2941_v59  ;;  %v633_v41 = vstv %s2606_s22  ;;  %v153_v46 = vstv %s152_s1  ;;  %v147_v56 = vstv %s4070_s2  ;;  %s3038_s2 = sld [smem:[#allocation8 + $0x18]] }
  0xb2   :  { %202 = vrot.lane.b32.xlu0 %v192_v0, %s2785_s27  ;;  %200 = vrot.lane.b32.xlu1 %v191_v1, %s2785_s27  ;;  %v503_v0 = vstv %s2601_s15  ;;  %v154_v51 = vmul.f32 %v153_v46, %v2830_v52  ;;  %v155_v52 = vmul.f32 %v153_v46, %v2839_v58  ;;  %s2619_s15 = sld [smem:[#allocation8 + $0x21]] }
  0xb3   :  { %v504_v1 = vmul.f32 %v503_v0, %v2945_v63  ;;  %s2628_s22 = sld [smem:[#allocation8 + $0x2a]] }
  0xb4   :  { %s2624_s1 = sld [smem:[#allocation8 + $0x26]] }
  0xb6   :  { %224 = vrot.lane.b32.xlu0 %v216_v3, %s2786_s29  ;;  %204 = vrot.lane.b32.xlu1 %v193_v4, %s2785_s27  ;;  %v2951_v3 = vld [vmem:[#allocation2 + $0x1a] sm:$0xff]  ;;  %v2953_v4 = vld [vmem:[#allocation2 + $0xa] sm:$0xff] }
  0xb7   :  { %v531_v12 = vmul.f32 %v529_v7, %v2953_v4 }
  0xba   :  { %228 = vrot.lane.b32.xlu0 %v218_v5, %s2786_s29  ;;  %226 = vrot.lane.b32.xlu1 %v217_v6, %s2786_s29  ;;  %v506_v5 = vmul.f32 %v503_v0, %v2951_v3  ;;  %v505_v6 = vmul.f32 %v503_v0, %v2953_v4 }
  0xbe   :  { %250 = vrot.lane.b32.xlu0 %v242_v8, %s2787_s4  ;;  %230 = vrot.lane.b32.xlu1 %v219_v9, %s2786_s29  ;;  %v2959_v8 = vld [vmem:[#allocation2 + $0x22] sm:$0xff]  ;;  %v530_v9 = vmul.f32 %v529_v7, %v2945_v63 }
  0xc2   :  { %254 = vrot.lane.b32.xlu0 %v244_v10, %s2787_s4  ;;  %252 = vrot.lane.b32.xlu1 %v243_v11, %s2787_s4  ;;  %v507_v10 = vmul.f32 %v503_v0, %v2959_v8  ;;  %v532_v11 = vmul.f32 %v529_v7, %v2951_v3 }
  0xc6   :  { %276 = vrot.lane.b32.xlu0 %v268_v13, %s2788_s6  ;;  %256 = vrot.lane.b32.xlu1 %v245_v14, %s2787_s4  ;;  %v555_v13 = vstv %s2603_s17  ;;  %s2622_s17 = sld [smem:[#allocation8 + $0x24]] }
  0xc7   :  { %v556_v14 = vmul.f32 %v555_v13, %v2945_v63  ;;  %v558_v17 = vmul.f32 %v555_v13, %v2951_v3 }
  0xca   :  { %280 = vrot.lane.b32.xlu0 %v270_v15, %s2788_s6  ;;  %278 = vrot.lane.b32.xlu1 %v269_v16, %s2788_s6  ;;  %v533_v15 = vmul.f32 %v529_v7, %v2959_v8  ;;  %v3031_v7 = vld [vmem:[#allocation2 + $0xb] sm:$0xff] }
  0xce   :  { %302 = vrot.lane.b32.xlu0 %v294_v18, %s2789_s8  ;;  %282 = vrot.lane.b32.xlu1 %v271_v19, %s2788_s6  ;;  %v557_v18 = vmul.f32 %v555_v13, %v2953_v4  ;;  %v581_v19 = vstv %s2604_s20  ;;  %s2600_s20 = sld [smem:[#allocation8 + $0xe]] }
  0xcf   :  { %v582_v23 = vmul.f32 %v581_v19, %v2945_v63  ;;  %v583_v30 = vmul.f32 %v581_v19, %v2953_v4  ;;  %v585_v36 = vmul.f32 %v581_v19, %v2959_v8 }
  0xd2   :  { %306 = vrot.lane.b32.xlu0 %v296_v20, %s2789_s8  ;;  %304 = vrot.lane.b32.xlu1 %v295_v21, %s2789_s8 }
  0xd6   :  { %342 = vrot.lane.b32.xlu0 %v334_v24, %s2784_s25  ;;  %308 = vrot.lane.b32.xlu1 %v297_v25, %s2789_s8  ;;  %v559_v24 = vmul.f32 %v555_v13, %v2959_v8 }
  0xda   :  { %346 = vrot.lane.b32.xlu0 %v336_v28, %s2784_s25  ;;  %344 = vrot.lane.b32.xlu1 %v335_v29, %s2784_s25  ;;  %v584_v29 = vmul.f32 %v581_v19, %v2951_v3 }
  0xde   :  { %368 = vrot.lane.b32.xlu0 %v360_v32, %s2785_s27  ;;  %348 = vrot.lane.b32.xlu1 %v337_v33, %s2784_s25  ;;  %v607_v32 = vstv %s2605_s21  ;;  %s2623_s21 = sld [smem:[#allocation8 + $0x25]] }
  0xe2   :  { %372 = vrot.lane.b32.xlu0 %v362_v34, %s2785_s27  ;;  %370 = vrot.lane.b32.xlu1 %v361_v35, %s2785_s27  ;;  %v608_v35 = vmul.f32 %v607_v32, %v2945_v63 }
  0xe6   :  { %394 = vrot.lane.b32.xlu0 %v386_v37, %s2786_s29  ;;  %374 = vrot.lane.b32.xlu1 %v363_v38, %s2785_s27 }
  0xea   :  { %398 = vrot.lane.b32.xlu0 %v388_v39, %s2786_s29  ;;  %396 = vrot.lane.b32.xlu1 %v387_v40, %s2786_s29  ;;  %v610_v39 = vmul.f32 %v607_v32, %v2951_v3  ;;  %v609_v40 = vmul.f32 %v607_v32, %v2953_v4 }
  0xee   :  { %420 = vrot.lane.b32.xlu0 %v412_v42, %s2787_s4  ;;  %400 = vrot.lane.b32.xlu1 %v389_v43, %s2786_s29 }
  0xf2   :  { %424 = vrot.lane.b32.xlu0 %v414_v44, %s2787_s4  ;;  %422 = vrot.lane.b32.xlu1 %v413_v45, %s2787_s4  ;;  %v634_v44 = vmul.f32 %v633_v41, %v2945_v63  ;;  %v611_v45 = vmul.f32 %v607_v32, %v2959_v8 }
  0xf6   :  { %446 = vrot.lane.b32.xlu0 %v438_v47, %s2788_s6  ;;  %426 = vrot.lane.b32.xlu1 %v415_v48, %s2787_s4 }
  0xfa   :  { %450 = vrot.lane.b32.xlu0 %v440_v49, %s2788_s6  ;;  %448 = vrot.lane.b32.xlu1 %v439_v50, %s2788_s6  ;;  %v636_v49 = vmul.f32 %v633_v41, %v2951_v3  ;;  %v635_v50 = vmul.f32 %v633_v41, %v2953_v4 }
  0xfe   :  { %472 = vrot.lane.b32.xlu0 %v464_v54, %s2789_s8  ;;  %452 = vrot.lane.b32.xlu1 %v441_v55, %s2788_s6  ;;  %v3018_v54 = vld [vmem:[#allocation2 + $0x3] sm:$0xff]  ;;  %v673_v55 = vstv %s2608_s0  ;;  %s2625_s0 = sld [smem:[#allocation8 + $0x27]] }
  0xff   :  { %v674_v0 = vmul.f32 %v673_v55, %v3018_v54  ;;  %v675_v13 = vmul.f32 %v673_v55, %v3031_v7 }
 0x102   :  { %476 = vrot.lane.b32.xlu0 %v466_v60, %s2789_s8  ;;  %474 = vrot.lane.b32.xlu1 %v465_v62, %s2789_s8 }
 0x106   :  { %512 = vrot.lane.b32.xlu0 %v504_v1, %s2784_s25  ;;  %478 = vrot.lane.b32.xlu1 %v467_v2, %s2789_s8  ;;  %v637_v1 = vmul.f32 %v633_v41, %v2959_v8  ;;  %v158_v2 = vadd.f32 %v154_v51, %v147_v56 }
 0x10a   :  { %516 = vrot.lane.b32.xlu0 %v506_v5, %s2784_s25  ;;  %514 = vrot.lane.b32.xlu1 %v505_v6, %s2784_s25  ;;  %v156_v5 = vmul.f32 %v153_v46, %v2832_v53  ;;  %v3029_v6 = vld [vmem:[#allocation2 + $0x1b] sm:$0xff]  ;;  %v159_v53 = vadd.f32 %v155_v52, %v147_v56 }
 0x10c   :  { %v160_v58 = vadd.f32 %v156_v5, %v147_v56 }
 0x10e   :  { %538 = vrot.lane.b32.xlu0 %v530_v9, %s2785_s27  ;;  %518 = vrot.lane.b32.xlu1 %v507_v10, %s2784_s25 }
 0x112   :  { %542 = vrot.lane.b32.xlu0 %v532_v11, %s2785_s27  ;;  %540 = vrot.lane.b32.xlu1 %v531_v12, %s2785_s27  ;;  %v676_v12 = vmul.f32 %v673_v55, %v3029_v6 }
 0x116   :  { %564 = vrot.lane.b32.xlu0 %v556_v14, %s2786_s29  ;;  %544 = vrot.lane.b32.xlu1 %v533_v15, %s2785_s27  ;;  %v699_v14 = vstv %s2609_s23  ;;  %v157_v15 = vmul.f32 %v153_v46, %v2842_v61  ;;  %s2626_s23 = sld [smem:[#allocation8 + $0x28]] }
 0x117   :  { %v702_v46 = vmul.f32 %v699_v14, %v3029_v6 }
 0x118   :  { %v2975_v16 = vpop.permute.xlu0 %172  ;;  %v161_v61 = vadd.f32 %v157_v15, %v147_v56  ;;  %v3061_v56 = vld [vmem:[#allocation2 + $0xc] sm:$0xff] }
 0x119   :  { %v184_v9 = vadd.f32 %v2975_v16, %v158_v2 }
 0x11a   :  { %568 = vrot.lane.b32.xlu0 %v558_v17, %s2786_s29  ;;  %566 = vrot.lane.b32.xlu1 %v557_v18, %s2786_s29  ;;  %v3041_v18 = vld [vmem:[#allocation2 + $0x23] sm:$0xff] }
 0x11b   :  { %v677_v32 = vmul.f32 %v673_v55, %v3041_v18 }
 0x11c   :  { %v2981_v20 = vpop.permute.xlu1 %174  ;;  %v2983_v21 = vpop.permute.xlu0 %176 }
 0x11d   :  { %v185_v16 = vadd.f32 %v2981_v20, %v159_v53  ;;  %v186_v19 = vadd.f32 %v2983_v21, %v160_v58 }
 0x11e   :  { %590 = vrot.lane.b32.xlu0 %v582_v23, %s2787_s4  ;;  %570 = vrot.lane.b32.xlu1 %v559_v24, %s2786_s29 }
 0x120   :  { %v2989_v25 = vpop.permute.xlu1 %178  ;;  %v199_v28 = vpop.permute.xlu0 %198 }
 0x121   :  { %v210_v17 = vadd.f32 %v199_v28, %v184_v9  ;;  %v187_v20 = vadd.f32 %v2989_v25, %v161_v61  ;;  %v3065_v25 = vld [vmem:[#allocation2 + $0x1c] sm:$0xff] }
 0x122   :  { %594 = vrot.lane.b32.xlu0 %v584_v29, %s2787_s4  ;;  %592 = vrot.lane.b32.xlu1 %v583_v30, %s2787_s4  ;;  %v700_v30 = vmul.f32 %v699_v14, %v3018_v54 }
 0x124   :  { %v2995_v33 = vpop.permute.xlu1 %200  ;;  %v2997_v34 = vpop.permute.xlu0 %202 }
 0x125   :  { %v211_v28 = vadd.f32 %v2995_v33, %v185_v16  ;;  %v701_v33 = vmul.f32 %v699_v14, %v3031_v7 }
 0x126   :  { %616 = vrot.lane.b32.xlu0 %v608_v35, %s2788_s6  ;;  %596 = vrot.lane.b32.xlu1 %v585_v36, %s2787_s4  ;;  %v833_v35 = vstv %s2614_s28  ;;  %v212_v36 = vadd.f32 %v2997_v34, %v186_v19  ;;  %v751_v19 = vstv %s2611_s30  ;;  %s2607_s28 = sld [smem:[#allocation8 + $0x15]] }
 0x127   :  { %v835_v52 = vmul.f32 %v833_v35, %v3061_v56  ;;  %s2631_s30 = sld [smem:[#allocation8 + $0x2d]] }
 0x128   :  { %v3003_v37 = vpop.permute.xlu1 %204  ;;  %v225_v38 = vpop.permute.xlu0 %224 }
 0x129   :  { %v236_v23 = vadd.f32 %v225_v38, %v210_v17 }
 0x12a   :  { %620 = vrot.lane.b32.xlu0 %v610_v39, %s2788_s6  ;;  %618 = vrot.lane.b32.xlu1 %v609_v40, %s2788_s6  ;;  %v3051_v40 = vld [vmem:[#allocation2 + $0x4] sm:$0xff] }
 0x12b   :  { %v834_v34 = vmul.f32 %v833_v35, %v3051_v40 }
 0x12c   :  { %v227_v42 = vpop.permute.xlu1 %226  ;;  %v229_v43 = vpop.permute.xlu0 %228 }
 0x12d   :  { %v237_v21 = vadd.f32 %v227_v42, %v211_v28  ;;  %v238_v38 = vadd.f32 %v229_v43, %v212_v36  ;;  %v754_v36 = vmul.f32 %v751_v19, %v3029_v6 }
 0x12e   :  { %642 = vrot.lane.b32.xlu0 %v634_v44, %s2789_s8  ;;  %622 = vrot.lane.b32.xlu1 %v611_v45, %s2788_s6 }
 0x130   :  { %v3013_v47 = vpop.permute.xlu1 %230  ;;  %v251_v48 = vpop.permute.xlu0 %250 }
 0x131   :  { %v262_v39 = vadd.f32 %v251_v48, %v236_v23  ;;  %v213_v48 = vadd.f32 %v3003_v37, %v187_v20  ;;  %v777_v20 = vstv %s2612_s5  ;;  %s2635_s5 = sld [smem:[#allocation8 + $0x31]] }
 0x132   :  { %646 = vrot.lane.b32.xlu0 %v636_v49, %s2789_s8  ;;  %644 = vrot.lane.b32.xlu1 %v635_v50, %s2789_s8  ;;  %v725_v49 = vstv %s3038_s2  ;;  %s2630_s2 = sld [smem:[#allocation8 + $0x2c]] }
 0x133   :  { %v239_v42 = vadd.f32 %v3013_v47, %v213_v48  ;;  %v3076_v47 = vld [vmem:[#allocation2 + $0x24] sm:$0xff]  ;;  %v728_v17 = vmul.f32 %v725_v49, %v3029_v6  ;;  %v729_v61 = vmul.f32 %v725_v49, %v3041_v18 }
 0x134   :  { %v253_v60 = vpop.permute.xlu1 %252  ;;  %v255_v62 = vpop.permute.xlu0 %254  ;;  %v837_v23 = vmul.f32 %v833_v35, %v3076_v47 }
 0x135   :  { %v263_v50 = vadd.f32 %v253_v60, %v237_v21  ;;  %v264_v51 = vadd.f32 %v255_v62, %v238_v38  ;;  %v726_v60 = vmul.f32 %v725_v49, %v3018_v54  ;;  %v703_v62 = vmul.f32 %v699_v14, %v3041_v18 }
 0x136   :  { %682 = vrot.lane.b32.xlu0 %v674_v0, %s2784_s25  ;;  %648 = vrot.lane.b32.xlu1 %v637_v1, %s2789_s8 }
 0x138   :  { %v257_v10 = vpop.permute.xlu1 %256  ;;  %v277_v11 = vpop.permute.xlu0 %276 }
 0x139   :  { %v288_v41 = vadd.f32 %v277_v11, %v262_v39  ;;  %v265_v5 = vadd.f32 %v257_v10, %v239_v42  ;;  %v727_v10 = vmul.f32 %v725_v49, %v3031_v7  ;;  %v753_v39 = vmul.f32 %v751_v19, %v3031_v7 }
 0x13a   :  { %686 = vrot.lane.b32.xlu0 %v676_v12, %s2784_s25  ;;  %684 = vrot.lane.b32.xlu1 %v675_v13, %s2784_s25  ;;  %v836_v12 = vmul.f32 %v833_v35, %v3065_v25  ;;  %v779_v49 = vmul.f32 %v777_v20, %v3031_v7 }
 0x13c   :  { %v279_v24 = vpop.permute.xlu1 %278  ;;  %v281_v29 = vpop.permute.xlu0 %280 }
 0x13d   :  { %v289_v43 = vadd.f32 %v279_v24, %v263_v50  ;;  %v290_v0 = vadd.f32 %v281_v29, %v264_v51 }
 0x13e   :  { %708 = vrot.lane.b32.xlu0 %v700_v30, %s2785_s27  ;;  %688 = vrot.lane.b32.xlu1 %v677_v32, %s2784_s25  ;;  %v752_v32 = vmul.f32 %v751_v19, %v3018_v54 }
 0x140   :  { %v283_v44 = vpop.permute.xlu1 %282  ;;  %v303_v45 = vpop.permute.xlu0 %302 }
 0x141   :  { %v314_v55 = vadd.f32 %v303_v45, %v288_v41  ;;  %v291_v13 = vadd.f32 %v283_v44, %v265_v5  ;;  %v778_v41 = vmul.f32 %v777_v20, %v3018_v54  ;;  %v755_v44 = vmul.f32 %v751_v19, %v3041_v18 }
 0x142   :  { %712 = vrot.lane.b32.xlu0 %v702_v46, %s2785_s27  ;;  %710 = vrot.lane.b32.xlu1 %v701_v33, %s2785_s27  ;;  %v780_v33 = vmul.f32 %v777_v20, %v3029_v6  ;;  %v869_v19 = vstv %s2616_s11  ;;  %s2636_s11 = sld [smem:[#allocation8 + $0x32]] }
 0x143   :  { %v3068_v1 = vadd.f32 %v834_v34, %v314_v55  ;;  %v803_v34 = vstv %s2613_s7  ;;  %v781_v55 = vmul.f32 %v777_v20, %v3041_v18  ;;  %s2632_s7 = sld [smem:[#allocation8 + $0x2e]] }
 0x144   :  { %v305_v2 = vpop.permute.xlu1 %304  ;;  %v307_v37 = vpop.permute.xlu0 %306  ;;  %v804_v51 = vmul.f32 %v803_v34, %v3018_v54 }
 0x145   :  { %v315_v9 = vadd.f32 %v305_v2, %v289_v43  ;;  %v316_v11 = vadd.f32 %v307_v37, %v290_v0  ;;  %v805_v0 = vmul.f32 %v803_v34, %v3031_v7  ;;  %v806_v2 = vmul.f32 %v803_v34, %v3029_v6 }
 0x146   :  { %734 = vrot.lane.b32.xlu0 %v726_v60, %s2786_s29  ;;  %714 = vrot.lane.b32.xlu1 %v703_v62, %s2785_s27  ;;  %v843_v37 = vstv %s2615_s9  ;;  %v323_v60 = vstv %s2593_s10  ;;  %s2633_s9 = sld [smem:[#allocation8 + $0x2f]] }
 0x147   :  { %v3078_v53 = vadd.f32 %v835_v52, %v315_v9  ;;  %v3080_v58 = vadd.f32 %v836_v12, %v316_v11  ;;  %v807_v52 = vmul.f32 %v803_v34, %v3041_v18  ;;  %v844_v5 = vmul.f32 %v843_v37, %v3051_v40  ;;  %s2634_s10 = sld [smem:[#allocation8 + $0x30]] }
 0x148   :  { %v309_v15 = vpop.permute.xlu1 %308  ;;  %v343_v14 = vpop.permute.xlu0 %342  ;;  %v324_v9 = vmul.f32 %v323_v60, %v2884_v22 }
 0x149   :  { %v317_v16 = vadd.f32 %v309_v15, %v291_v13  ;;  %v845_v13 = vmul.f32 %v843_v37, %v3061_v56  ;;  %v846_v15 = vmul.f32 %v843_v37, %v3065_v25 }
 0x14a   :  { %738 = vrot.lane.b32.xlu0 %v728_v17, %s2786_s29  ;;  %736 = vrot.lane.b32.xlu1 %v727_v10, %s2786_s29  ;;  %v354_v7 = vadd.f32 %v343_v14, %v324_v9  ;;  %v325_v17 = vmul.f32 %v323_v60, %v2892_v27  ;;  %v326_v10 = vmul.f32 %v323_v60, %v2890_v26  ;;  %v1003_v27 = vstv %s2621_s12  ;;  %s2637_s12 = sld [smem:[#allocation8 + $0x33]] }
 0x14b   :  { %v3087_v24 = vadd.f32 %v837_v23, %v317_v16  ;;  %v327_v26 = vmul.f32 %v323_v60, %v2898_v31  ;;  %v872_v31 = vmul.f32 %v869_v19, %v3065_v25 }
 0x14c   :  { %v3089_v29 = vpop.permute.xlu1 %344  ;;  %v3091_v30 = vpop.permute.xlu0 %346 }
 0x14d   :  { %v355_v22 = vadd.f32 %v3089_v29, %v325_v17  ;;  %v356_v14 = vadd.f32 %v3091_v30, %v326_v10 }
 0x14e   :  { %760 = vrot.lane.b32.xlu0 %v752_v32, %s2787_s4  ;;  %740 = vrot.lane.b32.xlu1 %v729_v61, %s2786_s29 }
 0x150   :  { %v3097_v28 = vpop.permute.xlu1 %348  ;;  %v369_v35 = vpop.permute.xlu0 %368 }
 0x151   :  { %v380_v16 = vadd.f32 %v369_v35, %v354_v7  ;;  %v357_v29 = vadd.f32 %v3097_v28, %v327_v26  ;;  %v3152_v28 = vld [vmem:[#allocation2 + $0x1d] sm:$0xff] }
 0x152   :  { %764 = vrot.lane.b32.xlu0 %v754_v36, %s2787_s4  ;;  %762 = vrot.lane.b32.xlu1 %v753_v39, %s2787_s4  ;;  %v847_v36 = vmul.f32 %v843_v37, %v3076_v47  ;;  %v870_v39 = vmul.f32 %v869_v19, %v3051_v40  ;;  %v3148_v37 = vld [vmem:[#allocation2 + $0xd] sm:$0xff] }
 0x153   :  { %v1005_v9 = vmul.f32 %v1003_v27, %v3148_v37 }
 0x154   :  { %v371_v21 = vpop.permute.xlu1 %370  ;;  %v373_v38 = vpop.permute.xlu0 %372 }
 0x155   :  { %v381_v35 = vadd.f32 %v371_v21, %v355_v22  ;;  %v382_v20 = vadd.f32 %v373_v38, %v356_v14  ;;  %v895_v21 = vstv %s2617_s13  ;;  %s2638_s13 = sld [smem:[#allocation8 + $0x34]] }
 0x156   :  { %786 = vrot.lane.b32.xlu0 %v778_v41, %s2788_s6  ;;  %766 = vrot.lane.b32.xlu1 %v755_v44, %s2787_s4  ;;  %v3139_v44 = vld [vmem:[#allocation2 + $0x5] sm:$0xff]  ;;  %v897_v14 = vmul.f32 %v895_v21, %v3061_v56 }
 0x157   :  { %v1004_v38 = vmul.f32 %v1003_v27, %v3139_v44 }
 0x158   :  { %v3107_v45 = vpop.permute.xlu1 %374  ;;  %v395_v46 = vpop.permute.xlu0 %394 }
 0x159   :  { %v406_v23 = vadd.f32 %v395_v46, %v380_v16 }
 0x15a   :  { %790 = vrot.lane.b32.xlu0 %v780_v33, %s2788_s6  ;;  %788 = vrot.lane.b32.xlu1 %v779_v49, %s2788_s6 }
 0x15b   :  { %v1405_v59 = vstv %s2638_s13  ;;  %s2659_s13 = sld [smem:[#allocation8 + $0x49]] }
 0x15c   :  { %v397_v48 = vpop.permute.xlu1 %396  ;;  %v399_v50 = vpop.permute.xlu0 %398 }
 0x15d   :  { %v407_v30 = vadd.f32 %v397_v48, %v381_v35  ;;  %v408_v46 = vadd.f32 %v399_v50, %v382_v20  ;;  %v899_v35 = vmul.f32 %v895_v21, %v3076_v47 }
 0x15e   :  { %812 = vrot.lane.b32.xlu0 %v804_v51, %s2789_s8  ;;  %792 = vrot.lane.b32.xlu1 %v781_v55, %s2788_s6  ;;  %v871_v51 = vmul.f32 %v869_v19, %v3061_v56  ;;  %v383_v55 = vadd.f32 %v3107_v45, %v357_v29 }
 0x160   :  { %v3117_v42 = vpop.permute.xlu1 %400  ;;  %v421_v43 = vpop.permute.xlu0 %420 }
 0x161   :  { %v432_v41 = vadd.f32 %v421_v43, %v406_v23  ;;  %v409_v48 = vadd.f32 %v3117_v42, %v383_v55  ;;  %v3163_v42 = vld [vmem:[#allocation2 + $0x25] sm:$0xff] }
 0x162   :  { %814 = vrot.lane.b32.xlu1 %v805_v0, %s2789_s8  ;;  %816 = vrot.lane.b32.xlu0 %v806_v2, %s2789_s8 }
 0x164   :  { %v423_v54 = vpop.permute.xlu1 %422  ;;  %v425_v62 = vpop.permute.xlu0 %424 }
 0x165   :  { %v433_v43 = vadd.f32 %v423_v54, %v407_v30  ;;  %v434_v0 = vadd.f32 %v425_v62, %v408_v46  ;;  %v873_v54 = vmul.f32 %v869_v19, %v3076_v47  ;;  %v896_v62 = vmul.f32 %v895_v21, %v3051_v40 }
 0x166   :  { %818 = vrot.lane.b32.xlu1 %v807_v52, %s2789_s8  ;;  %852 = vrot.lane.b32.xlu0 %v844_v5, %s2784_s25  ;;  %v947_v46 = vstv %s2619_s15  ;;  %s2639_s15 = sld [smem:[#allocation8 + $0x35]] }
 0x167   :  { %v950_v55 = vmul.f32 %v947_v46, %v3065_v25 }
 0x168   :  { %v427_v11 = vpop.permute.xlu1 %426  ;;  %v447_v12 = vpop.permute.xlu0 %446 }
 0x169   :  { %v458_v33 = vadd.f32 %v447_v12, %v432_v41  ;;  %v435_v7 = vadd.f32 %v427_v11, %v409_v48  ;;  %v898_v11 = vmul.f32 %v895_v21, %v3065_v25  ;;  %v951_v48 = vmul.f32 %v947_v46, %v3076_v47 }
 0x16a   :  { %854 = vrot.lane.b32.xlu1 %v845_v13, %s2784_s25  ;;  %856 = vrot.lane.b32.xlu0 %v846_v15, %s2784_s25  ;;  %v1006_v15 = vmul.f32 %v1003_v27, %v3152_v28 }
 0x16c   :  { %v449_v32 = vpop.permute.xlu1 %448  ;;  %v451_v61 = vpop.permute.xlu0 %450 }
 0x16d   :  { %v459_v50 = vadd.f32 %v449_v32, %v433_v43  ;;  %v460_v60 = vadd.f32 %v451_v61, %v434_v0  ;;  %v921_v32 = vstv %s2618_s14  ;;  %v1007_v61 = vmul.f32 %v1003_v27, %v3163_v42  ;;  %s2642_s14 = sld [smem:[#allocation8 + $0x38]] }
 0x16e   :  { %858 = vrot.lane.b32.xlu1 %v847_v36, %s2784_s25  ;;  %878 = vrot.lane.b32.xlu0 %v870_v39, %s2785_s27  ;;  %v922_v20 = vmul.f32 %v921_v32, %v3051_v40  ;;  %v923_v29 = vmul.f32 %v921_v32, %v3061_v56  ;;  %v924_v30 = vmul.f32 %v921_v32, %v3065_v25  ;;  %v973_v43 = vstv %s2620_s16  ;;  %s2640_s16 = sld [smem:[#allocation8 + $0x36]] }
 0x170   :  { %v453_v49 = vpop.permute.xlu1 %452  ;;  %v473_v34 = vpop.permute.xlu0 %472 }
 0x171   :  { %v484_v2 = vadd.f32 %v473_v34, %v458_v33  ;;  %v461_v17 = vadd.f32 %v453_v49, %v435_v7  ;;  %v925_v34 = vmul.f32 %v921_v32, %v3076_v47  ;;  %v1039_v32 = vstv %s2623_s21  ;;  %s2644_s21 = sld [smem:[#allocation8 + $0x3a]] }
 0x172   :  { %880 = vrot.lane.b32.xlu1 %v871_v51, %s2785_s27  ;;  %882 = vrot.lane.b32.xlu0 %v872_v31, %s2785_s27  ;;  %v948_v51 = vmul.f32 %v947_v46, %v3051_v40 }
 0x173   :  { %v3155_v52 = vadd.f32 %v1004_v38, %v484_v2  ;;  %v949_v38 = vmul.f32 %v947_v46, %v3061_v56 }
 0x174   :  { %v475_v5 = vpop.permute.xlu1 %474  ;;  %v477_v45 = vpop.permute.xlu0 %476 }
 0x175   :  { %v485_v12 = vadd.f32 %v475_v5, %v459_v50  ;;  %v486_v13 = vadd.f32 %v477_v45, %v460_v60  ;;  %v974_v50 = vmul.f32 %v973_v43, %v3051_v40  ;;  %v975_v45 = vmul.f32 %v973_v43, %v3061_v56 }
 0x176   :  { %884 = vrot.lane.b32.xlu1 %v873_v54, %s2785_s27  ;;  %904 = vrot.lane.b32.xlu0 %v896_v62, %s2786_s29  ;;  %v976_v54 = vmul.f32 %v973_v43, %v3065_v25  ;;  %v1013_v62 = vstv %s2622_s17  ;;  %s2641_s17 = sld [smem:[#allocation8 + $0x37]] }
 0x177   :  { %v3165_v10 = vadd.f32 %v1005_v9, %v485_v12  ;;  %v3167_v16 = vadd.f32 %v1006_v15, %v486_v13  ;;  %v493_v9 = vstv %s2600_s20  ;;  %v977_v12 = vmul.f32 %v973_v43, %v3076_v47  ;;  %s2643_s20 = sld [smem:[#allocation8 + $0x39]] }
 0x178   :  { %v479_v19 = vpop.permute.xlu1 %478  ;;  %v513_v22 = vpop.permute.xlu0 %512  ;;  %v1014_v13 = vmul.f32 %v1013_v62, %v3139_v44  ;;  %v494_v15 = vmul.f32 %v493_v9, %v2945_v63  ;;  %v496_v47 = vmul.f32 %v493_v9, %v2951_v3  ;;  %v497_v3 = vmul.f32 %v493_v9, %v2959_v8 }
 0x179   :  { %v487_v23 = vadd.f32 %v479_v19, %v461_v17  ;;  %v1015_v19 = vmul.f32 %v1013_v62, %v3148_v37  ;;  %v1042_v8 = vmul.f32 %v1039_v32, %v3152_v28 }
 0x17a   :  { %906 = vrot.lane.b32.xlu1 %v897_v14, %s2786_s29  ;;  %908 = vrot.lane.b32.xlu0 %v898_v11, %s2786_s29  ;;  %v524_v56 = vadd.f32 %v513_v22, %v494_v15  ;;  %v1016_v14 = vmul.f32 %v1013_v62, %v3152_v28  ;;  %v495_v11 = vmul.f32 %v493_v9, %v2953_v4  ;;  %v1173_v4 = vstv %s2628_s22  ;;  %s2649_s22 = sld [smem:[#allocation8 + $0x3f]] }
 0x17b   :  { %v3174_v36 = vadd.f32 %v1007_v61, %v487_v23 }
 0x17c   :  { %v3176_v39 = vpop.permute.xlu1 %514  ;;  %v3178_v26 = vpop.permute.xlu0 %516 }
 0x17d   :  { %v525_v63 = vadd.f32 %v3176_v39, %v495_v11  ;;  %v526_v22 = vadd.f32 %v3178_v26, %v496_v47 }
 0x17e   :  { %910 = vrot.lane.b32.xlu1 %v899_v35, %s2786_s29  ;;  %930 = vrot.lane.b32.xlu0 %v922_v20, %s2787_s4 }
 0x180   :  { %v3184_v41 = vpop.permute.xlu1 %518  ;;  %v539_v27 = vpop.permute.xlu0 %538 }
 0x181   :  { %v550_v23 = vadd.f32 %v539_v27, %v524_v56  ;;  %v527_v39 = vadd.f32 %v3184_v41, %v497_v3  ;;  %v3239_v41 = vld [vmem:[#allocation2 + $0x1e] sm:$0xff] }
 0x182   :  { %932 = vrot.lane.b32.xlu1 %v923_v29, %s2787_s4  ;;  %934 = vrot.lane.b32.xlu0 %v924_v30, %s2787_s4  ;;  %v1017_v29 = vmul.f32 %v1013_v62, %v3163_v42  ;;  %v1040_v30 = vmul.f32 %v1039_v32, %v3139_v44  ;;  %v3235_v62 = vld [vmem:[#allocation2 + $0xe] sm:$0xff] }
 0x183   :  { %v1175_v15 = vmul.f32 %v1173_v4, %v3235_v62 }
 0x184   :  { %v541_v33 = vpop.permute.xlu1 %540  ;;  %v543_v49 = vpop.permute.xlu0 %542 }
 0x185   :  { %v551_v27 = vadd.f32 %v541_v33, %v525_v63  ;;  %v552_v46 = vadd.f32 %v543_v49, %v526_v22  ;;  %v1065_v33 = vstv %s2624_s1  ;;  %s2645_s1 = sld [smem:[#allocation8 + $0x3b]] }
 0x186   :  { %936 = vrot.lane.b32.xlu1 %v925_v34, %s2787_s4  ;;  %956 = vrot.lane.b32.xlu0 %v948_v51, %s2788_s6  ;;  %v3226_v51 = vld [vmem:[#allocation2 + $0x6] sm:$0xff]  ;;  %v1068_v22 = vmul.f32 %v1065_v33, %v3152_v28 }
 0x187   :  { %v1174_v49 = vmul.f32 %v1173_v4, %v3226_v51 }
 0x188   :  { %v3194_v31 = vpop.permute.xlu1 %544  ;;  %v565_v21 = vpop.permute.xlu0 %564 }
 0x189   :  { %v576_v61 = vadd.f32 %v565_v21, %v550_v23 }
 0x18a   :  { %958 = vrot.lane.b32.xlu1 %v949_v38, %s2788_s6  ;;  %960 = vrot.lane.b32.xlu0 %v950_v55, %s2788_s6 }
 0x18c   :  { %v567_v0 = vpop.permute.xlu1 %566  ;;  %v569_v2 = vpop.permute.xlu0 %568 }
 0x18d   :  { %v577_v26 = vadd.f32 %v567_v0, %v551_v27  ;;  %v578_v21 = vadd.f32 %v569_v2, %v552_v46  ;;  %v1069_v27 = vmul.f32 %v1065_v33, %v3163_v42 }
 0x18e   :  { %962 = vrot.lane.b32.xlu1 %v951_v48, %s2788_s6  ;;  %982 = vrot.lane.b32.xlu0 %v974_v50, %s2789_s8  ;;  %v1041_v48 = vmul.f32 %v1039_v32, %v3148_v37  ;;  %v553_v50 = vadd.f32 %v3194_v31, %v527_v39 }
 0x190   :  { %v3204_v60 = vpop.permute.xlu1 %570  ;;  %v591_v5 = vpop.permute.xlu0 %590 }
 0x191   :  { %v602_v34 = vadd.f32 %v591_v5, %v576_v61  ;;  %v579_v0 = vadd.f32 %v3204_v60, %v553_v50  ;;  %v3250_v60 = vld [vmem:[#allocation2 + $0x26] sm:$0xff] }
 0x192   :  { %984 = vrot.lane.b32.xlu1 %v975_v45, %s2789_s8  ;;  %986 = vrot.lane.b32.xlu0 %v976_v54, %s2789_s8 }
 0x194   :  { %v593_v7 = vpop.permute.xlu1 %592  ;;  %v595_v40 = vpop.permute.xlu0 %594 }
 0x195   :  { %v603_v5 = vadd.f32 %v593_v7, %v577_v26  ;;  %v604_v45 = vadd.f32 %v595_v40, %v578_v21  ;;  %v1043_v7 = vmul.f32 %v1039_v32, %v3163_v42  ;;  %v1066_v40 = vmul.f32 %v1065_v33, %v3139_v44 }
 0x196   :  { %988 = vrot.lane.b32.xlu1 %v977_v12, %s2789_s8  ;;  %1022 = vrot.lane.b32.xlu0 %v1014_v13, %s2784_s25  ;;  %v1117_v21 = vstv %s2626_s23  ;;  %s2647_s23 = sld [smem:[#allocation8 + $0x3d]] }
 0x197   :  { %v1120_v50 = vmul.f32 %v1117_v21, %v3152_v28 }
 0x198   :  { %v597_v25 = vpop.permute.xlu1 %596  ;;  %v617_v17 = vpop.permute.xlu0 %616 }
 0x199   :  { %v628_v38 = vadd.f32 %v617_v17, %v602_v34  ;;  %v605_v56 = vadd.f32 %v597_v25, %v579_v0  ;;  %v1067_v25 = vmul.f32 %v1065_v33, %v3148_v37  ;;  %v1121_v0 = vmul.f32 %v1117_v21, %v3163_v42 }
 0x19a   :  { %1024 = vrot.lane.b32.xlu1 %v1015_v19, %s2784_s25  ;;  %1026 = vrot.lane.b32.xlu0 %v1016_v14, %s2784_s25  ;;  %v1176_v14 = vmul.f32 %v1173_v4, %v3239_v41 }
 0x19c   :  { %v619_v35 = vpop.permute.xlu1 %618  ;;  %v621_v20 = vpop.permute.xlu0 %620 }
 0x19d   :  { %v629_v2 = vadd.f32 %v619_v35, %v603_v5  ;;  %v630_v9 = vadd.f32 %v621_v20, %v604_v45  ;;  %v1091_v35 = vstv %s2625_s0  ;;  %v1177_v20 = vmul.f32 %v1173_v4, %v3250_v60  ;;  %s2646_s0 = sld [smem:[#allocation8 + $0x3c]] }
 0x19e   :  { %1028 = vrot.lane.b32.xlu1 %v1017_v29, %s2784_s25  ;;  %1048 = vrot.lane.b32.xlu0 %v1040_v30, %s2785_s27  ;;  %v1092_v46 = vmul.f32 %v1091_v35, %v3139_v44  ;;  %v1093_v39 = vmul.f32 %v1091_v35, %v3148_v37  ;;  %v1094_v26 = vmul.f32 %v1091_v35, %v3152_v28  ;;  %v1143_v5 = vstv %s2627_s24  ;;  %s2648_s24 = sld [smem:[#allocation8 + $0x3e]] }
 0x1a0   :  { %v623_v55 = vpop.permute.xlu1 %622  ;;  %v643_v43 = vpop.permute.xlu0 %642 }
 0x1a1   :  { %v654_v54 = vadd.f32 %v643_v43, %v628_v38  ;;  %v631_v11 = vadd.f32 %v623_v55, %v605_v56  ;;  %v1095_v43 = vmul.f32 %v1091_v35, %v3163_v42  ;;  %v1147_v56 = vmul.f32 %v1143_v5, %v3163_v42 }
 0x1a2   :  { %1050 = vrot.lane.b32.xlu1 %v1041_v48, %s2785_s27  ;;  %1052 = vrot.lane.b32.xlu0 %v1042_v8, %s2785_s27  ;;  %v1118_v48 = vmul.f32 %v1117_v21, %v3139_v44 }
 0x1a3   :  { %v3242_v12 = vadd.f32 %v1174_v49, %v654_v54  ;;  %v1119_v49 = vmul.f32 %v1117_v21, %v3148_v37 }
 0x1a4   :  { %v645_v13 = vpop.permute.xlu1 %644  ;;  %v647_v31 = vpop.permute.xlu0 %646 }
 0x1a5   :  { %v655_v17 = vadd.f32 %v645_v13, %v629_v2  ;;  %v656_v19 = vadd.f32 %v647_v31, %v630_v9  ;;  %v1144_v2 = vmul.f32 %v1143_v5, %v3139_v44  ;;  %v1145_v31 = vmul.f32 %v1143_v5, %v3148_v37 }
 0x1a6   :  { %1054 = vrot.lane.b32.xlu1 %v1043_v7, %s2785_s27  ;;  %1074 = vrot.lane.b32.xlu0 %v1066_v40, %s2786_s29  ;;  %v1146_v7 = vmul.f32 %v1143_v5, %v3152_v28  ;;  %v1183_v40 = vstv %s2629_s26  ;;  %v3309_v37 = vstv %s2607_s28  ;;  %s2650_s26 = sld [smem:[#allocation8 + $0x40]] }
 0x1a7   :  { %v3252_v47 = vadd.f32 %v1175_v15, %v655_v17  ;;  %v3254_v23 = vadd.f32 %v1176_v14, %v656_v19  ;;  %v1184_v17 = vmul.f32 %v1183_v40, %v3226_v51  ;;  %v1185_v14 = vmul.f32 %v1183_v40, %v3235_v62  ;;  %s2651_s28 = sld [smem:[#allocation8 + $0x41]] }
 0x1a8   :  { %v649_v32 = vpop.permute.xlu1 %648  ;;  %v3256_v63 = vpop.permute.xlu0 %682  ;;  %v1187_v35 = vmul.f32 %v1183_v40, %v3250_v60 }
 0x1a9   :  { %4079 = vst [vmem:[#allocation15_spill] sm:$0xff] %v3252_v47  ;;  %v657_v61 = vadd.f32 %v649_v32, %v631_v11  ;;  %v1186_v11 = vmul.f32 %v1183_v40, %v3239_v41  ;;  %v666_v32 = vmul.f32 %v3309_v37, %v3029_v6 }
 0x1aa   :  { %1076 = vrot.lane.b32.xlu1 %v1067_v25, %s2786_s29  ;;  %1078 = vrot.lane.b32.xlu0 %v1068_v22, %s2786_s29  ;;  %v1209_v25 = vstv %s2630_s2  ;;  %s2656_s2 = sld [smem:[#allocation8 + $0x46]] }
 0x1ab   :  { %v3263_v29 = vadd.f32 %v1177_v20, %v657_v61  ;;  %v1210_v20 = vmul.f32 %v1209_v25, %v3226_v51  ;;  %v1211_v21 = vmul.f32 %v1209_v25, %v3235_v62 }
 0x1ac   :  { %v3265_v30 = vpop.permute.xlu1 %684  ;;  %v687_v3 = vpop.permute.xlu0 %686 }
 0x1ad   :  { %v696_v42 = vadd.f32 %v687_v3, %v666_v32 }
 0x1ae   :  { %1080 = vrot.lane.b32.xlu1 %v1069_v27, %s2786_s29  ;;  %1100 = vrot.lane.b32.xlu0 %v1092_v46, %s2787_s4  ;;  %v667_v27 = vmul.f32 %v3309_v37, %v3041_v18  ;;  %v3334_v18 = vld [vmem:[#allocation2 + $0x48] sm:$0xff] }
 0x1b0   :  { %v3271_v34 = vpop.permute.xlu1 %688  ;;  %v3273_v4 = vpop.permute.xlu0 %708 }
 0x1b1   :  { %v697_v6 = vadd.f32 %v3271_v34, %v667_v27 }
 0x1b2   :  { %1102 = vrot.lane.b32.xlu1 %v1093_v39, %s2787_s4  ;;  %1104 = vrot.lane.b32.xlu0 %v1094_v26, %s2787_s4 }
 0x1b4   :  { %v3279_v38 = vpop.permute.xlu1 %710  ;;  %v713_v55 = vpop.permute.xlu0 %712 }
 0x1b5   :  { %v722_v46 = vadd.f32 %v713_v55, %v696_v42 }
 0x1b6   :  { %1106 = vrot.lane.b32.xlu1 %v1095_v43, %s2787_s4  ;;  %1126 = vrot.lane.b32.xlu0 %v1118_v48, %s2788_s6  ;;  %v1212_v43 = vmul.f32 %v1209_v25, %v3239_v41 }
 0x1b8   :  { %v715_v8 = vpop.permute.xlu1 %714  ;;  %v3285_v33 = vpop.permute.xlu0 %734 }
 0x1b9   :  { %v723_v48 = vadd.f32 %v715_v8, %v697_v6 }
 0x1ba   :  { %1128 = vrot.lane.b32.xlu1 %v1119_v49, %s2788_s6  ;;  %1130 = vrot.lane.b32.xlu0 %v1120_v50, %s2788_s6  ;;  %v1235_v50 = vstv %s2631_s30  ;;  %s2652_s30 = sld [smem:[#allocation8 + $0x42]] }
 0x1bb   :  { %v1239_v27 = vmul.f32 %v1235_v50, %v3250_v60 }
 0x1bc   :  { %v3291_v45 = vpop.permute.xlu1 %736  ;;  %v739_v54 = vpop.permute.xlu0 %738 }
 0x1bd   :  { %v748_v39 = vadd.f32 %v739_v54, %v722_v46 }
 0x1be   :  { %1132 = vrot.lane.b32.xlu1 %v1121_v0, %s2788_s6  ;;  %1152 = vrot.lane.b32.xlu0 %v1144_v2, %s2789_s8  ;;  %v1213_v0 = vmul.f32 %v1209_v25, %v3250_v60  ;;  %v1236_v2 = vmul.f32 %v1235_v50, %v3226_v51  ;;  %v1261_v25 = vstv %s2632_s7  ;;  %s2654_s7 = sld [smem:[#allocation8 + $0x44]] }
 0x1bf   :  { %v1262_v46 = vmul.f32 %v1261_v25, %v3226_v51 }
 0x1c0   :  { %v741_v9 = vpop.permute.xlu1 %740  ;;  %v3297_v13 = vpop.permute.xlu0 %760 }
 0x1c1   :  { %v749_v55 = vadd.f32 %v741_v9, %v723_v48  ;;  %v3346_v9 = vld [vmem:[#allocation2 + $0x50] sm:$0xff] }
 0x1c2   :  { %1154 = vrot.lane.b32.xlu1 %v1145_v31, %s2789_s8  ;;  %1156 = vrot.lane.b32.xlu0 %v1146_v7, %s2789_s8  ;;  %v3340_v31 = vstv %s2635_s5  ;;  %s2653_s5 = sld [smem:[#allocation8 + $0x43]] }
 0x1c3   :  { %v1346_v40 = vmul.f32 %v3340_v31, %v3334_v18  ;;  %v1347_v42 = vmul.f32 %v3340_v31, %v3346_v9 }
 0x1c4   :  { %v3303_v15 = vpop.permute.xlu1 %762  ;;  %v765_v44 = vpop.permute.xlu0 %764 }
 0x1c5   :  { %v774_v49 = vadd.f32 %v765_v44, %v748_v39 }
 0x1c6   :  { %1158 = vrot.lane.b32.xlu1 %v1147_v56, %s2789_s8  ;;  %1192 = vrot.lane.b32.xlu0 %v1184_v17, %s2784_s25 }
 0x1c8   :  { %v767_v28 = vpop.permute.xlu1 %766  ;;  %v3311_v19 = vpop.permute.xlu0 %786 }
 0x1c9   :  { %v775_v8 = vadd.f32 %v767_v28, %v749_v55  ;;  %v1238_v28 = vmul.f32 %v1235_v50, %v3239_v41 }
 0x1ca   :  { %1194 = vrot.lane.b32.xlu1 %v1185_v14, %s2784_s25  ;;  %1196 = vrot.lane.b32.xlu0 %v1186_v11, %s2784_s25  ;;  %v1237_v11 = vmul.f32 %v1235_v50, %v3235_v62  ;;  %v1265_v50 = vmul.f32 %v1261_v25, %v3250_v60 }
 0x1cc   :  { %v3319_v22 = vpop.permute.xlu1 %788  ;;  %v791_v61 = vpop.permute.xlu0 %790 }
 0x1cd   :  { %v800_v34 = vadd.f32 %v791_v61, %v774_v49 }
 0x1ce   :  { %1198 = vrot.lane.b32.xlu1 %v1187_v35, %s2784_s25  ;;  %1218 = vrot.lane.b32.xlu0 %v1210_v20, %s2785_s27 }
 0x1d0   :  { %v793_v3 = vpop.permute.xlu1 %792  ;;  %v3328_v26 = vpop.permute.xlu0 %812 }
 0x1d1   :  { %v801_v44 = vadd.f32 %v793_v3, %v775_v8  ;;  %v1263_v3 = vmul.f32 %v1261_v25, %v3235_v62  ;;  %v1313_v8 = vstv %s2634_s10  ;;  %s2657_s10 = sld [smem:[#allocation8 + $0x47]] }
 0x1d2   :  { %1220 = vrot.lane.b32.xlu1 %v1211_v21, %s2785_s27  ;;  %1222 = vrot.lane.b32.xlu0 %v1212_v43, %s2785_s27  ;;  %v1264_v21 = vmul.f32 %v1261_v25, %v3239_v41  ;;  %v1287_v43 = vstv %s2633_s9  ;;  %v1316_v25 = vmul.f32 %v1313_v8, %v3239_v41  ;;  %s2655_s9 = sld [smem:[#allocation8 + $0x45]] }
 0x1d3   :  { %v1288_v55 = vmul.f32 %v1287_v43, %v3226_v51 }
 0x1d4   :  { %v3336_v5 = vpop.permute.xlu1 %814  ;;  %v817_v54 = vpop.permute.xlu0 %816 }
 0x1d5   :  { %v826_v7 = vadd.f32 %v817_v54, %v800_v34 }
 0x1d6   :  { %1224 = vrot.lane.b32.xlu1 %v1213_v0, %s2785_s27  ;;  %1244 = vrot.lane.b32.xlu0 %v1236_v2, %s2786_s29  ;;  %v1289_v0 = vmul.f32 %v1287_v43, %v3235_v62  ;;  %v1290_v2 = vmul.f32 %v1287_v43, %v3239_v41 }
 0x1d7   :  { %v3348_v56 = vadd.f32 %v1346_v40, %v826_v7 }
 0x1d8   :  { %v819_v17 = vpop.permute.xlu1 %818  ;;  %v3350_v14 = vpop.permute.xlu0 %852 }
 0x1d9   :  { %v827_v32 = vadd.f32 %v819_v17, %v801_v44  ;;  %v1291_v44 = vmul.f32 %v1287_v43, %v3250_v60  ;;  %v1314_v17 = vmul.f32 %v1313_v8, %v3226_v51  ;;  %v3402_v43 = vld [vmem:[#allocation2 + $0x38] sm:$0xff] }
 0x1da   :  { %1246 = vrot.lane.b32.xlu1 %v1237_v11, %s2786_s29  ;;  %1248 = vrot.lane.b32.xlu0 %v1238_v28, %s2786_s29 }
 0x1db   :  { %v3358_v61 = vadd.f32 %v1347_v42, %v827_v32  ;;  %v1315_v32 = vmul.f32 %v1313_v8, %v3235_v62  ;;  %v3394_v42 = vld [vmem:[#allocation2 + $0x30] sm:$0xff] }
 0x1dc   :  { %v3360_v35 = vpop.permute.xlu1 %854  ;;  %v857_v20 = vpop.permute.xlu0 %856 }
 0x1dd   :  { %4080 = vst [vmem:[#allocation16_spill] sm:$0xff] %v3360_v35 }
 0x1de   :  { %1250 = vrot.lane.b32.xlu1 %v1239_v27, %s2786_s29  ;;  %1270 = vrot.lane.b32.xlu0 %v1262_v46, %s2787_s4  ;;  %v1353_v27 = vstv %s2636_s11  ;;  %s2658_s11 = sld [smem:[#allocation8 + $0x48]] }
 0x1e0   :  { %v859_v6 = vpop.permute.xlu1 %858  ;;  %v3366_v39 = vpop.permute.xlu0 %878 }
 0x1e2   :  { %1272 = vrot.lane.b32.xlu1 %v1263_v3, %s2787_s4  ;;  %1274 = vrot.lane.b32.xlu0 %v1264_v21, %s2787_s4  ;;  %v1317_v3 = vmul.f32 %v1313_v8, %v3250_v60  ;;  %v1354_v21 = vmul.f32 %v1353_v27, %v3394_v42  ;;  %v866_v60 = vadd.f32 %v857_v20, %v3080_v58 }
 0x1e4   :  { %v3372_v48 = vpop.permute.xlu1 %880  ;;  %v883_v49 = vpop.permute.xlu0 %882 }
 0x1e5   :  { %4081 = vst [vmem:[#allocation17_spill] sm:$0xff] %v3372_v48 }
 0x1e6   :  { %1276 = vrot.lane.b32.xlu1 %v1265_v50, %s2787_s4  ;;  %1296 = vrot.lane.b32.xlu0 %v1288_v55, %s2788_s6  ;;  %v1355_v50 = vmul.f32 %v1353_v27, %v3402_v43  ;;  %v1356_v55 = vmul.f32 %v1353_v27, %v3334_v18 }
 0x1e8   :  { %v885_v34 = vpop.permute.xlu1 %884  ;;  %v3378_v54 = vpop.permute.xlu0 %904 }
 0x1e9   :  { %4082 = vst [vmem:[#allocation18_spill] sm:$0xff] %v3378_v54 }
 0x1ea   :  { %1298 = vrot.lane.b32.xlu1 %v1289_v0, %s2788_s6  ;;  %1300 = vrot.lane.b32.xlu0 %v1290_v2, %s2788_s6  ;;  %v1379_v0 = vstv %s2637_s12  ;;  %s2663_s12 = sld [smem:[#allocation8 + $0x4d]] }
 0x1eb   :  { %v1381_v58 = vmul.f32 %v1379_v0, %v3402_v43  ;;  %v1382_v20 = vmul.f32 %v1379_v0, %v3334_v18 }
 0x1ec   :  { %v3384_v7 = vpop.permute.xlu1 %906  ;;  %v909_v40 = vpop.permute.xlu0 %908 }
 0x1ed   :  { %4083 = vst [vmem:[#allocation19_spill] sm:$0xff] %v3384_v7 }
 0x1ee   :  { %1302 = vrot.lane.b32.xlu1 %v1291_v44, %s2788_s6  ;;  %1322 = vrot.lane.b32.xlu0 %v1314_v17, %s2789_s8  ;;  %v1357_v44 = vmul.f32 %v1353_v27, %v3346_v9  ;;  %v1380_v17 = vmul.f32 %v1379_v0, %v3394_v42 }
 0x1f0   :  { %v911_v11 = vpop.permute.xlu1 %910  ;;  %v3390_v28 = vpop.permute.xlu0 %930 }
 0x1f1   :  { %4084 = vst [vmem:[#allocation20_spill] sm:$0xff] %v3390_v28 }
 0x1f2   :  { %1324 = vrot.lane.b32.xlu1 %v1315_v32, %s2789_s8  ;;  %1326 = vrot.lane.b32.xlu0 %v1316_v25, %s2789_s8  ;;  %v892_v32 = vadd.f32 %v883_v49, %v866_v60  ;;  %v867_v25 = vadd.f32 %v859_v6, %v3087_v24  ;;  %v3426_v49 = vld [vmem:[#allocation2 + $0x49] sm:$0xff] }
 0x1f4   :  { %v3398_v51 = vpop.permute.xlu1 %932  ;;  %v935_v46 = vpop.permute.xlu0 %934 }
 0x1f5   :  { %4085 = vst [vmem:[#allocation21_spill] sm:$0xff] %v3398_v51 }
 0x1f6   :  { %1328 = vrot.lane.b32.xlu1 %v1317_v3, %s2789_s8  ;;  %1362 = vrot.lane.b32.xlu0 %v1354_v21, %s2784_s25  ;;  %v918_v3 = vadd.f32 %v909_v40, %v892_v32  ;;  %v3432_v32 = vstv %s2642_s14  ;;  %s2660_s14 = sld [smem:[#allocation8 + $0x4a]] }
 0x1f7   :  { %4090 = vst [vmem:[#allocation26_spill] sm:$0xff] %v3432_v32 }
 0x1f8   :  { %v937_v62 = vpop.permute.xlu1 %936  ;;  %v3406_v41 = vpop.permute.xlu0 %956  ;;  %v944_v27 = vadd.f32 %v935_v46, %v918_v3 }
 0x1f9   :  { %4086 = vst [vmem:[#allocation22_spill] sm:$0xff] %v3406_v41 }
 0x1fa   :  { %1364 = vrot.lane.b32.xlu1 %v1355_v50, %s2784_s25  ;;  %1366 = vrot.lane.b32.xlu0 %v1356_v55, %s2784_s25  ;;  %v893_v55 = vadd.f32 %v885_v34, %v867_v25  ;;  %v1516_v25 = vmul.f32 %v3432_v32, %v3426_v49 }
 0x1fc   :  { %v3413_v2 = vpop.permute.xlu1 %958  ;;  %v961_v8 = vpop.permute.xlu0 %960  ;;  %v919_v60 = vadd.f32 %v911_v11, %v893_v55  ;;  %v3438_v11 = vld [vmem:[#allocation2 + $0x51] sm:$0xff]  ;;  %v1408_v55 = vmul.f32 %v1405_v59, %v3334_v18 }
 0x1fd   :  { %4087 = vst [vmem:[#allocation23_spill] sm:$0xff] %v3413_v2  ;;  %v970_v24 = vadd.f32 %v961_v8, %v944_v27  ;;  %v1431_v27 = vstv %s2639_s15  ;;  %v3482_v2 = vld [vmem:[#allocation2 + $0x39] sm:$0xff]  ;;  %s2661_s15 = sld [smem:[#allocation8 + $0x4b]] }
 0x1fe   :  { %1368 = vrot.lane.b32.xlu1 %v1357_v44, %s2784_s25  ;;  %1388 = vrot.lane.b32.xlu0 %v1380_v17, %s2785_s27  ;;  %v1383_v44 = vmul.f32 %v1379_v0, %v3346_v9  ;;  %v1406_v17 = vmul.f32 %v1405_v59, %v3394_v42  ;;  %v945_v34 = vadd.f32 %v937_v62, %v919_v60 }
 0x1ff   :  { %v1517_v60 = vmul.f32 %v3432_v32, %v3438_v11  ;;  %v3476_v32 = vld [vmem:[#allocation2 + $0x31] sm:$0xff] }
 0x200   :  { %v963_v21 = vpop.permute.xlu1 %962  ;;  %v3420_v50 = vpop.permute.xlu0 %982 }
 0x201   :  { %4088 = vst [vmem:[#allocation24_spill] sm:$0xff] %v3420_v50  ;;  %v971_v8 = vadd.f32 %v963_v21, %v945_v34 }
 0x202   :  { %1390 = vrot.lane.b32.xlu1 %v1381_v58, %s2785_s27  ;;  %1392 = vrot.lane.b32.xlu0 %v1382_v20, %s2785_s27  ;;  %v1407_v20 = vmul.f32 %v1405_v59, %v3402_v43 }
 0x204   :  { %v3428_v6 = vpop.permute.xlu1 %984  ;;  %v987_v40 = vpop.permute.xlu0 %986 }
 0x205   :  { %4089 = vst [vmem:[#allocation25_spill] sm:$0xff] %v3428_v6  ;;  %v996_v46 = vadd.f32 %v987_v40, %v970_v24 }
 0x206   :  { %1394 = vrot.lane.b32.xlu1 %v1383_v44, %s2785_s27  ;;  %1414 = vrot.lane.b32.xlu0 %v1406_v17, %s2786_s29  ;;  %v1409_v44 = vmul.f32 %v1405_v59, %v3346_v9  ;;  %v1432_v17 = vmul.f32 %v1431_v27, %v3394_v42 }
 0x207   :  { %v3440_v3 = vadd.f32 %v1516_v25, %v996_v46  ;;  %v1433_v25 = vmul.f32 %v1431_v27, %v3402_v43 }
 0x208   :  { %v989_v58 = vpop.permute.xlu1 %988  ;;  %v1023_v0 = vpop.permute.xlu0 %1022 }
 0x209   :  { %4091 = vst [vmem:[#allocation27_spill] sm:$0xff] %v3440_v3  ;;  %v997_v62 = vadd.f32 %v989_v58, %v971_v8  ;;  %v1434_v8 = vmul.f32 %v1431_v27, %v3334_v18  ;;  %v1457_v58 = vstv %s2640_s16  ;;  %s2662_s16 = sld [smem:[#allocation8 + $0x4c]] }
 0x20a   :  { %1416 = vrot.lane.b32.xlu1 %v1407_v20, %s2786_s29  ;;  %1418 = vrot.lane.b32.xlu0 %v1408_v55, %s2786_s29  ;;  %v1435_v55 = vmul.f32 %v1431_v27, %v3346_v9  ;;  %v1460_v47 = vmul.f32 %v1457_v58, %v3334_v18  ;;  %v1461_v57 = vmul.f32 %v1457_v58, %v3346_v9 }
 0x20b   :  { %v3448_v24 = vadd.f32 %v1517_v60, %v997_v62  ;;  %v1458_v62 = vmul.f32 %v1457_v58, %v3394_v42 }
 0x20c   :  { %v1025_v21 = vpop.permute.xlu1 %1024  ;;  %v1027_v40 = vpop.permute.xlu0 %1026 }
 0x20d   :  { %4092 = vst [vmem:[#allocation28_spill] sm:$0xff] %v3448_v24 }
 0x20e   :  { %1420 = vrot.lane.b32.xlu1 %v1409_v44, %s2786_s29  ;;  %1440 = vrot.lane.b32.xlu0 %v1432_v17, %s2787_s4  ;;  %v1459_v17 = vmul.f32 %v1457_v58, %v3402_v43 }
 0x210   :  { %v3454_v34 = vpop.permute.xlu1 %1028  ;;  %v1049_v46 = vpop.permute.xlu0 %1048 }
 0x212   :  { %1442 = vrot.lane.b32.xlu1 %v1433_v25, %s2787_s4  ;;  %1444 = vrot.lane.b32.xlu0 %v1434_v8, %s2787_s4  ;;  %v1483_v25 = vstv %s2641_s17  ;;  %s2664_s17 = sld [smem:[#allocation8 + $0x4e]] }
 0x213   :  { %v1485_v3 = vmul.f32 %v1483_v25, %v3402_v43  ;;  %v1486_v6 = vmul.f32 %v1483_v25, %v3334_v18  ;;  %v1034_v18 = vadd.f32 %v1023_v0, %v3155_v52 }
 0x214   :  { %v1051_v59 = vpop.permute.xlu1 %1050  ;;  %v1053_v20 = vpop.permute.xlu0 %1052 }
 0x215   :  { %v1060_v41 = vadd.f32 %v1049_v46, %v1034_v18  ;;  %v3495_v46 = vld [vmem:[#allocation2 + $0x32] sm:$0xff]  ;;  %v1683_v18 = vstv %s2649_s22  ;;  %s2666_s22 = sld [smem:[#allocation8 + $0x50]] }
 0x216   :  { %1446 = vrot.lane.b32.xlu1 %v1435_v55, %s2787_s4  ;;  %1466 = vrot.lane.b32.xlu0 %v1458_v62, %s2788_s6  ;;  %v1484_v55 = vmul.f32 %v1483_v25, %v3394_v42 }
 0x218   :  { %v3464_v60 = vpop.permute.xlu1 %1054  ;;  %v1075_v44 = vpop.permute.xlu0 %1074 }
 0x21a   :  { %1468 = vrot.lane.b32.xlu1 %v1459_v17, %s2788_s6  ;;  %1470 = vrot.lane.b32.xlu0 %v1460_v47, %s2788_s6  ;;  %v1523_v17 = vstv %s2643_s20  ;;  %s2665_s20 = sld [smem:[#allocation8 + $0x4f]] }
 0x21b   :  { %v1527_v0 = vmul.f32 %v1523_v17, %v3438_v11 }
 0x21c   :  { %v1077_v27 = vpop.permute.xlu1 %1076  ;;  %v1079_v8 = vpop.permute.xlu0 %1078 }
 0x21e   :  { %1472 = vrot.lane.b32.xlu1 %v1461_v57, %s2788_s6  ;;  %1492 = vrot.lane.b32.xlu0 %v1484_v55, %s2789_s8  ;;  %v1487_v57 = vmul.f32 %v1483_v25, %v3346_v9  ;;  %v1524_v55 = vmul.f32 %v1523_v17, %v3476_v32  ;;  %v1549_v9 = vstv %s2644_s21  ;;  %v1035_v25 = vadd.f32 %v1025_v21, %v3165_v10  ;;  %s2670_s21 = sld [smem:[#allocation8 + $0x54]] }
 0x21f   :  { %v1550_v28 = vmul.f32 %v1549_v9, %v3476_v32  ;;  %v1037_v10 = vadd.f32 %v3454_v34, %v3174_v36  ;;  %v3509_v36 = vld [vmem:[#allocation2 + $0x4a] sm:$0xff] }
 0x220   :  { %v1081_v62 = vpop.permute.xlu1 %1080  ;;  %v1101_v24 = vpop.permute.xlu0 %1100  ;;  %v1061_v48 = vadd.f32 %v1051_v59, %v1035_v25  ;;  %v1552_v59 = vmul.f32 %v1549_v9, %v3426_v49 }
 0x222   :  { %1494 = vrot.lane.b32.xlu1 %v1485_v3, %s2789_s8  ;;  %1496 = vrot.lane.b32.xlu0 %v1486_v6, %s2789_s8  ;;  %v1525_v3 = vmul.f32 %v1523_v17, %v3482_v2  ;;  %v1526_v6 = vmul.f32 %v1523_v17, %v3426_v49  ;;  %v1551_v17 = vmul.f32 %v1549_v9, %v3482_v2 }
 0x224   :  { %v1103_v47 = vpop.permute.xlu1 %1102  ;;  %v1105_v58 = vpop.permute.xlu0 %1104 }
 0x226   :  { %1498 = vrot.lane.b32.xlu1 %v1487_v57, %s2789_s8  ;;  %1532 = vrot.lane.b32.xlu0 %v1524_v55, %s2784_s25  ;;  %v1036_v57 = vadd.f32 %v1027_v40, %v3167_v16  ;;  %v1086_v55 = vadd.f32 %v1075_v44, %v1060_v41  ;;  %v1087_v16 = vadd.f32 %v1077_v27, %v1061_v48 }
 0x228   :  { %v1107_v50 = vpop.permute.xlu1 %1106  ;;  %v1127_v51 = vpop.permute.xlu0 %1126  ;;  %v1062_v54 = vadd.f32 %v1053_v20, %v1036_v57  ;;  %v1112_v35 = vadd.f32 %v1101_v24, %v1086_v55  ;;  %v1575_v24 = vstv %s2645_s1  ;;  %v1684_v20 = vmul.f32 %v1683_v18, %v3495_v46  ;;  %v3505_v57 = vld [vmem:[#allocation2 + $0x3a] sm:$0xff]  ;;  %s2667_s1 = sld [smem:[#allocation8 + $0x51]] }
 0x22a   :  { %1534 = vrot.lane.b32.xlu1 %v1525_v3, %s2784_s25  ;;  %1536 = vrot.lane.b32.xlu0 %v1526_v6, %s2784_s25  ;;  %v1088_v41 = vadd.f32 %v1079_v8, %v1062_v54  ;;  %v1138_v21 = vadd.f32 %v1127_v51, %v1112_v35  ;;  %v1063_v3 = vadd.f32 %v3464_v60, %v1037_v10 }
 0x22b   :  { %v1113_v6 = vadd.f32 %v1103_v47, %v1087_v16  ;;  %v1553_v60 = vmul.f32 %v1549_v9, %v3438_v11  ;;  %v1576_v8 = vmul.f32 %v1575_v24, %v3476_v32  ;;  %v1685_v47 = vmul.f32 %v1683_v18, %v3505_v57 }
 0x22c   :  { %v1129_v7 = vpop.permute.xlu1 %1128  ;;  %v1131_v52 = vpop.permute.xlu0 %1130  ;;  %v1114_v25 = vadd.f32 %v1105_v58, %v1088_v41  ;;  %v1089_v35 = vadd.f32 %v1081_v62, %v1063_v3  ;;  %v1686_v10 = vmul.f32 %v1683_v18, %v3509_v36 }
 0x22d   :  { %v1139_v48 = vadd.f32 %v1129_v7, %v1113_v6  ;;  %v3519_v7 = vld [vmem:[#allocation2 + $0x52] sm:$0xff]  ;;  %v1579_v6 = vmul.f32 %v1575_v24, %v3438_v11 }
 0x22e   :  { %1538 = vrot.lane.b32.xlu1 %v1527_v0, %s2784_s25  ;;  %1558 = vrot.lane.b32.xlu0 %v1550_v28, %s2785_s27  ;;  %v1140_v54 = vadd.f32 %v1131_v52, %v1114_v25  ;;  %v1115_v58 = vadd.f32 %v1107_v50, %v1089_v35  ;;  %v1578_v50 = vmul.f32 %v1575_v24, %v3426_v49 }
 0x230   :  { %v1133_v40 = vpop.permute.xlu1 %1132  ;;  %v1153_v44 = vpop.permute.xlu0 %1152 }
 0x231   :  { %v1164_v28 = vadd.f32 %v1153_v44, %v1138_v21  ;;  %v1141_v62 = vadd.f32 %v1133_v40, %v1115_v58  ;;  %v1577_v21 = vmul.f32 %v1575_v24, %v3482_v2 }
 0x232   :  { %1560 = vrot.lane.b32.xlu1 %v1551_v17, %s2785_s27  ;;  %1562 = vrot.lane.b32.xlu0 %v1552_v59, %s2785_s27  ;;  %v1601_v17 = vstv %s2646_s0  ;;  %v1687_v59 = vmul.f32 %v1683_v18, %v3519_v7  ;;  %s2671_s0 = sld [smem:[#allocation8 + $0x55]] }
 0x233   :  { %v3511_v51 = vadd.f32 %v1684_v20, %v1164_v28  ;;  %v1602_v25 = vmul.f32 %v1601_v17, %v3476_v32  ;;  %v1603_v35 = vmul.f32 %v1601_v17, %v3482_v2 }
 0x234   :  { %v1155_v34 = vpop.permute.xlu1 %1154  ;;  %v1157_v27 = vpop.permute.xlu0 %1156 }
 0x235   :  { %v1165_v55 = vadd.f32 %v1155_v34, %v1139_v48  ;;  %v1166_v0 = vadd.f32 %v1157_v27, %v1140_v54  ;;  %v1604_v48 = vmul.f32 %v1601_v17, %v3426_v49  ;;  %v1627_v54 = vstv %s2647_s23  ;;  %s2678_s23 = sld [smem:[#allocation8 + $0x5c]] }
 0x236   :  { %1564 = vrot.lane.b32.xlu1 %v1553_v60, %s2785_s27  ;;  %1584 = vrot.lane.b32.xlu0 %v1576_v8, %s2786_s29  ;;  %v1605_v27 = vmul.f32 %v1601_v17, %v3438_v11  ;;  %v1628_v60 = vmul.f32 %v1627_v54, %v3476_v32  ;;  %v1629_v58 = vmul.f32 %v1627_v54, %v3482_v2 }
 0x237   :  { %v3521_v52 = vadd.f32 %v1685_v47, %v1165_v55  ;;  %v3523_v16 = vadd.f32 %v1686_v10, %v1166_v0  ;;  %v1630_v55 = vmul.f32 %v1627_v54, %v3426_v49  ;;  %v1653_v0 = vstv %s2648_s24  ;;  %s2672_s24 = sld [smem:[#allocation8 + $0x56]] }
 0x238   :  { %v1159_v9 = vpop.permute.xlu1 %1158  ;;  %v1193_v41 = vpop.permute.xlu0 %1192  ;;  %v1655_v17 = vmul.f32 %v1653_v0, %v3482_v2 }
 0x239   :  { %v1167_v44 = vadd.f32 %v1159_v9, %v1141_v62  ;;  %v1631_v9 = vmul.f32 %v1627_v54, %v3438_v11 }
 0x23a   :  { %1586 = vrot.lane.b32.xlu1 %v1577_v21, %s2786_s29  ;;  %1588 = vrot.lane.b32.xlu0 %v1578_v50, %s2786_s29  ;;  %v1654_v21 = vmul.f32 %v1653_v0, %v3476_v32 }
 0x23b   :  { %v3530_v40 = vadd.f32 %v1687_v59, %v1167_v44  ;;  %v1656_v59 = vmul.f32 %v1653_v0, %v3426_v49  ;;  %v1204_v49 = vadd.f32 %v1193_v41, %v3242_v12 }
 0x23c   :  { %v3532_v20 = vpop.permute.xlu1 %1194  ;;  %v1197_v3 = vpop.permute.xlu0 %1196 }
 0x23e   :  { %1590 = vrot.lane.b32.xlu1 %v1579_v6, %s2786_s29  ;;  %1610 = vrot.lane.b32.xlu0 %v1602_v25, %s2787_s4  ;;  %v1693_v6 = vstv %s2650_s26  ;;  %s2677_s26 = sld [smem:[#allocation8 + $0x5b]] }
 0x23f   :  { %v1694_v54 = vmul.f32 %v1693_v6, %v3495_v46  ;;  %v1697_v12 = vmul.f32 %v1693_v6, %v3519_v7 }
 0x240   :  { %v3538_v28 = vpop.permute.xlu1 %1198  ;;  %v1219_v18 = vpop.permute.xlu0 %1218 }
 0x242   :  { %1612 = vrot.lane.b32.xlu1 %v1603_v35, %s2787_s4  ;;  %1614 = vrot.lane.b32.xlu0 %v1604_v48, %s2787_s4  ;;  %v1657_v48 = vmul.f32 %v1653_v0, %v3438_v11  ;;  %v1206_v11 = vadd.f32 %v1197_v3, %v3254_v23  ;;  %v1207_v23 = vadd.f32 %v3538_v28, %v3263_v29  ;;  %v3594_v29 = vld [vmem:[#allocation2 + $0x4b] sm:$0xff] }
 0x244   :  { %v3544_v24 = vpop.permute.xlu1 %1220  ;;  %v1223_v34 = vpop.permute.xlu0 %1222 }
 0x246   :  { %1616 = vrot.lane.b32.xlu1 %v1605_v27, %s2787_s4  ;;  %1636 = vrot.lane.b32.xlu0 %v1628_v60, %s2788_s6 }
 0x248   :  { %v1225_v8 = vpop.permute.xlu1 %1224  ;;  %v1245_v47 = vpop.permute.xlu0 %1244 }
 0x24a   :  { %1638 = vrot.lane.b32.xlu1 %v1629_v58, %s2788_s6  ;;  %1640 = vrot.lane.b32.xlu0 %v1630_v55, %s2788_s6  ;;  %v1695_v58 = vmul.f32 %v1693_v6, %v3505_v57  ;;  %v1696_v55 = vmul.f32 %v1693_v6, %v3509_v36 }
 0x24c   :  { %v3554_v10 = vpop.permute.xlu1 %1246  ;;  %v1249_v62 = vpop.permute.xlu0 %1248 }
 0x24e   :  { %1642 = vrot.lane.b32.xlu1 %v1631_v9, %s2788_s6  ;;  %1662 = vrot.lane.b32.xlu0 %v1654_v21, %s2789_s8  ;;  %v1230_v9 = vadd.f32 %v1219_v18, %v1204_v49  ;;  %v1719_v21 = vstv %s2651_s28  ;;  %v3582_v18 = vld [vmem:[#allocation2 + $0x33] sm:$0xff]  ;;  %v3584_v49 = vstv %s2656_s2  ;;  %s2679_s28 = sld [smem:[#allocation8 + $0x5d]] }
 0x24f   :  { %v1720_v41 = vmul.f32 %v1719_v21, %v3495_v46  ;;  %4093 = vst [vmem:[#allocation29_spill] sm:$0xff] %v3584_v49  ;;  %v1721_v6 = vmul.f32 %v1719_v21, %v3505_v57  ;;  %s2680_s2 = sld [smem:[#allocation8 + $0x5e]] }
 0x250   :  { %v1251_v50 = vpop.permute.xlu1 %1250  ;;  %v1271_v44 = vpop.permute.xlu0 %1270  ;;  %v1256_v0 = vadd.f32 %v1245_v47, %v1230_v9  ;;  %v1233_v9 = vadd.f32 %v1225_v8, %v1207_v23  ;;  %v1723_v8 = vmul.f32 %v1719_v21, %v3519_v7 }
 0x252   :  { %1664 = vrot.lane.b32.xlu1 %v1655_v17, %s2789_s8  ;;  %1666 = vrot.lane.b32.xlu0 %v1656_v59, %s2789_s8  ;;  %v1259_v28 = vadd.f32 %v1251_v50, %v1233_v9  ;;  %v3606_v50 = vld [vmem:[#allocation2 + $0x53] sm:$0xff]  ;;  %v1771_v9 = vstv %s2653_s5  ;;  %s2682_s5 = sld [smem:[#allocation8 + $0x60]] }
 0x254   :  { %v3564_v25 = vpop.permute.xlu1 %1272  ;;  %v1275_v35 = vpop.permute.xlu0 %1274 }
 0x256   :  { %1668 = vrot.lane.b32.xlu1 %v1657_v48, %s2789_s8  ;;  %1702 = vrot.lane.b32.xlu0 %v1694_v54, %s2784_s25  ;;  %v1232_v48 = vadd.f32 %v1223_v34, %v1206_v11  ;;  %v1282_v54 = vadd.f32 %v1271_v44, %v1256_v0  ;;  %v1722_v34 = vmul.f32 %v1719_v21, %v3509_v36  ;;  %v1745_v44 = vstv %s2652_s30  ;;  %s2681_s30 = sld [smem:[#allocation8 + $0x5f]] }
 0x257   :  { %v1747_v21 = vmul.f32 %v1745_v44, %v3505_v57 }
 0x258   :  { %v1277_v27 = vpop.permute.xlu1 %1276  ;;  %v1297_v60 = vpop.permute.xlu0 %1296  ;;  %v1258_v3 = vadd.f32 %v1249_v62, %v1232_v48 }
 0x259   :  { %v1308_v47 = vadd.f32 %v1297_v60, %v1282_v54  ;;  %v1285_v54 = vadd.f32 %v1277_v27, %v1259_v28  ;;  %v1748_v27 = vmul.f32 %v1745_v44, %v3509_v36  ;;  %v1749_v28 = vmul.f32 %v1745_v44, %v3519_v7 }
 0x25a   :  { %1704 = vrot.lane.b32.xlu1 %v1695_v58, %s2784_s25  ;;  %1706 = vrot.lane.b32.xlu0 %v1696_v55, %s2784_s25  ;;  %v1284_v11 = vadd.f32 %v1275_v35, %v1258_v3  ;;  %v1746_v35 = vmul.f32 %v1745_v44, %v3495_v46  ;;  %v1856_v3 = vmul.f32 %v3584_v49, %v3594_v29 }
 0x25c   :  { %v3576_v17 = vpop.permute.xlu1 %1298  ;;  %v1301_v59 = vpop.permute.xlu0 %1300 }
 0x25d   :  { %v1310_v62 = vadd.f32 %v1301_v59, %v1284_v11  ;;  %v1857_v11 = vmul.f32 %v3584_v49, %v3606_v50 }
 0x25e   :  { %1708 = vrot.lane.b32.xlu1 %v1697_v12, %s2784_s25  ;;  %1728 = vrot.lane.b32.xlu0 %v1720_v41, %s2785_s27  ;;  %v1854_v12 = vmul.f32 %v3584_v49, %v3582_v18 }
 0x260   :  { %v1303_v58 = vpop.permute.xlu1 %1302  ;;  %v1323_v55 = vpop.permute.xlu0 %1322 }
 0x261   :  { %v1334_v0 = vadd.f32 %v1323_v55, %v1308_v47  ;;  %v1311_v59 = vadd.f32 %v1303_v58, %v1285_v54  ;;  %v1774_v54 = vmul.f32 %v1771_v9, %v3509_v36 }
 0x262   :  { %1730 = vrot.lane.b32.xlu1 %v1721_v6, %s2785_s27  ;;  %1732 = vrot.lane.b32.xlu0 %v1722_v34, %s2785_s27 }
 0x263   :  { %v3596_v60 = vadd.f32 %v1854_v12, %v1334_v0 }
 0x264   :  { %v3598_v41 = vpop.permute.xlu1 %1324  ;;  %v1327_v48 = vpop.permute.xlu0 %1326 }
 0x265   :  { %v1336_v23 = vadd.f32 %v1327_v48, %v1310_v62  ;;  %v1772_v62 = vmul.f32 %v1771_v9, %v3495_v46 }
 0x266   :  { %1734 = vrot.lane.b32.xlu1 %v1723_v8, %s2785_s27  ;;  %1754 = vrot.lane.b32.xlu0 %v1746_v35, %s2786_s29  ;;  %v1773_v35 = vmul.f32 %v1771_v9, %v3505_v57 }
 0x267   :  { %v3608_v47 = vadd.f32 %v1856_v3, %v1336_v23  ;;  %v1797_v23 = vstv %s2654_s7  ;;  %s2676_s7 = sld [smem:[#allocation8 + $0x5a]] }
 0x268   :  { %v1329_v55 = vpop.permute.xlu1 %1328  ;;  %v3610_v6 = vpop.permute.xlu0 %1362 }
 0x269   :  { %4094 = vst [vmem:[#allocation30_spill] sm:$0xff] %v3608_v47  ;;  %v1337_v34 = vadd.f32 %v1329_v55, %v1311_v59  ;;  %v1775_v59 = vmul.f32 %v1771_v9, %v3519_v7  ;;  %v1798_v55 = vmul.f32 %v1797_v23, %v3495_v46  ;;  %v1823_v47 = vstv %s2655_s9  ;;  %s2683_s9 = sld [smem:[#allocation8 + $0x61]] }
 0x26a   :  { %1756 = vrot.lane.b32.xlu1 %v1747_v21, %s2786_s29  ;;  %1758 = vrot.lane.b32.xlu0 %v1748_v27, %s2786_s29  ;;  %v2717_v21 = vld [vmem:[#allocation2 + $0x3] sm:$0xff]  ;;  %v1824_v49 = vmul.f32 %v1823_v47, %v3495_v46 }
 0x26b   :  { %v3618_v58 = vadd.f32 %v1857_v11, %v1337_v34  ;;  %v664_v27 = vmul.f32 %v2717_v21, %v3309_v37 }
 0x26c   :  { %v3620_v0 = vpop.permute.xlu1 %1364  ;;  %v3622_v12 = vpop.permute.xlu0 %1366 }
 0x26d   :  { %4095 = vst [vmem:[#allocation31_spill] sm:$0xff] %v3618_v58  ;;  %v694_v34 = vadd.f32 %v3256_v63, %v664_v27  ;;  %v1801_v27 = vmul.f32 %v1797_v23, %v3519_v7 }
 0x26e   :  { %1760 = vrot.lane.b32.xlu1 %v1749_v28, %s2786_s29  ;;  %1780 = vrot.lane.b32.xlu0 %v1772_v62, %s2787_s4  ;;  %v1799_v62 = vmul.f32 %v1797_v23, %v3505_v57 }
 0x26f   :  { %v720_v58 = vadd.f32 %v3273_v4, %v694_v34 }
 0x270   :  { %v3628_v48 = vpop.permute.xlu1 %1368  ;;  %v3630_v8 = vpop.permute.xlu0 %1388 }
 0x272   :  { %1782 = vrot.lane.b32.xlu1 %v1773_v35, %s2787_s4  ;;  %1784 = vrot.lane.b32.xlu0 %v1774_v54, %s2787_s4  ;;  %v1800_v35 = vmul.f32 %v1797_v23, %v3509_v36  ;;  %v2718_v54 = vld [vmem:[#allocation2 + $0xb] sm:$0xff]  ;;  %v1826_v23 = vmul.f32 %v1823_v47, %v3509_v36 }
 0x273   :  { %v665_v9 = vmul.f32 %v2718_v54, %v3309_v37  ;;  %v3678_v54 = vld [vmem:[#allocation2 + $0x3b] sm:$0xff] }
 0x274   :  { %v3636_v44 = vpop.permute.xlu1 %1390  ;;  %v3638_v3 = vpop.permute.xlu0 %1392 }
 0x275   :  { %v695_v63 = vadd.f32 %v3265_v30, %v665_v9 }
 0x276   :  { %1786 = vrot.lane.b32.xlu1 %v1775_v59, %s2787_s4  ;;  %1806 = vrot.lane.b32.xlu0 %v1798_v55, %s2788_s6  ;;  %v746_v59 = vadd.f32 %v3285_v33, %v720_v58  ;;  %v1825_v58 = vmul.f32 %v1823_v47, %v3505_v57  ;;  %v1827_v57 = vmul.f32 %v1823_v47, %v3519_v7 }
 0x277   :  { %v721_v37 = vadd.f32 %v3279_v38, %v695_v63 }
 0x278   :  { %v3646_v11 = vpop.permute.xlu1 %1394  ;;  %v1415_v28 = vpop.permute.xlu0 %1414  ;;  %v772_v4 = vadd.f32 %v3297_v13, %v746_v59  ;;  %v1863_v13 = vstv %s2657_s10 }
 0x279   :  { %v747_v34 = vadd.f32 %v3291_v45, %v721_v37  ;;  %v1864_v36 = vmul.f32 %v1863_v13, %v3582_v18  ;;  %v1865_v7 = vmul.f32 %v1863_v13, %v3678_v54  ;;  %v1866_v47 = vmul.f32 %v1863_v13, %v3594_v29 }
 0x27a   :  { %1808 = vrot.lane.b32.xlu1 %v1799_v62, %s2788_s6  ;;  %1810 = vrot.lane.b32.xlu0 %v1800_v35, %s2788_s6  ;;  %v798_v30 = vadd.f32 %v3311_v19, %v772_v4  ;;  %v1344_v19 = vmul.f32 %v3340_v31, %v3394_v42  ;;  %v1345_v42 = vmul.f32 %v3340_v31, %v3402_v43 }
 0x27b   :  { %v773_v46 = vadd.f32 %v3303_v15, %v747_v34  ;;  %v1376_v31 = vadd.f32 %v3622_v12, %v3348_v56  ;;  %v1867_v34 = vmul.f32 %v1863_v13, %v3606_v50  ;;  %v1377_v56 = vadd.f32 %v3628_v48, %v3358_v61  ;;  %v3711_v61 = vld [vmem:[#allocation2 + $0x4c] sm:$0xff] }
 0x27c   :  { %v1417_v55 = vpop.permute.xlu1 %1416  ;;  %v1419_v21 = vpop.permute.xlu0 %1418  ;;  %v824_v38 = vadd.f32 %v3328_v26, %v798_v30 }
 0x27d   :  { %v799_v45 = vadd.f32 %v3319_v22, %v773_v46  ;;  %v3697_v46 = vld [vmem:[#allocation2 + $0x34] sm:$0xff] }
 0x27e   :  { %1812 = vrot.lane.b32.xlu1 %v1801_v27, %s2788_s6  ;;  %1832 = vrot.lane.b32.xlu0 %v1824_v49, %s2789_s8  ;;  %v1348_v26 = vadd.f32 %v1344_v19, %v824_v38  ;;  %v1889_v27 = vstv %s2658_s11  ;;  %v2023_v38 = vstv %s2663_s12 }
 0x27f   :  { %v825_v15 = vadd.f32 %v3336_v5, %v799_v45  ;;  %v1890_v30 = vmul.f32 %v1889_v27, %v3582_v18  ;;  %v2024_v19 = vmul.f32 %v2023_v38, %v3697_v46 }
 0x280   :  { %v3664_v62 = vpop.permute.xlu1 %1420  ;;  %v1441_v33 = vpop.permute.xlu0 %1440  ;;  %v1374_v22 = vadd.f32 %v3610_v6, %v1348_v26 }
 0x281   :  { %v1349_v5 = vadd.f32 %v1345_v42, %v825_v15 }
 0x282   :  { %1834 = vrot.lane.b32.xlu1 %v1825_v58, %s2789_s8  ;;  %1836 = vrot.lane.b32.xlu0 %v1826_v23, %s2789_s8  ;;  %v1400_v59 = vadd.f32 %v3630_v8, %v1374_v22  ;;  %v1402_v8 = vadd.f32 %v3638_v3, %v1376_v31  ;;  %v1892_v3 = vmul.f32 %v1889_v27, %v3594_v29  ;;  %v3707_v22 = vld [vmem:[#allocation2 + $0x3c] sm:$0xff] }
 0x283   :  { %v1375_v6 = vadd.f32 %v3620_v0, %v1349_v5 }
 0x284   :  { %v1443_v49 = vpop.permute.xlu1 %1442  ;;  %v1445_v35 = vpop.permute.xlu0 %1444  ;;  %v1426_v43 = vadd.f32 %v1415_v28, %v1400_v59  ;;  %v1428_v12 = vadd.f32 %v1419_v21, %v1402_v8 }
 0x285   :  { %v1401_v58 = vadd.f32 %v3636_v44, %v1375_v6  ;;  %v1891_v44 = vmul.f32 %v1889_v27, %v3678_v54  ;;  %v2026_v6 = vmul.f32 %v2023_v38, %v3711_v61 }
 0x286   :  { %1838 = vrot.lane.b32.xlu1 %v1827_v57, %s2789_s8  ;;  %1872 = vrot.lane.b32.xlu0 %v1864_v36, %s2784_s25  ;;  %v1452_v23 = vadd.f32 %v1441_v33, %v1426_v43  ;;  %v1915_v33 = vstv %s2659_s13  ;;  %v1403_v57 = vadd.f32 %v3646_v11, %v1377_v56  ;;  %v1454_v15 = vadd.f32 %v1445_v35, %v1428_v12 }
 0x287   :  { %v1427_v0 = vadd.f32 %v1417_v55, %v1401_v58  ;;  %v1916_v35 = vmul.f32 %v1915_v33, %v3582_v18  ;;  %v3730_v58 = vld [vmem:[#allocation2 + $0x54] sm:$0xff]  ;;  %v1919_v12 = vmul.f32 %v1915_v33, %v3606_v50 }
 0x288   :  { %v1447_v9 = vpop.permute.xlu1 %1446  ;;  %v1467_v63 = vpop.permute.xlu0 %1466  ;;  %v1429_v48 = vadd.f32 %v3664_v62, %v1403_v57  ;;  %v2027_v8 = vmul.f32 %v3730_v58, %v2023_v38 }
 0x289   :  { %v1478_v28 = vadd.f32 %v1467_v63, %v1452_v23  ;;  %v1453_v36 = vadd.f32 %v1443_v49, %v1427_v0  ;;  %v1893_v49 = vmul.f32 %v1889_v27, %v3606_v50 }
 0x28a   :  { %1874 = vrot.lane.b32.xlu1 %v1865_v7, %s2784_s25  ;;  %1876 = vrot.lane.b32.xlu0 %v1866_v47, %s2784_s25  ;;  %v2025_v7 = vmul.f32 %v2023_v38, %v3707_v22  ;;  %v1455_v47 = vadd.f32 %v1447_v9, %v1429_v48  ;;  %v1918_v9 = vmul.f32 %v1915_v33, %v3594_v29 }
 0x28c   :  { %v1469_v37 = vpop.permute.xlu1 %1468  ;;  %v1471_v4 = vpop.permute.xlu0 %1470 }
 0x28d   :  { %v1479_v55 = vadd.f32 %v1469_v37, %v1453_v36  ;;  %v1480_v21 = vadd.f32 %v1471_v4, %v1454_v15  ;;  %v1917_v4 = vmul.f32 %v1915_v33, %v3678_v54  ;;  %v864_v15 = vadd.f32 %v3350_v14, %v3068_v1 }
 0x28e   :  { %1878 = vrot.lane.b32.xlu1 %v1867_v34, %s2784_s25  ;;  %1898 = vrot.lane.b32.xlu0 %v1890_v30, %s2785_s27  ;;  %v1941_v30 = vstv %s2660_s14 }
 0x28f   :  { %v1945_v57 = vmul.f32 %v1941_v30, %v3606_v50 }
 0x290   :  { %v1473_v13 = vpop.permute.xlu1 %1472  ;;  %v1493_v45 = vpop.permute.xlu0 %1492 }
 0x291   :  { %v1504_v26 = vadd.f32 %v1493_v45, %v1478_v28  ;;  %v1481_v62 = vadd.f32 %v1473_v13, %v1455_v47  ;;  %v1942_v28 = vmul.f32 %v1941_v30, %v3582_v18  ;;  %v1943_v45 = vmul.f32 %v1941_v30, %v3678_v54 }
 0x292   :  { %1900 = vrot.lane.b32.xlu1 %v1891_v44, %s2785_s27  ;;  %1902 = vrot.lane.b32.xlu0 %v1892_v3, %s2785_s27  ;;  %v1944_v44 = vmul.f32 %v1941_v30, %v3594_v29  ;;  %v1967_v3 = vstv %s2661_s15 }
 0x293   :  { %v3714_v42 = vadd.f32 %v2024_v19, %v1504_v26  ;;  %v1968_v36 = vmul.f32 %v1967_v3, %v3582_v18 }
 0x294   :  { %v1495_v63 = vpop.permute.xlu1 %1494  ;;  %v1497_v11 = vpop.permute.xlu0 %1496 }
 0x295   :  { %v1505_v5 = vadd.f32 %v1495_v63, %v1479_v55  ;;  %v1506_v59 = vadd.f32 %v1497_v11, %v1480_v21  ;;  %v1969_v55 = vmul.f32 %v1967_v3, %v3678_v54  ;;  %v1970_v21 = vmul.f32 %v1967_v3, %v3594_v29 }
 0x296   :  { %1904 = vrot.lane.b32.xlu1 %v1893_v49, %s2785_s27  ;;  %1924 = vrot.lane.b32.xlu0 %v1916_v35, %s2786_s29  ;;  %v890_v63 = vadd.f32 %v3366_v39, %v864_v15  ;;  %v1993_v11 = vstv %s2662_s16  ;;  %v4096_v49 = vld [vmem:[#allocation16_spill] sm:$0xff] }
 0x297   :  { %v3722_v31 = vadd.f32 %v2025_v7, %v1505_v5  ;;  %v3724_v43 = vadd.f32 %v2026_v6, %v1506_v59  ;;  %v865_v35 = vadd.f32 %v4096_v49, %v3078_v53  ;;  %v4097_v7 = vld [vmem:[#allocation18_spill] sm:$0xff]  ;;  %v1971_v5 = vmul.f32 %v1967_v3, %v3606_v50  ;;  %v4098_v6 = vld [vmem:[#allocation17_spill] sm:$0xff]  ;;  %v4099_v39 = vld [vmem:[#allocation20_spill] sm:$0xff] }
 0x298   :  { %v1499_v37 = vpop.permute.xlu1 %1498  ;;  %v3726_v27 = vpop.permute.xlu0 %1532  ;;  %v916_v1 = vadd.f32 %v4097_v7, %v890_v63  ;;  %v1994_v59 = vmul.f32 %v1993_v11, %v3582_v18  ;;  %v4102_v18 = vld [vmem:[#allocation21_spill] sm:$0xff] }
 0x299   :  { %v1507_v34 = vadd.f32 %v1499_v37, %v1481_v62  ;;  %v891_v62 = vadd.f32 %v4098_v6, %v865_v35  ;;  %v1997_v35 = vmul.f32 %v1993_v11, %v3606_v50  ;;  %v4106_v7 = vld [vmem:[#allocation25_spill] sm:$0xff] }
 0x29a   :  { %1926 = vrot.lane.b32.xlu1 %v1917_v4, %s2786_s29  ;;  %1928 = vrot.lane.b32.xlu0 %v1918_v9, %s2786_s29  ;;  %v942_v37 = vadd.f32 %v4099_v39, %v916_v1  ;;  %v4100_v4 = vld [vmem:[#allocation19_spill] sm:$0xff] }
 0x29b   :  { %v3735_v23 = vadd.f32 %v2027_v8, %v1507_v34  ;;  %v917_v9 = vadd.f32 %v4100_v4, %v891_v62  ;;  %v4101_v34 = vld [vmem:[#allocation22_spill] sm:$0xff]  ;;  %v2059_v4 = vstv %s2665_s20 }
 0x29c   :  { %v3737_v56 = vpop.permute.xlu1 %1534  ;;  %v3739_v0 = vpop.permute.xlu0 %1536  ;;  %v968_v53 = vadd.f32 %v4101_v34, %v942_v37 }
 0x29e   :  { %1930 = vrot.lane.b32.xlu1 %v1919_v12, %s2786_s29  ;;  %1950 = vrot.lane.b32.xlu0 %v1942_v28, %s2787_s4  ;;  %v1995_v12 = vmul.f32 %v1993_v11, %v3678_v54  ;;  %v1996_v28 = vmul.f32 %v1993_v11, %v3594_v29 }
 0x2a0   :  { %v3745_v13 = vpop.permute.xlu1 %1538  ;;  %v3747_v38 = vpop.permute.xlu0 %1558 }
 0x2a2   :  { %1952 = vrot.lane.b32.xlu1 %v1943_v45, %s2787_s4  ;;  %1954 = vrot.lane.b32.xlu0 %v1944_v44, %s2787_s4  ;;  %v943_v45 = vadd.f32 %v4102_v18, %v917_v9  ;;  %v4103_v44 = vld [vmem:[#allocation24_spill] sm:$0xff]  ;;  %v4107_v9 = vld [vmem:[#allocation27_spill] sm:$0xff]  ;;  %v2060_v18 = vmul.f32 %v2059_v4, %v3697_v46 }
 0x2a3   :  { %v994_v3 = vadd.f32 %v4103_v44, %v968_v53 }
 0x2a4   :  { %v3753_v33 = vpop.permute.xlu1 %1560  ;;  %v3755_v19 = vpop.permute.xlu0 %1562 }
 0x2a6   :  { %1956 = vrot.lane.b32.xlu1 %v1945_v57, %s2787_s4  ;;  %1976 = vrot.lane.b32.xlu0 %v1968_v36, %s2788_s6  ;;  %v2033_v57 = vstv %s2664_s17  ;;  %v4104_v36 = vld [vmem:[#allocation23_spill] sm:$0xff] }
 0x2a7   :  { %v969_v15 = vadd.f32 %v4104_v36, %v943_v45  ;;  %v2034_v29 = vmul.f32 %v2033_v57, %v3697_v46  ;;  %v2035_v39 = vmul.f32 %v2033_v57, %v3707_v22  ;;  %v2036_v50 = vmul.f32 %v2033_v57, %v3711_v61 }
 0x2a8   :  { %v3763_v26 = vpop.permute.xlu1 %1564  ;;  %v1585_v48 = vpop.permute.xlu0 %1584  ;;  %v2193_v36 = vstv %s2670_s21 }
 0x2a9   :  { %v995_v1 = vadd.f32 %v4106_v7, %v969_v15 }
 0x2aa   :  { %1978 = vrot.lane.b32.xlu1 %v1969_v55, %s2788_s6  ;;  %1980 = vrot.lane.b32.xlu0 %v1970_v21, %s2788_s6  ;;  %v4105_v55 = vld [vmem:[#allocation26_spill] sm:$0xff] }
 0x2ab   :  { %v1514_v21 = vmul.f32 %v4105_v55, %v3476_v32  ;;  %v1515_v6 = vmul.f32 %v4105_v55, %v3482_v2  ;;  %v1546_v2 = vadd.f32 %v3739_v0, %v4107_v9 }
 0x2ac   :  { %v1587_v14 = vpop.permute.xlu1 %1586  ;;  %v1589_v47 = vpop.permute.xlu0 %1588 }
 0x2ad   :  { %v1519_v11 = vadd.f32 %v1515_v6, %v995_v1 }
 0x2ae   :  { %1982 = vrot.lane.b32.xlu1 %v1971_v5, %s2788_s6  ;;  %2002 = vrot.lane.b32.xlu0 %v1994_v59, %s2789_s8  ;;  %v1518_v5 = vadd.f32 %v1514_v21, %v994_v3  ;;  %v3812_v3 = vld [vmem:[#allocation2 + $0x35] sm:$0xff] }
 0x2b0   :  { %v3781_v30 = vpop.permute.xlu1 %1590  ;;  %v1611_v8 = vpop.permute.xlu0 %1610  ;;  %v1544_v59 = vadd.f32 %v3726_v27, %v1518_v5  ;;  %v1545_v27 = vadd.f32 %v3737_v56, %v1519_v11  ;;  %v4108_v56 = vld [vmem:[#allocation28_spill] sm:$0xff] }
 0x2b1   :  { %v1547_v0 = vadd.f32 %v3745_v13, %v4108_v56  ;;  %v3826_v13 = vld [vmem:[#allocation2 + $0x4d] sm:$0xff] }
 0x2b2   :  { %2004 = vrot.lane.b32.xlu1 %v1995_v12, %s2789_s8  ;;  %2006 = vrot.lane.b32.xlu0 %v1996_v28, %s2789_s8  ;;  %v1570_v37 = vadd.f32 %v3747_v38, %v1544_v59  ;;  %v2037_v28 = vmul.f32 %v3730_v58, %v2033_v57  ;;  %v1571_v45 = vadd.f32 %v3753_v33, %v1545_v27  ;;  %v3822_v59 = vld [vmem:[#allocation2 + $0x3d] sm:$0xff] }
 0x2b3   :  { %v1572_v38 = vadd.f32 %v3755_v19, %v1546_v2  ;;  %v2061_v33 = vmul.f32 %v2059_v4, %v3707_v22  ;;  %v2062_v19 = vmul.f32 %v2059_v4, %v3711_v61  ;;  %v2196_v9 = vmul.f32 %v2193_v36, %v3826_v13 }
 0x2b4   :  { %v1613_v63 = vpop.permute.xlu1 %1612  ;;  %v1615_v49 = vpop.permute.xlu0 %1614  ;;  %v1596_v34 = vadd.f32 %v1585_v48, %v1570_v37  ;;  %v1597_v48 = vadd.f32 %v1587_v14, %v1571_v45  ;;  %v2111_v45 = vstv %s2667_s1 }
 0x2b5   :  { %v1598_v15 = vadd.f32 %v1589_v47, %v1572_v38 }
 0x2b6   :  { %2008 = vrot.lane.b32.xlu1 %v1997_v35, %s2789_s8  ;;  %2042 = vrot.lane.b32.xlu0 %v2034_v29, %s2784_s25  ;;  %v1622_v44 = vadd.f32 %v1611_v8, %v1596_v34  ;;  %v2085_v8 = vstv %s2666_s22  ;;  %v2194_v35 = vmul.f32 %v2193_v36, %v3812_v3  ;;  %v1573_v29 = vadd.f32 %v3763_v26, %v1547_v0 }
 0x2b7   :  { %v1623_v7 = vadd.f32 %v1613_v63, %v1597_v48  ;;  %v1624_v1 = vadd.f32 %v1615_v49, %v1598_v15  ;;  %v2063_v63 = vmul.f32 %v3730_v58, %v2059_v4  ;;  %v2086_v49 = vmul.f32 %v2085_v8, %v3697_v46 }
 0x2b8   :  { %v1617_v32 = vpop.permute.xlu1 %1616  ;;  %v1637_v62 = vpop.permute.xlu0 %1636  ;;  %v1599_v14 = vadd.f32 %v3781_v30, %v1573_v29  ;;  %v3837_v30 = vld [vmem:[#allocation2 + $0x55] sm:$0xff]  ;;  %v2089_v48 = vmul.f32 %v3730_v58, %v2085_v8  ;;  %v2112_v15 = vmul.f32 %v2111_v45, %v3697_v46 }
 0x2b9   :  { %v1648_v57 = vadd.f32 %v1637_v62, %v1622_v44  ;;  %v2197_v38 = vmul.f32 %v2193_v36, %v3837_v30 }
 0x2ba   :  { %2044 = vrot.lane.b32.xlu1 %v2035_v39, %s2784_s25  ;;  %2046 = vrot.lane.b32.xlu0 %v2036_v50, %s2784_s25  ;;  %v2195_v50 = vmul.f32 %v2193_v36, %v3822_v59  ;;  %v1625_v11 = vadd.f32 %v1617_v32, %v1599_v14  ;;  %v2088_v32 = vmul.f32 %v2085_v8, %v3711_v61 }
 0x2bb   :  { %v2113_v36 = vmul.f32 %v2111_v45, %v3707_v22 }
 0x2bc   :  { %v1639_v53 = vpop.permute.xlu1 %1638  ;;  %v1641_v12 = vpop.permute.xlu0 %1640 }
 0x2bd   :  { %v1649_v47 = vadd.f32 %v1639_v53, %v1623_v7  ;;  %v1650_v6 = vadd.f32 %v1641_v12, %v1624_v1 }
 0x2be   :  { %2048 = vrot.lane.b32.xlu1 %v2037_v28, %s2784_s25  ;;  %2068 = vrot.lane.b32.xlu0 %v2060_v18, %s2785_s27  ;;  %v2087_v28 = vmul.f32 %v2085_v8, %v3707_v22  ;;  %v2115_v8 = vmul.f32 %v3730_v58, %v2111_v45 }
 0x2c0   :  { %v1643_v55 = vpop.permute.xlu1 %1642  ;;  %v1663_v21 = vpop.permute.xlu0 %1662 }
 0x2c1   :  { %v1674_v5 = vadd.f32 %v1663_v21, %v1648_v57  ;;  %v1651_v2 = vadd.f32 %v1643_v55, %v1625_v11  ;;  %v2114_v21 = vmul.f32 %v2111_v45, %v3711_v61  ;;  %v3889_v45 = vld [vmem:[#allocation2 + $0x4e] sm:$0xff] }
 0x2c2   :  { %2070 = vrot.lane.b32.xlu1 %v2061_v33, %s2785_s27  ;;  %2072 = vrot.lane.b32.xlu0 %v2062_v19, %s2785_s27 }
 0x2c3   :  { %v3829_v62 = vadd.f32 %v2194_v35, %v1674_v5  ;;  %v4109_v35 = vld [vmem:[#allocation13_spill] sm:$0xff] }
 0x2c4   :  { %v1665_v39 = vpop.permute.xlu1 %1664  ;;  %v1667_v26 = vpop.permute.xlu0 %1666  ;;  %v2138_v29 = vmul.f32 %v4109_v35, %v3697_v46  ;;  %v2139_v5 = vmul.f32 %v4109_v35, %v3707_v22  ;;  %v2140_v14 = vmul.f32 %v4109_v35, %v3711_v61 }
 0x2c5   :  { %v1675_v37 = vadd.f32 %v1665_v39, %v1649_v47  ;;  %v1676_v27 = vadd.f32 %v1667_v26, %v1650_v6  ;;  %v2203_v47 = vstv %s2671_s0 }
 0x2c6   :  { %2074 = vrot.lane.b32.xlu1 %v2063_v63, %s2785_s27  ;;  %2094 = vrot.lane.b32.xlu0 %v2086_v49, %s2786_s29  ;;  %v2204_v26 = vmul.f32 %v2203_v47, %v3812_v3  ;;  %v2205_v63 = vmul.f32 %v2203_v47, %v3822_v59  ;;  %v2206_v11 = vmul.f32 %v2203_v47, %v3826_v13 }
 0x2c7   :  { %v3839_v34 = vadd.f32 %v2195_v50, %v1675_v37  ;;  %v3841_v53 = vadd.f32 %v2196_v9, %v1676_v27  ;;  %v2207_v37 = vmul.f32 %v2203_v47, %v3837_v30  ;;  %v3881_v27 = vld [vmem:[#allocation2 + $0x36] sm:$0xff]  ;;  %v2373_v9 = vstv %s2678_s23 }
 0x2c8   :  { %v1669_v4 = vpop.permute.xlu1 %1668  ;;  %v1703_v12 = vpop.permute.xlu0 %1702 }
 0x2c9   :  { %v1677_v18 = vadd.f32 %v1669_v4, %v1651_v2  ;;  %v3883_v2 = vld [vmem:[#allocation2 + $0x3e] sm:$0xff] }
 0x2ca   :  { %2096 = vrot.lane.b32.xlu1 %v2087_v28, %s2786_s29  ;;  %2098 = vrot.lane.b32.xlu0 %v2088_v32, %s2786_s29  ;;  %v2374_v32 = vmul.f32 %v2373_v9, %v3881_v27 }
 0x2cb   :  { %v3848_v44 = vadd.f32 %v2197_v38, %v1677_v18  ;;  %v2375_v18 = vmul.f32 %v2373_v9, %v3883_v2  ;;  %v3891_v38 = vld [vmem:[#allocation2 + $0x56] sm:$0xff] }
 0x2cc   :  { %v1705_v56 = vpop.permute.xlu1 %1704  ;;  %v1707_v0 = vpop.permute.xlu0 %1706 }
 0x2ce   :  { %2100 = vrot.lane.b32.xlu1 %v2089_v48, %s2786_s29  ;;  %2120 = vrot.lane.b32.xlu0 %v2112_v15, %s2787_s4  ;;  %v1714_v48 = vadd.f32 %v1703_v12, %v3511_v51 }
 0x2d0   :  { %v3854_v57 = vpop.permute.xlu1 %1708  ;;  %v1729_v55 = vpop.permute.xlu0 %1728 }
 0x2d1   :  { %v1740_v35 = vadd.f32 %v1729_v55, %v1714_v48 }
 0x2d2   :  { %2122 = vrot.lane.b32.xlu1 %v2113_v36, %s2787_s4  ;;  %2124 = vrot.lane.b32.xlu0 %v2114_v21, %s2787_s4  ;;  %v2376_v21 = vmul.f32 %v2373_v9, %v3889_v45 }
 0x2d4   :  { %v1731_v33 = vpop.permute.xlu1 %1730  ;;  %v1733_v19 = vpop.permute.xlu0 %1732 }
 0x2d6   :  { %2126 = vrot.lane.b32.xlu1 %v2115_v8, %s2787_s4  ;;  %2146 = vrot.lane.b32.xlu0 %v2138_v29, %s2788_s6  ;;  %v2377_v8 = vmul.f32 %v2373_v9, %v3891_v38  ;;  %v2229_v29 = vstv %s2672_s24 }
 0x2d8   :  { %v3865_v7 = vpop.permute.xlu1 %1734  ;;  %v1755_v1 = vpop.permute.xlu0 %1754 }
 0x2d9   :  { %v1766_v47 = vadd.f32 %v1755_v1, %v1740_v35 }
 0x2da   :  { %2148 = vrot.lane.b32.xlu1 %v2139_v5, %s2788_s6  ;;  %2150 = vrot.lane.b32.xlu0 %v2140_v14, %s2788_s6  ;;  %v1715_v5 = vadd.f32 %v1705_v56, %v3521_v52  ;;  %v1716_v14 = vadd.f32 %v1707_v0, %v3523_v16  ;;  %v2399_v52 = vstv %s2679_s28  ;;  %v1717_v16 = vadd.f32 %v3854_v57, %v3530_v40 }
 0x2dc   :  { %v1757_v6 = vpop.permute.xlu1 %1756  ;;  %v1759_v39 = vpop.permute.xlu0 %1758  ;;  %v1741_v55 = vadd.f32 %v1731_v33, %v1715_v5  ;;  %v1742_v9 = vadd.f32 %v1733_v19, %v1716_v14  ;;  %v2232_v19 = vmul.f32 %v2229_v29, %v3826_v13 }
 0x2de   :  { %2212 = vrot.lane.b32.xlu1 %v2204_v26, %s2784_s25  ;;  %2214 = vrot.lane.b32.xlu0 %v2205_v63, %s2784_s25  ;;  %v4110_v26 = vld [vmem:[#allocation15_spill] sm:$0xff]  ;;  %v1768_v56 = vadd.f32 %v1759_v39, %v1742_v9 }
 0x2df   :  { %v1205_v51 = vadd.f32 %v3532_v20, %v4110_v26  ;;  %v1767_v20 = vadd.f32 %v1757_v6, %v1741_v55 }
 0x2e0   :  { %v3877_v49 = vpop.permute.xlu1 %1760  ;;  %v1781_v50 = vpop.permute.xlu0 %1780 }
 0x2e1   :  { %v1231_v48 = vadd.f32 %v3544_v24, %v1205_v51 }
 0x2e2   :  { %2216 = vrot.lane.b32.xlu1 %v2206_v11, %s2784_s25  ;;  %2218 = vrot.lane.b32.xlu0 %v2207_v37, %s2784_s25  ;;  %v2230_v11 = vmul.f32 %v2229_v29, %v3812_v3  ;;  %v2231_v37 = vmul.f32 %v2229_v29, %v3822_v59 }
 0x2e3   :  { %v1257_v1 = vadd.f32 %v3554_v10, %v1231_v48 }
 0x2e4   :  { %v1783_v4 = vpop.permute.xlu1 %1782  ;;  %v1785_v28 = vpop.permute.xlu0 %1784 }
 0x2e5   :  { %v1793_v35 = vadd.f32 %v1783_v4, %v1767_v20  ;;  %v1794_v5 = vadd.f32 %v1785_v28, %v1768_v56  ;;  %v1283_v57 = vadd.f32 %v3564_v25, %v1257_v1  ;;  %v4111_v20 = vld [vmem:[#allocation29_spill] sm:$0xff] }
 0x2e6   :  { %2382 = vrot.lane.b32.xlu1 %v2374_v32, %s2784_s25  ;;  %2384 = vrot.lane.b32.xlu0 %v2375_v18, %s2784_s25  ;;  %v1792_v32 = vadd.f32 %v1781_v50, %v1766_v47  ;;  %v2363_v18 = vstv %s2677_s26  ;;  %v2233_v50 = vmul.f32 %v2229_v29, %v3837_v30  ;;  %v2400_v47 = vmul.f32 %v2399_v52, %v3881_v27 }
 0x2e7   :  { %v2364_v24 = vmul.f32 %v2363_v18, %v3881_v27  ;;  %v2365_v4 = vmul.f32 %v2363_v18, %v3883_v2  ;;  %v2366_v25 = vmul.f32 %v2363_v18, %v3889_v45  ;;  %v1309_v28 = vadd.f32 %v3576_v17, %v1283_v57 }
 0x2e8   :  { %v1787_v15 = vpop.permute.xlu1 %1786  ;;  %v1807_v36 = vpop.permute.xlu0 %1806  ;;  %v2403_v17 = vmul.f32 %v2399_v52, %v3891_v38  ;;  %v1855_v56 = vmul.f32 %v4111_v20, %v3678_v54 }
 0x2e9   :  { %v1818_v0 = vadd.f32 %v1807_v36, %v1792_v32  ;;  %v2402_v32 = vmul.f32 %v2399_v52, %v3889_v45 }
 0x2ea   :  { %2386 = vrot.lane.b32.xlu1 %v2376_v21, %s2784_s25  ;;  %2388 = vrot.lane.b32.xlu0 %v2377_v8, %s2784_s25  ;;  %s3914_s25 = sld [smem:[#allocation8 + $0x57]]  ;;  %v1743_v8 = vadd.f32 %v3865_v7, %v1717_v16  ;;  %v2401_v7 = vmul.f32 %v2399_v52, %v3883_v2 }
 0x2ec   :  { %v1809_v12 = vpop.permute.xlu1 %1808  ;;  %v1811_v63 = vpop.permute.xlu0 %1810  ;;  %v1769_v10 = vadd.f32 %v3877_v49, %v1743_v8 }
 0x2ed   :  { %v1819_v6 = vadd.f32 %v1809_v12, %v1793_v35  ;;  %v1820_v39 = vadd.f32 %v1811_v63, %v1794_v5  ;;  %v1335_v12 = vadd.f32 %v3598_v41, %v1309_v28  ;;  %v2367_v41 = vmul.f32 %v2363_v18, %v3891_v38  ;;  %v4113_v5 = vld [vmem:[#allocation31_spill] sm:$0xff] }
 0x2ee   :  { %2238 = vrot.lane.b32.xlu1 %v2230_v11, %s2785_s27  ;;  %2240 = vrot.lane.b32.xlu0 %v2231_v37, %s2785_s27  ;;  %v1795_v26 = vadd.f32 %v1787_v15, %v1769_v10  ;;  %v2425_v10 = vstv %s2680_s2 }
 0x2ef   :  { %v2428_v28 = vmul.f32 %v2425_v10, %v3889_v45 }
 0x2f0   :  { %v1813_v21 = vpop.permute.xlu1 %1812  ;;  %v1833_v33 = vpop.permute.xlu0 %1832  ;;  %v2255_v15 = vstv %s3914_s25 }
 0x2f1   :  { %v1844_v40 = vadd.f32 %v1833_v33, %v1818_v0  ;;  %v1821_v63 = vadd.f32 %v1813_v21, %v1795_v26  ;;  %v1859_v0 = vadd.f32 %v1855_v56, %v1335_v12  ;;  %v2256_v52 = vmul.f32 %v2255_v15, %v3812_v3 }
 0x2f2   :  { %2242 = vrot.lane.b32.xlu1 %v2232_v19, %s2785_s27  ;;  %2244 = vrot.lane.b32.xlu0 %v2233_v50, %s2785_s27  ;;  %v2257_v19 = vmul.f32 %v2255_v15, %v3822_v59  ;;  %v4112_v50 = vld [vmem:[#allocation30_spill] sm:$0xff]  ;;  %v2258_v8 = vmul.f32 %v2255_v15, %v3826_v13  ;;  %v2259_v35 = vmul.f32 %v2255_v15, %v3837_v30 }
 0x2f3   :  { %v3922_v36 = vadd.f32 %v2364_v24, %v1844_v40  ;;  %v2429_v26 = vmul.f32 %v2425_v10, %v3891_v38 }
 0x2f4   :  { %v1835_v29 = vpop.permute.xlu1 %1834  ;;  %v1837_v14 = vpop.permute.xlu0 %1836 }
 0x2f5   :  { %v1845_v51 = vadd.f32 %v1835_v29, %v1819_v6  ;;  %v1846_v49 = vadd.f32 %v1837_v14, %v1820_v39  ;;  %v2426_v29 = vmul.f32 %v2425_v10, %v3881_v27  ;;  %v2427_v14 = vmul.f32 %v2425_v10, %v3883_v2 }
 0x2f6   :  { %2408 = vrot.lane.b32.xlu1 %v2400_v47, %s2785_s27  ;;  %2410 = vrot.lane.b32.xlu0 %v2401_v7, %s2785_s27 }
 0x2f7   :  { %v3932_v11 = vadd.f32 %v2365_v4, %v1845_v51  ;;  %v3934_v37 = vadd.f32 %v2366_v25, %v1846_v49 }
 0x2f8   :  { %v1839_v55 = vpop.permute.xlu1 %1838  ;;  %v1873_v9 = vpop.permute.xlu0 %1872 }
 0x2f9   :  { %v1847_v48 = vadd.f32 %v1839_v55, %v1821_v63  ;;  %v1884_v16 = vadd.f32 %v1873_v9, %v3596_v60 }
 0x2fa   :  { %2412 = vrot.lane.b32.xlu1 %v2402_v32, %s2785_s27  ;;  %2414 = vrot.lane.b32.xlu0 %v2403_v17, %s2785_s27  ;;  %s2674_s27 = sld [smem:[#allocation8 + $0x58]] }
 0x2fb   :  { %v3945_v1 = vadd.f32 %v2367_v41, %v1847_v48 }
 0x2fc   :  { %v1875_v21 = vpop.permute.xlu1 %1874  ;;  %v1877_v33 = vpop.permute.xlu0 %1876 }
 0x2fd   :  { %v1885_v60 = vadd.f32 %v1875_v21, %v1859_v0  ;;  %v1886_v24 = vadd.f32 %v1877_v33, %v4112_v50  ;;  %v2451_v21 = vstv %s2681_s30 }
 0x2fe   :  { %2264 = vrot.lane.b32.xlu1 %v2256_v52, %s2786_s29  ;;  %2266 = vrot.lane.b32.xlu0 %v2257_v19, %s2786_s29  ;;  %v2452_v19 = vmul.f32 %v2451_v21, %v3881_v27 }
 0x300   :  { %v1879_v54 = vpop.permute.xlu1 %1878  ;;  %v1899_v18 = vpop.permute.xlu0 %1898  ;;  %v2281_v12 = vstv %s2674_s27 }
 0x301   :  { %v1887_v40 = vadd.f32 %v1879_v54, %v4113_v5  ;;  %v1910_v57 = vadd.f32 %v1899_v18, %v1884_v16  ;;  %v2282_v9 = vmul.f32 %v2281_v12, %v3812_v3  ;;  %v2283_v32 = vmul.f32 %v2281_v12, %v3822_v59 }
 0x302   :  { %2268 = vrot.lane.b32.xlu1 %v2258_v8, %s2786_s29  ;;  %2270 = vrot.lane.b32.xlu0 %v2259_v35, %s2786_s29  ;;  %v2284_v20 = vmul.f32 %v2281_v12, %v3826_v13  ;;  %v2285_v56 = vmul.f32 %v2281_v12, %v3837_v30  ;;  %v2454_v8 = vmul.f32 %v2451_v21, %v3889_v45 }
 0x303   :  { %v2455_v35 = vmul.f32 %v2451_v21, %v3891_v38 }
 0x304   :  { %v1901_v6 = vpop.permute.xlu1 %1900  ;;  %v1903_v39 = vpop.permute.xlu0 %1902 }
 0x305   :  { %v1911_v47 = vadd.f32 %v1901_v6, %v1885_v60  ;;  %v1912_v7 = vadd.f32 %v1903_v39, %v1886_v24  ;;  %v2453_v60 = vmul.f32 %v2451_v21, %v3883_v2 }
 0x306   :  { %2434 = vrot.lane.b32.xlu1 %v2426_v29, %s2786_s29  ;;  %2436 = vrot.lane.b32.xlu0 %v2427_v14, %s2786_s29 }
 0x308   :  { %v1905_v4 = vpop.permute.xlu1 %1904  ;;  %v1925_v25 = vpop.permute.xlu0 %1924 }
 0x309   :  { %v1913_v51 = vadd.f32 %v1905_v4, %v1887_v40  ;;  %v1936_v49 = vadd.f32 %v1925_v25, %v1910_v57 }
 0x30a   :  { %2438 = vrot.lane.b32.xlu1 %v2428_v28, %s2786_s29  ;;  %2440 = vrot.lane.b32.xlu0 %v2429_v26, %s2786_s29  ;;  %s2675_s29 = sld [smem:[#allocation8 + $0x59]] }
 0x30c   :  { %v1927_v63 = vpop.permute.xlu1 %1926  ;;  %v1929_v55 = vpop.permute.xlu0 %1928 }
 0x30d   :  { %v1937_v17 = vadd.f32 %v1927_v63, %v1911_v47  ;;  %v1938_v15 = vadd.f32 %v1929_v55, %v1912_v7  ;;  %v4114_v47 = vld [vmem:[#allocation14_spill] sm:$0xff] }
 0x30e   :  { %2290 = vrot.lane.b32.xlu1 %v2282_v9, %s2787_s4  ;;  %2292 = vrot.lane.b32.xlu0 %v2283_v32, %s2787_s4 }
 0x310   :  { %v1931_v48 = vpop.permute.xlu1 %1930  ;;  %v1951_v16 = vpop.permute.xlu0 %1950  ;;  %v2307_v57 = vstv %s2675_s29 }
 0x311   :  { %v1939_v41 = vadd.f32 %v1931_v48, %v1913_v51  ;;  %v1962_v0 = vadd.f32 %v1951_v16, %v1936_v49  ;;  %v2308_v39 = vmul.f32 %v2307_v57, %v3812_v3  ;;  %v2309_v25 = vmul.f32 %v2307_v57, %v3822_v59 }
 0x312   :  { %2294 = vrot.lane.b32.xlu1 %v2284_v20, %s2787_s4  ;;  %2296 = vrot.lane.b32.xlu0 %v2285_v56, %s2787_s4  ;;  %v2310_v28 = vmul.f32 %v2307_v57, %v3826_v13  ;;  %v2477_v49 = vstv %s2682_s5  ;;  %v2311_v55 = vmul.f32 %v2307_v57, %v3837_v30 }
 0x313   :  { %v2478_v9 = vmul.f32 %v2477_v49, %v3881_v27  ;;  %v2479_v16 = vmul.f32 %v2477_v49, %v3883_v2  ;;  %v2480_v20 = vmul.f32 %v2477_v49, %v3889_v45 }
 0x314   :  { %v1953_v33 = vpop.permute.xlu1 %1952  ;;  %v1955_v52 = vpop.permute.xlu0 %1954 }
 0x315   :  { %v1963_v50 = vadd.f32 %v1953_v33, %v1937_v17  ;;  %v1964_v24 = vadd.f32 %v1955_v52, %v1938_v15  ;;  %v2481_v52 = vmul.f32 %v2477_v49, %v3891_v38 }
 0x316   :  { %2460 = vrot.lane.b32.xlu1 %v2452_v19, %s2787_s4  ;;  %2462 = vrot.lane.b32.xlu0 %v2453_v60, %s2787_s4 }
 0x318   :  { %v1957_v54 = vpop.permute.xlu1 %1956  ;;  %v1977_v18 = vpop.permute.xlu0 %1976 }
 0x319   :  { %v1965_v5 = vadd.f32 %v1957_v54, %v1939_v41  ;;  %v1988_v40 = vadd.f32 %v1977_v18, %v1962_v0 }
 0x31a   :  { %2464 = vrot.lane.b32.xlu1 %v2454_v8, %s2787_s4  ;;  %2466 = vrot.lane.b32.xlu0 %v2455_v35, %s2787_s4  ;;  %s2669_s4 = sld [smem:[#allocation8 + $0x53]] }
 0x31c   :  { %v1979_v10 = vpop.permute.xlu1 %1978  ;;  %v1981_v6 = vpop.permute.xlu0 %1980 }
 0x31d   :  { %v1989_v29 = vadd.f32 %v1979_v10, %v1963_v50  ;;  %v1990_v14 = vadd.f32 %v1981_v6, %v1964_v24 }
 0x31e   :  { %2152 = vrot.lane.b32.xlu1 %v4114_v47, %s2788_s6  ;;  %2316 = vrot.lane.b32.xlu0 %v2308_v39, %s2788_s6 }
 0x320   :  { %v1983_v7 = vpop.permute.xlu1 %1982  ;;  %v2003_v4 = vpop.permute.xlu0 %2002  ;;  %v2163_v0 = vstv %s2669_s4 }
 0x321   :  { %v1991_v26 = vadd.f32 %v1983_v7, %v1965_v5  ;;  %v3987_v51 = vadd.f32 %v2003_v4, %v1988_v40  ;;  %v2164_v19 = vmul.f32 %v2163_v0, %v3697_v46  ;;  %v2165_v54 = vmul.f32 %v2163_v0, %v3707_v22 }
 0x322   :  { %2318 = vrot.lane.b32.xlu1 %v2309_v25, %s2788_s6  ;;  %2320 = vrot.lane.b32.xlu0 %v2310_v28, %s2788_s6  ;;  %v2166_v18 = vmul.f32 %v2163_v0, %v3711_v61  ;;  %v2333_v5 = vstv %s2676_s7 }
 0x323   :  { %v2334_v40 = vmul.f32 %v2333_v5, %v3812_v3  ;;  %v2336_v6 = vmul.f32 %v2333_v5, %v3826_v13  ;;  %v2337_v47 = vmul.f32 %v2333_v5, %v3837_v30 }
 0x324   :  { %v2005_v12 = vpop.permute.xlu1 %2004  ;;  %v2007_v63 = vpop.permute.xlu0 %2006 }
 0x325   :  { %v3993_v32 = vadd.f32 %v2005_v12, %v1989_v29  ;;  %v3995_v17 = vadd.f32 %v2007_v63, %v1990_v14  ;;  %v2503_v14 = vstv %s2683_s9 }
 0x326   :  { %2322 = vrot.lane.b32.xlu1 %v2311_v55, %s2788_s6  ;;  %2486 = vrot.lane.b32.xlu0 %v2478_v9, %s2788_s6  ;;  %v2504_v7 = vmul.f32 %v2503_v14, %v3881_v27  ;;  %v2505_v28 = vmul.f32 %v2503_v14, %v3883_v2  ;;  %v2507_v63 = vmul.f32 %v2503_v14, %v3891_v38 }
 0x328   :  { %v2009_v15 = vpop.permute.xlu1 %2008  ;;  %v2043_v48 = vpop.permute.xlu0 %2042 }
 0x329   :  { %v4001_v56 = vadd.f32 %v2009_v15, %v1991_v26  ;;  %v2054_v41 = vadd.f32 %v2043_v48, %v3714_v42  ;;  %v2506_v26 = vmul.f32 %v2503_v14, %v3889_v45 }
 0x32a   :  { %2488 = vrot.lane.b32.xlu1 %v2479_v16, %s2788_s6  ;;  %2490 = vrot.lane.b32.xlu0 %v2480_v20, %s2788_s6 }
 0x32c   :  { %v2045_v21 = vpop.permute.xlu1 %2044  ;;  %v2047_v33 = vpop.permute.xlu0 %2046 }
 0x32d   :  { %v2055_v60 = vadd.f32 %v2045_v21, %v3722_v31  ;;  %v2056_v50 = vadd.f32 %v2047_v33, %v3724_v43  ;;  %v2167_v43 = vmul.f32 %v3730_v58, %v2163_v0 }
 0x32e   :  { %2492 = vrot.lane.b32.xlu1 %v2481_v52, %s2788_s6  ;;  %2172 = vrot.lane.b32.xlu0 %v2164_v19, %s2789_s8  ;;  %s2790_s6 = smov [#allocation9]  }
 0x330   :  { %v2049_v42 = vpop.permute.xlu1 %2048  ;;  %v2069_v24 = vpop.permute.xlu0 %2068 }
 0x331   :  { %v2057_v8 = vadd.f32 %v2049_v42, %v3735_v23  ;;  %v2080_v35 = vadd.f32 %v2069_v24, %v2054_v41  ;;  %v2335_v23 = vmul.f32 %v2333_v5, %v3822_v59 }
 0x332   :  { %2174 = vrot.lane.b32.xlu1 %v2165_v54, %s2789_s8  ;;  %2176 = vrot.lane.b32.xlu0 %v2166_v18, %s2789_s8 }
 0x334   :  { %v2071_v46 = vpop.permute.xlu1 %2070  ;;  %v2073_v31 = vpop.permute.xlu0 %2072 }
 0x335   :  { %v2081_v57 = vadd.f32 %v2071_v46, %v2055_v60  ;;  %v2082_v10 = vadd.f32 %v2073_v31, %v2056_v50 }
 0x336   :  { %2178 = vrot.lane.b32.xlu1 %v2167_v43, %s2789_s8  ;;  %2342 = vrot.lane.b32.xlu0 %v2334_v40, %s2789_s8 }
 0x338   :  { %v2075_v22 = vpop.permute.xlu1 %2074  ;;  %v2095_v61 = vpop.permute.xlu0 %2094 }
 0x339   :  { %v2083_v39 = vadd.f32 %v2075_v22, %v2057_v8  ;;  %v2106_v29 = vadd.f32 %v2095_v61, %v2080_v35 }
 0x33a   :  { %2344 = vrot.lane.b32.xlu1 %v2335_v23, %s2789_s8  ;;  %2346 = vrot.lane.b32.xlu0 %v2336_v6, %s2789_s8 }
 0x33c   :  { %v2097_v58 = vpop.permute.xlu1 %2096  ;;  %v2099_v3 = vpop.permute.xlu0 %2098 }
 0x33d   :  { %v2107_v4 = vadd.f32 %v2097_v58, %v2081_v57  ;;  %v2108_v25 = vadd.f32 %v2099_v3, %v2082_v10 }
 0x33e   :  { %2348 = vrot.lane.b32.xlu1 %v2337_v47, %s2789_s8  ;;  %2512 = vrot.lane.b32.xlu0 %v2504_v7, %s2789_s8 }
 0x340   :  { %v2101_v59 = vpop.permute.xlu1 %2100  ;;  %v2121_v13 = vpop.permute.xlu0 %2120 }
 0x341   :  { %v2109_v49 = vadd.f32 %v2101_v59, %v2083_v39  ;;  %v2132_v12 = vadd.f32 %v2121_v13, %v2106_v29 }
 0x342   :  { %2514 = vrot.lane.b32.xlu1 %v2505_v28, %s2789_s8  ;;  %2516 = vrot.lane.b32.xlu0 %v2506_v26, %s2789_s8 }
 0x344   :  { %v2123_v30 = vpop.permute.xlu1 %2122  ;;  %v2125_v27 = vpop.permute.xlu0 %2124 }
 0x345   :  { %v2133_v55 = vadd.f32 %v2123_v30, %v2107_v4  ;;  %v2134_v9 = vadd.f32 %v2125_v27, %v2108_v25 }
 0x346   :  { %2518 = vrot.lane.b32.xlu1 %v2507_v63, %s2789_s8  ;;  %s2574_s8 = sshll.u32 %s2790_s6, 4  ;;  %s2575_s8 = int_to_ptr.vmem [resolvable:$true] %s2574_s8 }
 0x347   :  { %s2752_s10 = scalar_lea.vmem %s2575_s8, 512  ;;  %p2757_p11 = scmp.lt.s32.totalorder %s2575_s8, %s2575_s8 }
 0x348   :  { %v2127_v15 = vpop.permute.xlu1 %2126  ;;  %v2147_v48 = vpop.permute.xlu0 %2146  ;;  %p2753_p10 = scmp.ne.s32.totalorder %s2575_s8, %s2752_s10  ;;  %p2758_p12 = scmp.lt.s32.totalorder %s2752_s10, %s2752_s10 }
 0x349   :  { %v4035_v16 = vadd.f32 %v2127_v15, %v2109_v49  ;;  %v4037_v2 = vadd.f32 %v2147_v48, %v2132_v12 }
 0x34a   :  { %p2759_p13 = por %p2758_p12, %p2757_p11 }
 0x34c   :  { %v2149_v45 = vpop.permute.xlu1 %2148  ;;  %v2151_v20 = vpop.permute.xlu0 %2150  ;;  %p2760_p0 = pnand %p2759_p13, %p2753_p10 }
 0x34d   :  { %v4039_v41 = vadd.f32 %v2149_v45, %v2133_v55  ;;  %v4041_v0 = vadd.f32 %v2151_v20, %v2134_v9 }
 0x350   :  { %v2213_v21 = vpop.permute.xlu1 %2212  ;;  %v2215_v33 = vpop.permute.xlu0 %2214 }
 0x351   :  { %v2224_v38 = vadd.f32 %v2213_v21, %v3829_v62  ;;  %v2225_v52 = vadd.f32 %v2215_v33, %v3839_v34 }
 0x354   :  { %v2217_v19 = vpop.permute.xlu1 %2216  ;;  %v2219_v60 = vpop.permute.xlu0 %2218 }
 0x355   :  { %v2226_v50 = vadd.f32 %v2217_v19, %v3841_v53  ;;  %v2227_v42 = vadd.f32 %v2219_v60, %v3848_v44 }
 0x358   :  { %v2383_v24 = vpop.permute.xlu1 %2382  ;;  %v2385_v54 = vpop.permute.xlu0 %2384 }
 0x359   :  { %v2394_v18 = vadd.f32 %v2383_v24, %v3922_v36  ;;  %v2395_v8 = vadd.f32 %v2385_v54, %v3932_v11 }
 0x35c   :  { %v2387_v35 = vpop.permute.xlu1 %2386  ;;  %v2389_v5 = vpop.permute.xlu0 %2388 }
 0x35d   :  { %v2396_v46 = vadd.f32 %v2387_v35, %v3934_v37  ;;  %v2397_v62 = vadd.f32 %v2389_v5, %v3945_v1 }
 0x360   :  { %v2239_v31 = vpop.permute.xlu1 %2238  ;;  %v2241_v34 = vpop.permute.xlu0 %2240 }
 0x361   :  { %v2250_v43 = vadd.f32 %v2239_v31, %v2224_v38  ;;  %v2251_v40 = vadd.f32 %v2241_v34, %v2225_v52 }
 0x364   :  { %v2243_v57 = vpop.permute.xlu1 %2242  ;;  %v2245_v53 = vpop.permute.xlu0 %2244 }
 0x365   :  { %v2252_v10 = vadd.f32 %v2243_v57, %v2226_v50  ;;  %v4051_v44 = vadd.f32 %v2245_v53, %v2227_v42 }
 0x368   :  { %v2409_v22 = vpop.permute.xlu1 %2408  ;;  %v2411_v61 = vpop.permute.xlu0 %2410 }
 0x369   :  { %v2420_v36 = vadd.f32 %v2409_v22, %v2394_v18  ;;  %v2421_v23 = vadd.f32 %v2411_v61, %v2395_v8 }
 0x36c   :  { %v2413_v11 = vpop.permute.xlu1 %2412  ;;  %v2415_v6 = vpop.permute.xlu0 %2414 }
 0x36d   :  { %v2422_v39 = vadd.f32 %v2413_v11, %v2396_v46  ;;  %v2423_v29 = vadd.f32 %v2415_v6, %v2397_v62 }
 0x370   :  { %v2265_v37 = vpop.permute.xlu1 %2264  ;;  %v2267_v14 = vpop.permute.xlu0 %2266 }
 0x371   :  { %v2276_v46 = vadd.f32 %v2265_v37, %v2250_v43 }
 0x374   :  { %v2269_v1 = vpop.permute.xlu1 %2268  ;;  %v2271_v58 = vpop.permute.xlu0 %2270 }
 0x375   :  { %v2278_v53 = vadd.f32 %v2269_v1, %v2252_v10 }
 0x378   :  { %v2435_v3 = vpop.permute.xlu1 %2434  ;;  %v2437_v47 = vpop.permute.xlu0 %2436 }
 0x379   :  { %v2446_v62 = vadd.f32 %v2435_v3, %v2420_v36 }
 0x37c   :  { %v2439_v7 = vpop.permute.xlu1 %2438  ;;  %v2441_v4 = vpop.permute.xlu0 %2440 }
 0x37d   :  { %v2448_v22 = vadd.f32 %v2439_v7, %v2422_v39  ;;  %v2449_v37 = vadd.f32 %v2441_v4, %v2423_v29 }
 0x380   :  { %v2291_v25 = vpop.permute.xlu1 %2290  ;;  %v2293_v59 = vpop.permute.xlu0 %2292 }
 0x381   :  { %v2302_v34 = vadd.f32 %v2291_v25, %v2276_v46 }
 0x384   :  { %v2295_v13 = vpop.permute.xlu1 %2294  ;;  %v2297_v28 = vpop.permute.xlu0 %2296 }
 0x385   :  { %v2304_v11 = vadd.f32 %v2295_v13, %v2278_v53 }
 0x388   :  { %v2461_v26 = vpop.permute.xlu1 %2460  ;;  %v2463_v49 = vpop.permute.xlu0 %2462 }
 0x389   :  { %v2472_v57 = vadd.f32 %v2461_v26, %v2446_v62 }
 0x38c   :  { %v2465_v12 = vpop.permute.xlu1 %2464  ;;  %v2467_v30 = vpop.permute.xlu0 %2466 }
 0x38d   :  { %v2475_v39 = vadd.f32 %v2467_v30, %v2449_v37 }
 0x390   :  { %v2153_v27 = vpop.permute.xlu1 %2152  ;;  %v2317_v63 = vpop.permute.xlu0 %2316 }
 0x391   :  { %v2161_v24 = vadd.f32 %v2153_v27, %v4035_v16  ;;  %v2328_v16 = vadd.f32 %v2317_v63, %v2302_v34 }
 0x394   :  { %v2319_v55 = vpop.permute.xlu1 %2318  ;;  %v2321_v9 = vpop.permute.xlu0 %2320 }
 0x395   :  { %v2330_v25 = vadd.f32 %v2321_v9, %v2304_v11 }
 0x398   :  { %v2323_v15 = vpop.permute.xlu1 %2322  ;;  %v2487_v48 = vpop.permute.xlu0 %2486 }
 0x399   :  { %v2498_v61 = vadd.f32 %v2487_v48, %v2472_v57 }
 0x39c   :  { %v2489_v45 = vpop.permute.xlu1 %2488  ;;  %v2491_v20 = vpop.permute.xlu0 %2490 }
 0x3a0   :  { %v2493_v21 = vpop.permute.xlu1 %2492  ;;  %v2173_v33 = vpop.permute.xlu0 %2172 }
 0x3a1   :  { %v2184_v38 = vadd.f32 %v2173_v33, %v4037_v2  ;;  %v2474_v33 = vadd.f32 %v2465_v12, %v2448_v22  ;;  %v2501_v63 = vadd.f32 %v2493_v21, %v2475_v39 }
 0x3a3   :  { %v2532_v52 = vadd.f32 %v2184_v38, %v3987_v51 }
 0x3a4   :  { %v2175_v19 = vpop.permute.xlu1 %2174  ;;  %v2177_v60 = vpop.permute.xlu0 %2176 }
 0x3a5   :  { %v2185_v50 = vadd.f32 %v2175_v19, %v4039_v41  ;;  %v2186_v42 = vadd.f32 %v2177_v60, %v4041_v0  ;;  %v2277_v41 = vadd.f32 %v2267_v14, %v2251_v40  ;;  %v2447_v0 = vadd.f32 %v2437_v47, %v2421_v23 }
 0x3a6   :  { %v2500_v40 = vadd.f32 %v2491_v20, %v2474_v33 }
 0x3a7   :  { %v2533_v54 = vadd.f32 %v2185_v50, %v3993_v32  ;;  %v2534_v18 = vadd.f32 %v2186_v42, %v3995_v17  ;;  %v2303_v32 = vadd.f32 %v2293_v59, %v2277_v41  ;;  %v2473_v27 = vadd.f32 %v2463_v49, %v2447_v0 }
 0x3a8   :  { %v2179_v8 = vpop.permute.xlu1 %2178  ;;  %v2343_v35 = vpop.permute.xlu0 %2342 }
 0x3a9   :  { %v2187_v5 = vadd.f32 %v2179_v8, %v2161_v24  ;;  %v2354_v43 = vadd.f32 %v2343_v35, %v2328_v16  ;;  %v2329_v3 = vadd.f32 %v2319_v55, %v2303_v32  ;;  %v2499_v26 = vadd.f32 %v2489_v45, %v2473_v27 }
 0x3ab   :  { %v2535_v2 = vadd.f32 %v2187_v5, %v4001_v56  ;;  %v2279_v56 = vadd.f32 %v2271_v58, %v4051_v44 }
 0x3ac   :  { %v2345_v51 = vpop.permute.xlu1 %2344  ;;  %v2347_v31 = vpop.permute.xlu0 %2346 }
 0x3ad   :  { %v2305_v23 = vadd.f32 %v2297_v28, %v2279_v56  ;;  %v2355_v14 = vadd.f32 %v2345_v51, %v2329_v3  ;;  %v2356_v7 = vadd.f32 %v2347_v31, %v2330_v25 }
 0x3af   :  { %v2331_v12 = vadd.f32 %v2323_v15, %v2305_v23 }
 0x3b0   :  { %v2349_v17 = vpop.permute.xlu1 %2348  ;;  %v2513_v6 = vpop.permute.xlu0 %2512 }
 0x3b1   :  { %v2524_v36 = vadd.f32 %v2513_v6, %v2498_v61  ;;  %v2357_v29 = vadd.f32 %v2349_v17, %v2331_v12 }
 0x3b3   :  { %v2528_v10 = vadd.f32 %v2524_v36, %v2354_v43 }
 0x3b4   :  { %v2515_v1 = vpop.permute.xlu1 %2514  ;;  %v2517_v47 = vpop.permute.xlu0 %2516 }
 0x3b5   :  { %v2536_v59 = vadd.f32 %v2532_v52, %v2528_v10  ;;  %v2525_v13 = vadd.f32 %v2515_v1, %v2499_v26  ;;  %v2526_v49 = vadd.f32 %v2517_v47, %v2500_v40 }
 0x3b7   :  { %v2684_v48 = vmul.f32 -1.442695, %v2536_v59  ;;  %v2529_v38 = vadd.f32 %v2525_v13, %v2355_v14  ;;  %v2530_v44 = vadd.f32 %v2526_v49, %v2356_v7 }
 0x3b8   :  { %v2519_v58 = vpop.permute.xlu1 %2518 }
 0x3b9   :  { %2701 = vpow2.f32 %v2684_v48  ;;  %v2537_v4 = vadd.f32 %v2533_v54, %v2529_v38  ;;  %v2538_v55 = vadd.f32 %v2534_v18, %v2530_v44  ;;  %v2527_v9 = vadd.f32 %v2519_v58, %v2501_v63 }
 0x3bb   :  { %v2685_v28 = vmul.f32 -1.442695, %v2537_v4  ;;  %v2686_v30 = vmul.f32 -1.442695, %v2538_v55  ;;  %v2531_v45 = vadd.f32 %v2527_v9, %v2357_v29 }
 0x3bd   :  { %2703 = vpow2.f32 %v2685_v28  ;;  %v2539_v20 = vadd.f32 %v2535_v2, %v2531_v45 }
 0x3be   :  { %2705 = vpow2.f32 %v2686_v30 }
 0x3bf   :  { %v2687_v52 = vmul.f32 -1.442695, %v2539_v20 }
 0x3c1   :  { %2707 = vpow2.f32 %v2687_v52 }
 0x3c6   :  { %v2702_v19 = vpop.eup %2701 }
 0x3c7   :  { %v2552_v15 = vadd.f32 1.0, %v2702_v19 }
 0x3c9   :  { %2709 = vrcp.f32 %v2552_v15 }
 0x3ca   :  { %v2704_v21 = vpop.eup %2703 }
 0x3cb   :  { %v2706_v60 = vpop.eup %2705  ;;  %v2553_v50 = vadd.f32 1.0, %v2704_v21 }
 0x3cc   :  { %v2554_v42 = vadd.f32 1.0, %v2706_v60 }
 0x3cd   :  { %2711 = vrcp.f32 %v2553_v50 }
 0x3ce   :  { %v2708_v24 = vpop.eup %2707  ;;  %2713 = vrcp.f32 %v2554_v42 }
 0x3cf   :  { %v2555_v54 = vadd.f32 1.0, %v2708_v24 }
 0x3d1   :  { %2715 = vrcp.f32 %v2555_v54 }
 0x3d6   :  { %v2710_v18 = vpop.eup %2709 }
 0x3d7   :  { %2565 = vst.msk [vmem:[#allocation9] sm:$0xff] %vm2564_vm3, %v2710_v18 }
 0x3da   :  { %v2712_v8 = vpop.eup %2711 }
 0x3db   :  { %v2714_v35 = vpop.eup %2713  ;;  %2566 = vst.msk [vmem:[#allocation9 + $0x8] sm:$0xff] %vm2564_vm3, %v2712_v8 }
 0x3dc   :  { %2567 = vst.msk [vmem:[#allocation9 + $0x10] sm:$0xff] %vm2564_vm3, %v2714_v35 }
 0x3de   :  { %v2716_v5 = vpop.eup %2715 }
 0x3df   :  { %2568 = vst.msk [vmem:[#allocation9 + $0x18] sm:$0xff] %vm2564_vm3, %v2716_v5 }
 0x3e0   :  { %2763 = shalt.err (!%p2760_p0)
}
 0x3e1   :  { %2580 = dma.vmem_to_hbm [thread:$0]  %s2575_s8, 512, %s4071_s3, [#allocation6], %s2779_s18, %s2779_s18, %s2780_s19  }
 0x3e2   :  { %2776 = dma.done.wait [#allocation6], 512  }
 0x3e3   :  { %2777 = vsyncadd [#allocation6], 4294966784 }
 0x3e4   :  { %2584 = vsyncpa [#allocation5], 1 }
 0x3e5   :  { %2585 = vsyncpa [#allocation6], 1 }
 0x3e6   :  { %2586 = vsyncpa [#allocation7], 1 }

</bundles_post_ra>
